<compile_context>
chip_gen: v6e
topology: v6e:2x2x1
jax: 0.10.0
libtpu: 0.0.40
codegen_flags: <defaults>
</compile_context>

<pallas_src>
import functools

import jax
import jax.numpy as jnp
import numpy as np
from jax import lax
from jax.experimental import pallas as pl
from jax.experimental.pallas import tpu as pltpu

IN_CHANNELS = 3
C_PAD = 4                          # channels padded to 4 -> whole-sublane tap stores
OUT_CHANNELS = 16
KERNEL = 3
DIVISOR = 2.0

# Fixed spatial size used by the module's forward (16^3 input volume, cubic).
D = H = W = 16
HW = H * W                         # 256
DHW = D * HW                       # 4096
OD = D - (KERNEL - 1)              # 14 : valid conv output extent
PD = OD // 2                       # 7  : max-pool output extent

TAPS_HW = KERNEL * KERNEL          # 9 (kh, kw) lane shifts handled in-kernel
K_DIM = TAPS_HW * C_PAD            # 36 contraction rows per kd matmul (zero-padded)

TILE_W = 4 * HW                    # 1024 : 4 depth planes per column tile
N_TILES = D // 4                   # 4
MAX_SHIFT = (KERNEL - 1) * W + (KERNEL - 1)                      # 34
XS_W = (N_TILES - 1) * TILE_W + (KERNEL - 1) * HW + TILE_W       # 4608
PAD_W = 4736                       # >= XS_W + MAX_SHIFT, multiple of 128

# widths of the shifted-max pooling chain (derived so every needed index exists)
M3_W = 736                         # >= 2*HW + 12*W + 12 + 1 = 717
M2_W = M3_W + HW                   # 992
M1_W = M2_W + W                    # 1008  (TILE_W >= M1_W + 1)


def _fused_kernel(nb_per_step, x_ref, w_ref, mask_ref, k_ref, o_ref, xs_ref):
    # x_ref   : (NB, C_PAD, PAD_W) bf16    flattened, zero-padded input volumes
    # w_ref   : (KERNEL, OUT_CHANNELS, K_DIM) bf16   [kd, co, kh*12 + kw*4 + ci]
    # mask_ref: (N_TILES, M3_W) f32    static pool-cell mask * 1/(343*divisor)
    # k_ref   : (1,) f32 in SMEM       folded scalar sum_c(conv_b[c]/div + bias[c])
    # o_ref   : (1, 1, NB) f32
    # xs_ref  : (K_DIM, XS_W) bf16 scratch: 9 lane-shifted copies of the volume
    w0 = w_ref[0]
    w1 = w_ref[1]
    w2 = w_ref[2]
    lane = lax.broadcasted_iota(jnp.int32, (1, nb_per_step), 1)
    out_row = jnp.zeros((1, nb_per_step), jnp.float32)

    for nb in range(nb_per_step):          # static unroll, NB <= 8
        # --- tap matrix for the 9 (kh, kw) shifts; the kd shift is a 128-aligned
        #     column offset applied at matmul time.  Each write covers whole
        #     packed sublanes (4 bf16 rows, row 3 is the zero channel), no cast.
        for t in range(TAPS_HW):
            kh, kw = divmod(t, KERNEL)
            s = kh * W + kw
            xs_ref[C_PAD * t:C_PAD * (t + 1), :] = x_ref[nb, :, s:s + XS_W]

        total = jnp.zeros((), jnp.float32)
        for tile in range(N_TILES):
            base = tile * TILE_W
            # conv for 4 depth planes: lane-dense (16, 1024) f32 via bf16 MXU matmuls
            acc = jnp.dot(w0, xs_ref[:, base:base + TILE_W],
                          preferred_element_type=jnp.float32)
            acc = acc + jnp.dot(w1, xs_ref[:, base + HW:base + HW + TILE_W],
                                preferred_element_type=jnp.float32)
            acc = acc + jnp.dot(w2, xs_ref[:, base + 2 * HW:base + 2 * HW + TILE_W],
                                preferred_element_type=jnp.float32)

            # 2x2x2 max-pool via shifted maxima along the flattened (od, oh, ow) axis
            m1 = jnp.maximum(acc[:, 0:M1_W], acc[:, 1:M1_W + 1])      # pair over ow
            m2 = jnp.maximum(m1[:, 0:M2_W], m1[:, W:M2_W + W])        # pair over oh
            m3 = jnp.maximum(m2[:, 0:M3_W], m2[:, HW:M3_W + HW])      # pair over od

            # pool-cell selection + 1/(343*divisor) scale: precomputed constant input
            total = total + jnp.sum(m3 * mask_ref[tile:tile + 1, :])

        out_row = out_row + jnp.where(lane == nb, total, 0.0)

    o_ref[...] = (out_row + k_ref[0]).reshape(1, 1, nb_per_step)


def _pool_mask():
    """Static mask over the m3 columns selecting 2x2x2 pool-cell base positions."""
    idx = np.arange(M3_W)
    rows = []
    for tile in range(N_TILES):
        od = 4 * tile + idx // HW
        rem = idx % HW
        oh = rem // W
        ow = rem % W
        # NOTE: cubic input assumed (D == H == W), so OD bounds apply to all axes.
        valid = ((od % 2 == 0) & (od <= OD - 2) &
                 (oh % 2 == 0) & (oh <= OD - 2) &
                 (ow % 2 == 0) & (ow <= OD - 2))
        rows.append(valid)
    mask = np.stack(rows)
    assert int(mask.sum()) == PD ** 3          # 343 pool cells total
    return mask.astype(np.float32) * np.float32(1.0 / (PD ** 3 * DIVISOR))


def _choose_nb(batch):
    """Samples per grid step: amortise per-step overhead, keep >= 2 grid steps."""
    if batch >= 16:
        return 8
    if batch >= 8:
        return 4
    if batch >= 4:
        return 2
    return 1


def model_forward(x, conv_w, conv_b, fused_bias):
    """x: (B, 3, 16, 16, 16) float32. Returns (B, 1, 1, 1) like torch.sum(..., dim=1)."""
    B, Cin, d, h, w = x.shape
    assert (Cin, d, h, w) == (IN_CHANNELS, D, H, W)
    assert D == H == W  # pool mask / shift geometry assumes a cubic volume
    # NOTE: conv output (14^3) is even, so MaxPool3d floor semantics are exact here.

    nb = _choose_nb(B)
    g = -(-B // nb)
    b_pad = g * nb

    # flatten spatial dims, zero-pad batch/channels/width, downcast to bf16 in HBM
    xflat = x.reshape(B, IN_CHANNELS, DHW)
    xpad = jnp.pad(
        xflat, ((0, b_pad - B), (0, C_PAD - IN_CHANNELS), (0, PAD_W - DHW))
    ).astype(jnp.bfloat16)

    # weights reordered to [kd, co, kh*12 + kw*4 + ci] (ci padded 3->4 with zeros)
    wk = jnp.transpose(conv_w, (2, 0, 3, 4, 1))                 # (kd, co, kh, kw, ci)
    wk = jnp.pad(wk, ((0, 0), (0, 0), (0, 0), (0, 0), (0, C_PAD - IN_CHANNELS)))
    wk = wk.reshape(KERNEL, OUT_CHANNELS, K_DIM).astype(jnp.bfloat16)

    # conv bias and fused bias commute through max-pool / mean -> fold to one scalar
    kconst = (jnp.sum(conv_b) / DIVISOR + jnp.sum(fused_bias)).reshape(1)
    kconst = kconst.astype(jnp.float32)

    mask = jnp.asarray(_pool_mask())                            # (N_TILES, M3_W) f32

    out = pl.pallas_call(
        functools.partial(_fused_kernel, nb),
        out_shape=jax.ShapeDtypeStruct((g, 1, nb), jnp.float32),
        grid_spec=pltpu.PrefetchScalarGridSpec(
            num_scalar_prefetch=0,
            grid=(g,),
            in_specs=[
                pl.BlockSpec((nb, C_PAD, PAD_W), lambda i: (i, 0, 0)),
                pl.BlockSpec((KERNEL, OUT_CHANNELS, K_DIM), lambda i: (0, 0, 0)),
                pl.BlockSpec((N_TILES, M3_W), lambda i: (0, 0)),
                pl.BlockSpec(memory_space=pltpu.MemorySpace.SMEM),
            ],
            out_specs=pl.BlockSpec((1, 1, nb), lambda i: (i, 0, 0)),
            scratch_shapes=[pltpu.VMEM((K_DIM, XS_W), jnp.bfloat16)],
        ),
        compiler_params=pltpu.CompilerParams(dimension_semantics=("parallel",)),
    )(xpad, wk, mask, kconst)

    return out.reshape(b_pad, 1, 1, 1)[:B]


def reference(x, conv_w, conv_b, fused_bias):
    """Pure-JAX (f32) reference mirroring the PyTorch module."""
    y = lax.conv_general_dilated(
        x, conv_w, window_strides=(1, 1, 1), padding="VALID",
        dimension_numbers=("NCDHW", "OIDHW", "NCDHW"))
    y = y + conv_b.reshape(1, -1, 1, 1, 1)
    y = lax.reduce_window(y, -jnp.inf, lax.max,
                          window_dimensions=(1, 1, 2, 2, 2),
                          window_strides=(1, 1, 2, 2, 2), padding="VALID")
    y = jnp.mean(y, axis=(2, 3, 4), keepdims=True)
    y = y / DIVISOR + fused_bias.reshape(1, -1, 1, 1, 1)
    return jnp.sum(y, axis=1)


if __name__ == "__main__":
    key = jax.random.PRNGKey(0)
    k1, k2, k3, k4 = jax.random.split(key, 4)

    # Deterministic synthetic parameters (shapes from the module's __init__).
    conv_w = jax.random.normal(
        k2, (OUT_CHANNELS, IN_CHANNELS, KERNEL, KERNEL, KERNEL), dtype=jnp.float32) * 0.1
    conv_b = jax.random.normal(k3, (OUT_CHANNELS,), dtype=jnp.float32) * 0.1
    fused_bias = jax.random.normal(k4, (OUT_CHANNELS, 1, 1, 1), dtype=jnp.float32)

    fwd = jax.jit(model_forward)

    # B=2 exercises NB=1 (grid=2); B=8 exercises NB=4 multi-sample grid steps.
    for batch in (2, 8):
        kx = jax.random.fold_in(k1, batch)
        x = jax.random.normal(kx, (batch, IN_CHANNELS, D, H, W), dtype=jnp.float32)

        out = jax.block_until_ready(fwd(x, conv_w, conv_b, fused_bias))
        ref = reference(x, conv_w, conv_b, fused_bias)

        assert out.shape == (batch, 1, 1, 1), out.shape
        # bf16 inputs + bf16 weights (f32 accumulation) vs f32 reference.
        np.testing.assert_allclose(np.asarray(out), np.asarray(ref),
                                   rtol=2e-2, atol=5e-2)

    print("KERNEL_OK")
</pallas_src>

<mosaic_0001>
module attributes {stable_mosaic.version = 11 : i64} {
  func.func @_fused_kernel(%arg0: i32, %arg1: memref<1x4x4736xbf16, #tpu.memory_space<vmem>>, %arg2: memref<3x16x36xbf16, #tpu.memory_space<vmem>>, %arg3: memref<4x736xf32, #tpu.memory_space<vmem>>, %arg4: memref<1xf32, #tpu.memory_space<smem>>, %arg5: memref<1x1x1xf32, #tpu.memory_space<vmem>>, %arg6: memref<36x4608xbf16, #tpu.memory_space<vmem>>) attributes {dimension_semantics = [#tpu.dimension_semantics<parallel>], iteration_bounds = array<i64: 2>, scalar_prefetch = 0 : i64, scratch_operands = 1 : i64, tpu.core_type = #tpu.core_type<tc>, window_params = [{transform_indices = @transform_0, window_bounds = array<i64: 1, 4, 4736>}, {pipeline_mode = #tpu.pipeline_mode<synchronous>, transform_indices = @transform_1, window_bounds = array<i64: 3, 16, 36>}, {pipeline_mode = #tpu.pipeline_mode<synchronous>, transform_indices = @transform_2, window_bounds = array<i64: 4, 736>}, {transform_indices = @transform_3, window_bounds = array<i64: 1>}, {transform_indices = @transform_4, window_bounds = array<i64: 1, 1, 1>}]} {
    %c0 = arith.constant 0 : index
    %c0_0 = arith.constant 0 : index
    %c0_1 = arith.constant 0 : index
    %0 = vector.load %arg2[%c0, %c0_0, %c0_1] : memref<3x16x36xbf16, #tpu.memory_space<vmem>>, vector<1x16x36xbf16>
    %1 = vector.shape_cast %0 : vector<1x16x36xbf16> to vector<16x36xbf16>
    %c1 = arith.constant 1 : index
    %c0_2 = arith.constant 0 : index
    %c0_3 = arith.constant 0 : index
    %2 = vector.load %arg2[%c1, %c0_2, %c0_3] : memref<3x16x36xbf16, #tpu.memory_space<vmem>>, vector<1x16x36xbf16>
    %3 = vector.shape_cast %2 : vector<1x16x36xbf16> to vector<16x36xbf16>
    %c2 = arith.constant 2 : index
    %c0_4 = arith.constant 0 : index
    %c0_5 = arith.constant 0 : index
    %4 = vector.load %arg2[%c2, %c0_4, %c0_5] : memref<3x16x36xbf16, #tpu.memory_space<vmem>>, vector<1x16x36xbf16>
    %5 = vector.shape_cast %4 : vector<1x16x36xbf16> to vector<16x36xbf16>
    %6 = tpu.iota {dimensions = array<i32: 1>} : vector<1x1xi32>
    %cst = arith.constant 0.000000e+00 : f32
    %7 = vector.broadcast %cst : f32 to vector<1x1xf32>
    %c0_6 = arith.constant 0 : index
    %c0_7 = arith.constant 0 : index
    %c0_8 = arith.constant 0 : index
    %8 = vector.load %arg1[%c0_6, %c0_7, %c0_8] : memref<1x4x4736xbf16, #tpu.memory_space<vmem>>, vector<1x4x4608xbf16>
    %9 = vector.shape_cast %8 : vector<1x4x4608xbf16> to vector<4x4608xbf16>
    %c0_9 = arith.constant 0 : index
    %c0_10 = arith.constant 0 : index
    %10 = vector.load %arg6[%c0_9, %c0_10] : memref<36x4608xbf16, #tpu.memory_space<vmem>>, vector<4x4608xbf16>
    tpu.vector_store %arg6[%c0_9, %c0_10], %9 {strides = array<i32>} : memref<36x4608xbf16, #tpu.memory_space<vmem>>, vector<4x4608xbf16>,
    %c0_11 = arith.constant 0 : index
    %c0_12 = arith.constant 0 : index
    %c1_13 = arith.constant 1 : index
    %11 = vector.load %arg1[%c0_11, %c0_12, %c1_13] : memref<1x4x4736xbf16, #tpu.memory_space<vmem>>, vector<1x4x4608xbf16>
    %12 = vector.shape_cast %11 : vector<1x4x4608xbf16> to vector<4x4608xbf16>
    %c4 = arith.constant 4 : index
    %c0_14 = arith.constant 0 : index
    %13 = vector.load %arg6[%c4, %c0_14] : memref<36x4608xbf16, #tpu.memory_space<vmem>>, vector<4x4608xbf16>
    tpu.vector_store %arg6[%c4, %c0_14], %12 {strides = array<i32>} : memref<36x4608xbf16, #tpu.memory_space<vmem>>, vector<4x4608xbf16>,
    %c0_15 = arith.constant 0 : index
    %c0_16 = arith.constant 0 : index
    %c2_17 = arith.constant 2 : index
    %14 = vector.load %arg1[%c0_15, %c0_16, %c2_17] : memref<1x4x4736xbf16, #tpu.memory_space<vmem>>, vector<1x4x4608xbf16>
    %15 = vector.shape_cast %14 : vector<1x4x4608xbf16> to vector<4x4608xbf16>
    %c8 = arith.constant 8 : index
    %c0_18 = arith.constant 0 : index
    %16 = vector.load %arg6[%c8, %c0_18] : memref<36x4608xbf16, #tpu.memory_space<vmem>>, vector<4x4608xbf16>
    tpu.vector_store %arg6[%c8, %c0_18], %15 {strides = array<i32>} : memref<36x4608xbf16, #tpu.memory_space<vmem>>, vector<4x4608xbf16>,
    %c0_19 = arith.constant 0 : index
    %c0_20 = arith.constant 0 : index
    %c16 = arith.constant 16 : index
    %17 = vector.load %arg1[%c0_19, %c0_20, %c16] : memref<1x4x4736xbf16, #tpu.memory_space<vmem>>, vector<1x4x4608xbf16>
    %18 = vector.shape_cast %17 : vector<1x4x4608xbf16> to vector<4x4608xbf16>
    %c12 = arith.constant 12 : index
    %c0_21 = arith.constant 0 : index
    %19 = vector.load %arg6[%c12, %c0_21] : memref<36x4608xbf16, #tpu.memory_space<vmem>>, vector<4x4608xbf16>
    tpu.vector_store %arg6[%c12, %c0_21], %18 {strides = array<i32>} : memref<36x4608xbf16, #tpu.memory_space<vmem>>, vector<4x4608xbf16>,
    %c0_22 = arith.constant 0 : index
    %c0_23 = arith.constant 0 : index
    %c17 = arith.constant 17 : index
    %20 = vector.load %arg1[%c0_22, %c0_23, %c17] : memref<1x4x4736xbf16, #tpu.memory_space<vmem>>, vector<1x4x4608xbf16>
    %21 = vector.shape_cast %20 : vector<1x4x4608xbf16> to vector<4x4608xbf16>
    %c16_24 = arith.constant 16 : index
    %c0_25 = arith.constant 0 : index
    %22 = vector.load %arg6[%c16_24, %c0_25] : memref<36x4608xbf16, #tpu.memory_space<vmem>>, vector<4x4608xbf16>
    tpu.vector_store %arg6[%c16_24, %c0_25], %21 {strides = array<i32>} : memref<36x4608xbf16, #tpu.memory_space<vmem>>, vector<4x4608xbf16>,
    %c0_26 = arith.constant 0 : index
    %c0_27 = arith.constant 0 : index
    %c18 = arith.constant 18 : index
    %23 = vector.load %arg1[%c0_26, %c0_27, %c18] : memref<1x4x4736xbf16, #tpu.memory_space<vmem>>, vector<1x4x4608xbf16>
    %24 = vector.shape_cast %23 : vector<1x4x4608xbf16> to vector<4x4608xbf16>
    %c20 = arith.constant 20 : index
    %c0_28 = arith.constant 0 : index
    %25 = vector.load %arg6[%c20, %c0_28] : memref<36x4608xbf16, #tpu.memory_space<vmem>>, vector<4x4608xbf16>
    tpu.vector_store %arg6[%c20, %c0_28], %24 {strides = array<i32>} : memref<36x4608xbf16, #tpu.memory_space<vmem>>, vector<4x4608xbf16>,
    %c0_29 = arith.constant 0 : index
    %c0_30 = arith.constant 0 : index
    %c32 = arith.constant 32 : index
    %26 = vector.load %arg1[%c0_29, %c0_30, %c32] : memref<1x4x4736xbf16, #tpu.memory_space<vmem>>, vector<1x4x4608xbf16>
    %27 = vector.shape_cast %26 : vector<1x4x4608xbf16> to vector<4x4608xbf16>
    %c24 = arith.constant 24 : index
    %c0_31 = arith.constant 0 : index
    %28 = vector.load %arg6[%c24, %c0_31] : memref<36x4608xbf16, #tpu.memory_space<vmem>>, vector<4x4608xbf16>
    tpu.vector_store %arg6[%c24, %c0_31], %27 {strides = array<i32>} : memref<36x4608xbf16, #tpu.memory_space<vmem>>, vector<4x4608xbf16>,
    %c0_32 = arith.constant 0 : index
    %c0_33 = arith.constant 0 : index
    %c33 = arith.constant 33 : index
    %29 = vector.load %arg1[%c0_32, %c0_33, %c33] : memref<1x4x4736xbf16, #tpu.memory_space<vmem>>, vector<1x4x4608xbf16>
    %30 = vector.shape_cast %29 : vector<1x4x4608xbf16> to vector<4x4608xbf16>
    %c28 = arith.constant 28 : index
    %c0_34 = arith.constant 0 : index
    %31 = vector.load %arg6[%c28, %c0_34] : memref<36x4608xbf16, #tpu.memory_space<vmem>>, vector<4x4608xbf16>
    tpu.vector_store %arg6[%c28, %c0_34], %30 {strides = array<i32>} : memref<36x4608xbf16, #tpu.memory_space<vmem>>, vector<4x4608xbf16>,
    %c0_35 = arith.constant 0 : index
    %c0_36 = arith.constant 0 : index
    %c34 = arith.constant 34 : index
    %32 = vector.load %arg1[%c0_35, %c0_36, %c34] : memref<1x4x4736xbf16, #tpu.memory_space<vmem>>, vector<1x4x4608xbf16>
    %33 = vector.shape_cast %32 : vector<1x4x4608xbf16> to vector<4x4608xbf16>
    %c32_37 = arith.constant 32 : index
    %c0_38 = arith.constant 0 : index
    %34 = vector.load %arg6[%c32_37, %c0_38] : memref<36x4608xbf16, #tpu.memory_space<vmem>>, vector<4x4608xbf16>
    tpu.vector_store %arg6[%c32_37, %c0_38], %33 {strides = array<i32>} : memref<36x4608xbf16, #tpu.memory_space<vmem>>, vector<4x4608xbf16>,
    %c0_39 = arith.constant 0 : index
    %c0_40 = arith.constant 0 : index
    %35 = vector.load %arg6[%c0_39, %c0_40] : memref<36x4608xbf16, #tpu.memory_space<vmem>>, vector<36x1024xbf16>
    %cst_41 = arith.constant dense<0.000000e+00> : vector<16x1024xf32>
    %36 = tpu.matmul %1, %35, %cst_41 {dimension_numbers = #tpu.dot_dimension_numbers<[1], [0], [0], [1], [0, 0, 1, 1], [], []>} : vector<16x36xbf16>, vector<36x1024xbf16>, vector<16x1024xf32> -> vector<16x1024xf32>
    %c0_42 = arith.constant 0 : index
    %c256 = arith.constant 256 : index
    %37 = vector.load %arg6[%c0_42, %c256] : memref<36x4608xbf16, #tpu.memory_space<vmem>>, vector<36x1024xbf16>
    %cst_43 = arith.constant dense<0.000000e+00> : vector<16x1024xf32>
    %38 = tpu.matmul %3, %37, %cst_43 {dimension_numbers = #tpu.dot_dimension_numbers<[1], [0], [0], [1], [0, 0, 1, 1], [], []>} : vector<16x36xbf16>, vector<36x1024xbf16>, vector<16x1024xf32> -> vector<16x1024xf32>
    %39 = arith.addf %36, %38 : vector<16x1024xf32>
    %c0_44 = arith.constant 0 : index
    %c512 = arith.constant 512 : index
    %40 = vector.load %arg6[%c0_44, %c512] : memref<36x4608xbf16, #tpu.memory_space<vmem>>, vector<36x1024xbf16>
    %cst_45 = arith.constant dense<0.000000e+00> : vector<16x1024xf32>
    %41 = tpu.matmul %5, %40, %cst_45 {dimension_numbers = #tpu.dot_dimension_numbers<[1], [0], [0], [1], [0, 0, 1, 1], [], []>} : vector<16x36xbf16>, vector<36x1024xbf16>, vector<16x1024xf32> -> vector<16x1024xf32>
    %42 = arith.addf %39, %41 : vector<16x1024xf32>
    %43 = vector.extract_strided_slice %42 {offsets = [0, 0], sizes = [16, 1008], strides = [1, 1]} : vector<16x1024xf32> to vector<16x1008xf32>
    %44 = vector.extract_strided_slice %42 {offsets = [0, 1], sizes = [16, 1008], strides = [1, 1]} : vector<16x1024xf32> to vector<16x1008xf32>
    %45 = arith.maximumf %43, %44 : vector<16x1008xf32>
    %46 = vector.extract_strided_slice %45 {offsets = [0, 0], sizes = [16, 992], strides = [1, 1]} : vector<16x1008xf32> to vector<16x992xf32>
    %47 = vector.extract_strided_slice %45 {offsets = [0, 16], sizes = [16, 992], strides = [1, 1]} : vector<16x1008xf32> to vector<16x992xf32>
    %48 = arith.maximumf %46, %47 : vector<16x992xf32>
    %49 = vector.extract_strided_slice %48 {offsets = [0, 0], sizes = [16, 736], strides = [1, 1]} : vector<16x992xf32> to vector<16x736xf32>
    %50 = vector.extract_strided_slice %48 {offsets = [0, 256], sizes = [16, 736], strides = [1, 1]} : vector<16x992xf32> to vector<16x736xf32>
    %51 = arith.maximumf %49, %50 : vector<16x736xf32>
    %c0_46 = arith.constant 0 : index
    %c0_47 = arith.constant 0 : index
    %52 = vector.load %arg3[%c0_46, %c0_47] : memref<4x736xf32, #tpu.memory_space<vmem>>, vector<1x736xf32>
    %53 = vector.broadcast %52 : vector<1x736xf32> to vector<16x736xf32>
    %54 = arith.mulf %51, %53 : vector<16x736xf32>
    %55 = vector.shape_cast %54 : vector<16x736xf32> to vector<1x16x736xf32>
    %cst_48 = arith.constant dense<0.000000e+00> : vector<1xf32>
    %56 = vector.multi_reduction <add>, %55, %cst_48 [1, 2] : vector<1x16x736xf32> to vector<1xf32>
    %57 = vector.shape_cast %56 : vector<1xf32> to vector<1x1x1xf32>
    %58 = vector.extract %57[0, 0, 0] : f32 from vector<1x1x1xf32>
    %cst_49 = arith.constant 0.000000e+00 : f32
    %59 = arith.addf %cst_49, %58 : f32
    %c0_50 = arith.constant 0 : index
    %c1024 = arith.constant 1024 : index
    %60 = vector.load %arg6[%c0_50, %c1024] : memref<36x4608xbf16, #tpu.memory_space<vmem>>, vector<36x1024xbf16>
    %cst_51 = arith.constant dense<0.000000e+00> : vector<16x1024xf32>
    %61 = tpu.matmul %1, %60, %cst_51 {dimension_numbers = #tpu.dot_dimension_numbers<[1], [0], [0], [1], [0, 0, 1, 1], [], []>} : vector<16x36xbf16>, vector<36x1024xbf16>, vector<16x1024xf32> -> vector<16x1024xf32>
    %c0_52 = arith.constant 0 : index
    %c1280 = arith.constant 1280 : index
    %62 = vector.load %arg6[%c0_52, %c1280] : memref<36x4608xbf16, #tpu.memory_space<vmem>>, vector<36x1024xbf16>
    %cst_53 = arith.constant dense<0.000000e+00> : vector<16x1024xf32>
    %63 = tpu.matmul %3, %62, %cst_53 {dimension_numbers = #tpu.dot_dimension_numbers<[1], [0], [0], [1], [0, 0, 1, 1], [], []>} : vector<16x36xbf16>, vector<36x1024xbf16>, vector<16x1024xf32> -> vector<16x1024xf32>
    %64 = arith.addf %61, %63 : vector<16x1024xf32>
    %c0_54 = arith.constant 0 : index
    %c1536 = arith.constant 1536 : index
    %65 = vector.load %arg6[%c0_54, %c1536] : memref<36x4608xbf16, #tpu.memory_space<vmem>>, vector<36x1024xbf16>
    %cst_55 = arith.constant dense<0.000000e+00> : vector<16x1024xf32>
    %66 = tpu.matmul %5, %65, %cst_55 {dimension_numbers = #tpu.dot_dimension_numbers<[1], [0], [0], [1], [0, 0, 1, 1], [], []>} : vector<16x36xbf16>, vector<36x1024xbf16>, vector<16x1024xf32> -> vector<16x1024xf32>
    %67 = arith.addf %64, %66 : vector<16x1024xf32>
    %68 = vector.extract_strided_slice %67 {offsets = [0, 0], sizes = [16, 1008], strides = [1, 1]} : vector<16x1024xf32> to vector<16x1008xf32>
    %69 = vector.extract_strided_slice %67 {offsets = [0, 1], sizes = [16, 1008], strides = [1, 1]} : vector<16x1024xf32> to vector<16x1008xf32>
    %70 = arith.maximumf %68, %69 : vector<16x1008xf32>
    %71 = vector.extract_strided_slice %70 {offsets = [0, 0], sizes = [16, 992], strides = [1, 1]} : vector<16x1008xf32> to vector<16x992xf32>
    %72 = vector.extract_strided_slice %70 {offsets = [0, 16], sizes = [16, 992], strides = [1, 1]} : vector<16x1008xf32> to vector<16x992xf32>
    %73 = arith.maximumf %71, %72 : vector<16x992xf32>
    %74 = vector.extract_strided_slice %73 {offsets = [0, 0], sizes = [16, 736], strides = [1, 1]} : vector<16x992xf32> to vector<16x736xf32>
    %75 = vector.extract_strided_slice %73 {offsets = [0, 256], sizes = [16, 736], strides = [1, 1]} : vector<16x992xf32> to vector<16x736xf32>
    %76 = arith.maximumf %74, %75 : vector<16x736xf32>
    %c1_56 = arith.constant 1 : index
    %c0_57 = arith.constant 0 : index
    %77 = vector.load %arg3[%c1_56, %c0_57] : memref<4x736xf32, #tpu.memory_space<vmem>>, vector<1x736xf32>
    %78 = vector.broadcast %77 : vector<1x736xf32> to vector<16x736xf32>
    %79 = arith.mulf %76, %78 : vector<16x736xf32>
    %80 = vector.shape_cast %79 : vector<16x736xf32> to vector<1x16x736xf32>
    %cst_58 = arith.constant dense<0.000000e+00> : vector<1xf32>
    %81 = vector.multi_reduction <add>, %80, %cst_58 [1, 2] : vector<1x16x736xf32> to vector<1xf32>
    %82 = vector.shape_cast %81 : vector<1xf32> to vector<1x1x1xf32>
    %83 = vector.extract %82[0, 0, 0] : f32 from vector<1x1x1xf32>
    %84 = arith.addf %59, %83 : f32
    %c0_59 = arith.constant 0 : index
    %c2048 = arith.constant 2048 : index
    %85 = vector.load %arg6[%c0_59, %c2048] : memref<36x4608xbf16, #tpu.memory_space<vmem>>, vector<36x1024xbf16>
    %cst_60 = arith.constant dense<0.000000e+00> : vector<16x1024xf32>
    %86 = tpu.matmul %1, %85, %cst_60 {dimension_numbers = #tpu.dot_dimension_numbers<[1], [0], [0], [1], [0, 0, 1, 1], [], []>} : vector<16x36xbf16>, vector<36x1024xbf16>, vector<16x1024xf32> -> vector<16x1024xf32>
    %c0_61 = arith.constant 0 : index
    %c2304 = arith.constant 2304 : index
    %87 = vector.load %arg6[%c0_61, %c2304] : memref<36x4608xbf16, #tpu.memory_space<vmem>>, vector<36x1024xbf16>
    %cst_62 = arith.constant dense<0.000000e+00> : vector<16x1024xf32>
    %88 = tpu.matmul %3, %87, %cst_62 {dimension_numbers = #tpu.dot_dimension_numbers<[1], [0], [0], [1], [0, 0, 1, 1], [], []>} : vector<16x36xbf16>, vector<36x1024xbf16>, vector<16x1024xf32> -> vector<16x1024xf32>
    %89 = arith.addf %86, %88 : vector<16x1024xf32>
    %c0_63 = arith.constant 0 : index
    %c2560 = arith.constant 2560 : index
    %90 = vector.load %arg6[%c0_63, %c2560] : memref<36x4608xbf16, #tpu.memory_space<vmem>>, vector<36x1024xbf16>
    %cst_64 = arith.constant dense<0.000000e+00> : vector<16x1024xf32>
    %91 = tpu.matmul %5, %90, %cst_64 {dimension_numbers = #tpu.dot_dimension_numbers<[1], [0], [0], [1], [0, 0, 1, 1], [], []>} : vector<16x36xbf16>, vector<36x1024xbf16>, vector<16x1024xf32> -> vector<16x1024xf32>
    %92 = arith.addf %89, %91 : vector<16x1024xf32>
    %93 = vector.extract_strided_slice %92 {offsets = [0, 0], sizes = [16, 1008], strides = [1, 1]} : vector<16x1024xf32> to vector<16x1008xf32>
    %94 = vector.extract_strided_slice %92 {offsets = [0, 1], sizes = [16, 1008], strides = [1, 1]} : vector<16x1024xf32> to vector<16x1008xf32>
    %95 = arith.maximumf %93, %94 : vector<16x1008xf32>
    %96 = vector.extract_strided_slice %95 {offsets = [0, 0], sizes = [16, 992], strides = [1, 1]} : vector<16x1008xf32> to vector<16x992xf32>
    %97 = vector.extract_strided_slice %95 {offsets = [0, 16], sizes = [16, 992], strides = [1, 1]} : vector<16x1008xf32> to vector<16x992xf32>
    %98 = arith.maximumf %96, %97 : vector<16x992xf32>
    %99 = vector.extract_strided_slice %98 {offsets = [0, 0], sizes = [16, 736], strides = [1, 1]} : vector<16x992xf32> to vector<16x736xf32>
    %100 = vector.extract_strided_slice %98 {offsets = [0, 256], sizes = [16, 736], strides = [1, 1]} : vector<16x992xf32> to vector<16x736xf32>
    %101 = arith.maximumf %99, %100 : vector<16x736xf32>
    %c2_65 = arith.constant 2 : index
    %c0_66 = arith.constant 0 : index
    %102 = vector.load %arg3[%c2_65, %c0_66] : memref<4x736xf32, #tpu.memory_space<vmem>>, vector<1x736xf32>
    %103 = vector.broadcast %102 : vector<1x736xf32> to vector<16x736xf32>
    %104 = arith.mulf %101, %103 : vector<16x736xf32>
    %105 = vector.shape_cast %104 : vector<16x736xf32> to vector<1x16x736xf32>
    %cst_67 = arith.constant dense<0.000000e+00> : vector<1xf32>
    %106 = vector.multi_reduction <add>, %105, %cst_67 [1, 2] : vector<1x16x736xf32> to vector<1xf32>
    %107 = vector.shape_cast %106 : vector<1xf32> to vector<1x1x1xf32>
    %108 = vector.extract %107[0, 0, 0] : f32 from vector<1x1x1xf32>
    %109 = arith.addf %84, %108 : f32
    %c0_68 = arith.constant 0 : index
    %c3072 = arith.constant 3072 : index
    %110 = vector.load %arg6[%c0_68, %c3072] : memref<36x4608xbf16, #tpu.memory_space<vmem>>, vector<36x1024xbf16>
    %cst_69 = arith.constant dense<0.000000e+00> : vector<16x1024xf32>
    %111 = tpu.matmul %1, %110, %cst_69 {dimension_numbers = #tpu.dot_dimension_numbers<[1], [0], [0], [1], [0, 0, 1, 1], [], []>} : vector<16x36xbf16>, vector<36x1024xbf16>, vector<16x1024xf32> -> vector<16x1024xf32>
    %c0_70 = arith.constant 0 : index
    %c3328 = arith.constant 3328 : index
    %112 = vector.load %arg6[%c0_70, %c3328] : memref<36x4608xbf16, #tpu.memory_space<vmem>>, vector<36x1024xbf16>
    %cst_71 = arith.constant dense<0.000000e+00> : vector<16x1024xf32>
    %113 = tpu.matmul %3, %112, %cst_71 {dimension_numbers = #tpu.dot_dimension_numbers<[1], [0], [0], [1], [0, 0, 1, 1], [], []>} : vector<16x36xbf16>, vector<36x1024xbf16>, vector<16x1024xf32> -> vector<16x1024xf32>
    %114 = arith.addf %111, %113 : vector<16x1024xf32>
    %c0_72 = arith.constant 0 : index
    %c3584 = arith.constant 3584 : index
    %115 = vector.load %arg6[%c0_72, %c3584] : memref<36x4608xbf16, #tpu.memory_space<vmem>>, vector<36x1024xbf16>
    %cst_73 = arith.constant dense<0.000000e+00> : vector<16x1024xf32>
    %116 = tpu.matmul %5, %115, %cst_73 {dimension_numbers = #tpu.dot_dimension_numbers<[1], [0], [0], [1], [0, 0, 1, 1], [], []>} : vector<16x36xbf16>, vector<36x1024xbf16>, vector<16x1024xf32> -> vector<16x1024xf32>
    %117 = arith.addf %114, %116 : vector<16x1024xf32>
    %118 = vector.extract_strided_slice %117 {offsets = [0, 0], sizes = [16, 1008], strides = [1, 1]} : vector<16x1024xf32> to vector<16x1008xf32>
    %119 = vector.extract_strided_slice %117 {offsets = [0, 1], sizes = [16, 1008], strides = [1, 1]} : vector<16x1024xf32> to vector<16x1008xf32>
    %120 = arith.maximumf %118, %119 : vector<16x1008xf32>
    %121 = vector.extract_strided_slice %120 {offsets = [0, 0], sizes = [16, 992], strides = [1, 1]} : vector<16x1008xf32> to vector<16x992xf32>
    %122 = vector.extract_strided_slice %120 {offsets = [0, 16], sizes = [16, 992], strides = [1, 1]} : vector<16x1008xf32> to vector<16x992xf32>
    %123 = arith.maximumf %121, %122 : vector<16x992xf32>
    %124 = vector.extract_strided_slice %123 {offsets = [0, 0], sizes = [16, 736], strides = [1, 1]} : vector<16x992xf32> to vector<16x736xf32>
    %125 = vector.extract_strided_slice %123 {offsets = [0, 256], sizes = [16, 736], strides = [1, 1]} : vector<16x992xf32> to vector<16x736xf32>
    %126 = arith.maximumf %124, %125 : vector<16x736xf32>
    %c3 = arith.constant 3 : index
    %c0_74 = arith.constant 0 : index
    %127 = vector.load %arg3[%c3, %c0_74] : memref<4x736xf32, #tpu.memory_space<vmem>>, vector<1x736xf32>
    %128 = vector.broadcast %127 : vector<1x736xf32> to vector<16x736xf32>
    %129 = arith.mulf %126, %128 : vector<16x736xf32>
    %130 = vector.shape_cast %129 : vector<16x736xf32> to vector<1x16x736xf32>
    %cst_75 = arith.constant dense<0.000000e+00> : vector<1xf32>
    %131 = vector.multi_reduction <add>, %130, %cst_75 [1, 2] : vector<1x16x736xf32> to vector<1xf32>
    %132 = vector.shape_cast %131 : vector<1xf32> to vector<1x1x1xf32>
    %133 = vector.extract %132[0, 0, 0] : f32 from vector<1x1x1xf32>
    %134 = arith.addf %109, %133 : f32
    %c0_i32 = arith.constant 0 : i32
    %135 = vector.broadcast %c0_i32 : i32 to vector<1x1xi32>
    %136 = arith.cmpi eq, %6, %135 : vector<1x1xi32>
    %cst_76 = arith.constant 0.000000e+00 : f32
    %137 = vector.broadcast %134 : f32 to vector<1x1xf32>
    %138 = vector.broadcast %cst_76 : f32 to vector<1x1xf32>
    %139 = arith.select %136, %137, %138 : vector<1x1xi1>, vector<1x1xf32>
    %140 = arith.addf %7, %139 : vector<1x1xf32>
    %c0_77 = arith.constant 0 : index
    %141 = memref.load %arg4[%c0_77] : memref<1xf32, #tpu.memory_space<smem>>
    %142 = vector.broadcast %141 : f32 to vector<1x1xf32>
    %143 = arith.addf %140, %142 : vector<1x1xf32>
    %144 = vector.shape_cast %143 : vector<1x1xf32> to vector<1x1x1xf32>
    %c0_78 = arith.constant 0 : index
    %c0_79 = arith.constant 0 : index
    %c0_80 = arith.constant 0 : index
    %145 = vector.load %arg5[%c0_78, %c0_79, %c0_80] : memref<1x1x1xf32, #tpu.memory_space<vmem>>, vector<1x1x1xf32>
    tpu.vector_store %arg5[%c0_78, %c0_79, %c0_80], %144 {strides = array<i32>} : memref<1x1x1xf32, #tpu.memory_space<vmem>>, vector<1x1x1xf32>,
    return
  }
  func.func @transform_0(%arg0: i32) -> (i32, i32, i32) {
    %c0_i32 = arith.constant 0 : i32
    %c0_i32_0 = arith.constant 0 : i32
    %c0_i32_1 = arith.constant 0 : i32
    return %arg0, %c0_i32, %c0_i32_0 : i32, i32, i32
  }
  func.func @transform_1(%arg0: i32) -> (i32, i32, i32) {
    %c0_i32 = arith.constant 0 : i32
    %c0_i32_0 = arith.constant 0 : i32
    %c0_i32_1 = arith.constant 0 : i32
    %c0_i32_2 = arith.constant 0 : i32
    return %c0_i32, %c0_i32_0, %c0_i32_1 : i32, i32, i32
  }
  func.func @transform_2(%arg0: i32) -> (i32, i32) {
    %c0_i32 = arith.constant 0 : i32
    %c0_i32_0 = arith.constant 0 : i32
    %c0_i32_1 = arith.constant 0 : i32
    return %c0_i32, %c0_i32_0 : i32, i32
  }
  func.func @transform_3(%arg0: i32) -> i32 {
    %c0_i32 = arith.constant 0 : i32
    %c0_i32_0 = arith.constant 0 : i32
    return %c0_i32 : i32
  }
  func.func @transform_4(%arg0: i32) -> (i32, i32, i32) {
    %c0_i32 = arith.constant 0 : i32
    %c0_i32_0 = arith.constant 0 : i32
    %c0_i32_1 = arith.constant 0 : i32
    return %arg0, %c0_i32, %c0_i32_0 : i32, i32, i32
  }
}

</mosaic_0001>

<bundles_post_ra>
// kernel: model_forward.1
= control target key start
LH: loop header
LB: loop body
LE: loop exit
PB: predicated region body
PF: predicated region fallthrough
CT: control target
= control target key end

     0   :  { %s7952_s17 = smov 0   ;;  %s11632_s0 = inlined_call_operand.vmem [shape: bf16[2,4,4736], index: 0, kind: input, shape index: {}]   ;;  %s11633_s1 = inlined_call_operand.vmem [shape: bf16[3,16,36], index: 1, kind: input, shape index: {}]   ;;  %s11634_s2 = inlined_call_operand.vmem [shape: f32[4,736], index: 2, kind: input, shape index: {}]   ;;  %s11635_s3 = inlined_call_operand.<no memory space> [shape: f32[1], index: 3, kind: input, shape index: {}]   ;;  %s11636_s4 = inlined_call_operand.vmem [shape: f32[2,1,1], index: 4, kind: output, shape index: {}]  }
   0x1   :  { %9 = sst [smem:[#allocation3]] %s11635_s3 }
   0x2 LB: > { %s7316_s18 = sadd.s32 4294967295, %s7912_s17   ;;  %p7320_p0 = scmp.ge.s32.totalorder %s7912_s17, 1  ;;  %s7912_s17 = sphi %s7952_s17, %s15_s17  }
   0x3   : > { %p163_p1 = scmp.lt.s32.totalorder %s7912_s17, 3 }
   0x5   : > { %p164_p2 = pnand %p7320_p0, %p163_p1 }
   0x7   : > { %167 = sbr.rel (%p164_p2) target bundleno = 1189 (0x4a5), region = 36 }
   0xc   : > { %p187_p3 = scmp.lt.s32.totalorder %s7316_s18, 1  ;;  %v11637_v0 = vlaneseq  ;;  %v7914_v1 = vmov 1983009808   ;;  %s7915_s22 = smov 94   ;;  %v7923_v21 = vmov 0   ;;  %vm615_vm0 = vcmask 1043456  }
   0xd   : > { %v417_v2 = vunpack.c.l.s4 %v7914_v1  ;;  %s7916_s23 = smov 111   ;;  %s7917_s24 = smov 110   ;;  %2927 = vmatprep.mubr.bf16.mxu0 %v7923_v21  ;;  %2970 = vmatprep.mubr.bf16.mxu1 %v7923_v21  ;;  %vm2664_vm1 = vcmask 769024   ;;  %vm1494_vm2 = vcmask 908288   ;;  %vm2079_vm3 = vcmask 785408  }
   0xe   : > { %s11823_s18 = smov (!%p187_p3, %s7316_s18), 1  ;;  %v7963_v3 = vshrl.u32 %v11637_v0, 7  ;;  %s7918_s25 = smov 96   ;;  %vm1787_vm4 = vcmask 900096   ;;  %vm2372_vm5 = vcmask 777216   ;;  %vm2870_vm6 = vcmask 1041408  }
   0xf   : > { %v418_v4 = vunpack.c.0.s8 %v417_v2  ;;  %s7668_s3 = smul.u32 74, %s11823_s18  ;;  %s7919_s26 = smov 95   ;;  %vm617_vm7 = vcmask 1039360   ;;  %vm909_vm8 = vcmask 1031168   ;;  %vm1202_vm9 = vcmask 916480  }
  0x10   : > { %11701 = vst [vmem:[#allocation4_spill] sm:$0xff] %v7963_v3  ;;  %s7920_s27 = smov 127   ;;  %s7921_s28 = smov 126   ;;  %vm2866_vm10 = vcmask 293888   ;;  %vm7267_vm12 = vcmask 0  }
  0x11   : > { %v7967_v5 = vsub.s32 %v418_v4, %v7963_v3  ;;  %s7972_s21 = scalar_lea.vmem %s11632_s0, %s7668_s3  ;;  %s7922_s29 = smov 112  }
  0x12   : > { %v2445_v6 = vld [vmem:[%s7972_s21 + $0x8] sm:$0xff]  ;;  %v7976_v7 = vld [vmem:[%s7972_s21] sm:$0xff]  ;;  %v2446_v16 = vld [vmem:[%s7972_s21 + $0x10] sm:$0xff]  ;;  %s7264_s7 = sld [smem:[#allocation3]]  ;;  %s194_s15 = scalar_lea.vmem %s11636_s4, %s11823_s18 }
  0x13   : > { %v2486_v8 = vrot.slane %v2445_v6, %v7967_v5  ;;  %v2464_v9 = vcombine.high %v7976_v7, %v7976_v7  ;;  %7326 = vst.sshfl [vmem:[#allocation2] sm:$0xf pattern:$0x76325410] %v7976_v7  ;;  %v7986_v10 = vrot.slane %v7976_v7, %v7967_v5  ;;  %v1601_v12 = vcombine.low %v2445_v6, %v2445_v6  ;;  %v208_v23 = vld [vmem:[%s7972_s21 + $0x10] sm:$0xff]  ;;  %v2447_v26 = vld [vmem:[%s7972_s21 + $0x18] sm:$0xff] }
  0x14   : > { %7328 = vst.sshfl [vmem:[#allocation2 + $0x10] sm:$0xf pattern:$0x76325410] %v2445_v6  ;;  %v2479_v14 = vcombine.high %v2445_v6, %v2445_v6  ;;  %v2501_v17 = vrot.slane %v2446_v16, %v7967_v5  ;;  %v1616_v18 = vcombine.low %v2446_v16, %v2446_v16  ;;  %v2494_v20 = vcombine.high %v2446_v16, %v2446_v16  ;;  %v209_v33 = vld [vmem:[%s7972_s21 + $0x18] sm:$0xff]  ;;  %v2448_v38 = vld [vmem:[%s7972_s21 + $0x20] sm:$0xff] }
  0x15   : > { %2610 = vrot.lane.b32.xlu0 %v2486_v8, %s7915_s22  ;;  %1440 = vrot.lane.b32.xlu1 %v2486_v8, %s7916_s23  ;;  %7327 = vst.sshfl [vmem:[#allocation2 + $0x8] sm:$0xf pattern:$0x76325410] %v2464_v9  ;;  %v2478_v11 = vrot.slane %v2464_v9, %v7967_v5  ;;  %v1608_v13 = vrot.slane %v1601_v12, %v7967_v5 }
  0x16   : > { %v2493_v15 = vrot.slane %v2479_v14, %v7967_v5  ;;  %v1623_v19 = vrot.slane %v1616_v18, %v7967_v5  ;;  %v2508_v22 = vrot.slane %v2494_v20, %v7967_v5  ;;  %7329 = vst.sshfl [vmem:[#allocation2 + $0x18] sm:$0xf pattern:$0x76325410] %v2479_v14  ;;  %v1586_v24 = vcombine.low %v7976_v7, %v7976_v7 }
  0x17   : > { %7330 = vst.sshfl [vmem:[#allocation2 + $0x20] sm:$0xf pattern:$0x76325410] %v208_v23  ;;  %v2516_v27 = vrot.slane %v2447_v26, %v7967_v5  ;;  %v1631_v28 = vcombine.low %v2447_v26, %v2447_v26  ;;  %v254_v29 = vcombine.high %v208_v23, %v208_v23  ;;  %v2509_v31 = vcombine.high %v2447_v26, %v2447_v26 }
  0x18   : > { %v1593_v25 = vrot.slane %v1586_v24, %v7967_v5  ;;  %7332 = vst.sshfl [vmem:[#allocation2 + $0x30] sm:$0xf pattern:$0x76325410] %v209_v33  ;;  %v8094_v45 = vrot.slane %v2448_v38, %v7967_v5  ;;  %v1646_v46 = vcombine.low %v2448_v38, %v2448_v38  ;;  %v2524_v58 = vcombine.high %v2448_v38, %v2448_v38 }
  0x19   : > { %1731 = vrot.lane.b32.xlu0 %v7986_v10, %s7917_s24  ;;  %2025 = vrot.lane.b32.xlu1 %v2486_v8, %s7918_s25  ;;  %v1638_v30 = vrot.slane %v1631_v28, %v7967_v5  ;;  %7331 = vst.sshfl [vmem:[#allocation2 + $0x28] sm:$0xf pattern:$0x76325410] %v254_v29  ;;  %v2523_v32 = vrot.slane %v2509_v31, %v7967_v5 }
  0x1a   : > { %v1653_v57 = vrot.slane %v1646_v46, %v7967_v5  ;;  %v269_v6 = vcombine.high %v209_v33, %v209_v33  ;;  %v8145_v7 = vrot.slane %v2524_v58, %v7967_v5 }
  0x1c   : > { %7333 = vst.sshfl [vmem:[#allocation2 + $0x38] sm:$0xf pattern:$0x76325410] %v269_v6 }
  0x1d   : > { %2608 = vrot.lane.b32.xlu0 %v2478_v11, %s7915_s22  ;;  %1438 = vrot.lane.b32.xlu1 %v2478_v11, %s7916_s23 }
  0x21   : > { %2023 = vrot.lane.b32.xlu0 %v2478_v11, %s7918_s25  ;;  %1733 = vrot.lane.b32.xlu1 %v1608_v13, %s7917_s24 }
  0x25   : > { %2316 = vrot.lane.b32.xlu0 %v7986_v10, %s7919_s26  ;;  %2318 = vrot.lane.b32.xlu1 %v1608_v13, %s7919_s26 }
  0x29   : > { %2612 = vrot.lane.b32.xlu0 %v2493_v15, %s7915_s22  ;;  %560 = vrot.lane.b32.xlu1 %v7986_v10, %s7920_s27 }
  0x2d   : > { %562 = vrot.lane.b32.xlu0 %v1608_v13, %s7920_s27  ;;  %853 = vrot.lane.b32.xlu1 %v2478_v11, %s7921_s28 }
  0x31   : > { %855 = vrot.lane.b32.xlu0 %v2486_v8, %s7921_s28  ;;  %1146 = vrot.lane.b32.xlu1 %v7986_v10, %s7922_s29 }
  0x35   : > { %1148 = vrot.lane.b32.xlu0 %v1608_v13, %s7922_s29  ;;  %1442 = vrot.lane.b32.xlu1 %v2493_v15, %s7916_s23 }
  0x39   : > { %1735 = vrot.lane.b32.xlu0 %v2486_v8, %s7917_s24  ;;  %2027 = vrot.lane.b32.xlu1 %v2493_v15, %s7918_s25 }
  0x3d   : > { %2320 = vrot.lane.b32.xlu0 %v2486_v8, %s7919_s26  ;;  %564 = vrot.lane.b32.xlu1 %v2486_v8, %s7920_s27 }
  0x41   : > { %857 = vrot.lane.b32.xlu0 %v2493_v15, %s7921_s28  ;;  %1150 = vrot.lane.b32.xlu1 %v2486_v8, %s7922_s29 }
  0x45   : > { %2614 = vrot.lane.b32.xlu0 %v2501_v17, %s7915_s22  ;;  %1444 = vrot.lane.b32.xlu1 %v2501_v17, %s7916_s23 }
  0x49   : > { %1737 = vrot.lane.b32.xlu0 %v1623_v19, %s7917_s24  ;;  %2029 = vrot.lane.b32.xlu1 %v2501_v17, %s7918_s25 }
  0x4d   : > { %2322 = vrot.lane.b32.xlu0 %v1623_v19, %s7919_s26  ;;  %2616 = vrot.lane.b32.xlu1 %v2508_v22, %s7915_s22 }
  0x51   : > { %566 = vrot.lane.b32.xlu0 %v1623_v19, %s7920_s27  ;;  %859 = vrot.lane.b32.xlu1 %v2501_v17, %s7921_s28 }
  0x55   : > { %1152 = vrot.lane.b32.xlu0 %v1623_v19, %s7922_s29  ;;  %1446 = vrot.lane.b32.xlu1 %v2508_v22, %s7916_s23 }
  0x59   : > { %1739 = vrot.lane.b32.xlu0 %v2501_v17, %s7917_s24  ;;  %2031 = vrot.lane.b32.xlu1 %v2508_v22, %s7918_s25 }
  0x5d   : > { %2324 = vrot.lane.b32.xlu0 %v2501_v17, %s7919_s26  ;;  %568 = vrot.lane.b32.xlu1 %v2501_v17, %s7920_s27 }
  0x61   : > { %861 = vrot.lane.b32.xlu0 %v2508_v22, %s7921_s28  ;;  %1154 = vrot.lane.b32.xlu1 %v2501_v17, %s7922_s29 }
  0x65   : > { %2606 = vrot.lane.b32.xlu0 %v7986_v10, %s7915_s22  ;;  %1436 = vrot.lane.b32.xlu1 %v7986_v10, %s7916_s23 }
  0x69   : > { %1729 = vrot.lane.b32.xlu0 %v1593_v25, %s7917_s24  ;;  %2021 = vrot.lane.b32.xlu1 %v7986_v10, %s7918_s25 }
  0x6d   : > { %2314 = vrot.lane.b32.xlu0 %v1593_v25, %s7919_s26  ;;  %558 = vrot.lane.b32.xlu1 %v1593_v25, %s7920_s27 }
  0x71   : > { %851 = vrot.lane.b32.xlu0 %v7986_v10, %s7921_s28  ;;  %1144 = vrot.lane.b32.xlu1 %v1593_v25, %s7922_s29 }
  0x75   : > { %2618 = vrot.lane.b32.xlu0 %v2516_v27, %s7915_s22  ;;  %1448 = vrot.lane.b32.xlu1 %v2516_v27, %s7916_s23 }
  0x79   : > { %1741 = vrot.lane.b32.xlu0 %v1638_v30, %s7917_s24  ;;  %2033 = vrot.lane.b32.xlu1 %v2516_v27, %s7918_s25 }
  0x7d   : > { %2326 = vrot.lane.b32.xlu0 %v1638_v30, %s7919_s26  ;;  %570 = vrot.lane.b32.xlu1 %v1638_v30, %s7920_s27 }
  0x81   : > { %863 = vrot.lane.b32.xlu0 %v2516_v27, %s7921_s28  ;;  %1156 = vrot.lane.b32.xlu1 %v1638_v30, %s7922_s29 }
  0x85   : > { %2620 = vrot.lane.b32.xlu0 %v2523_v32, %s7915_s22  ;;  %1450 = vrot.lane.b32.xlu1 %v2523_v32, %s7916_s23 }
  0x87   : > { %v8070_v34 = vpop.permute.xlu0 %2610  ;;  %v8072_v35 = vpop.permute.xlu1 %1440 }
  0x88   : > { %v2646_v41 = vrot.slane %v8070_v34, 4  ;;  %v1476_v42 = vrot.slane %v8072_v35, 4 }
  0x89   : > { %1743 = vrot.lane.b32.xlu0 %v2516_v27, %s7917_s24  ;;  %2035 = vrot.lane.b32.xlu1 %v2523_v32, %s7918_s25 }
  0x8b   : > { %v8076_v36 = vpop.permute.xlu0 %1731  ;;  %v8078_v37 = vpop.permute.xlu1 %2025 }
  0x8c   : > { %v1768_v53 = vrot.slane %v8076_v36, 4  ;;  %v2061_v54 = vrot.slane %v8078_v37, 4 }
  0x8d   : > { %2328 = vrot.lane.b32.xlu0 %v2516_v27, %s7919_s26  ;;  %572 = vrot.lane.b32.xlu1 %v2516_v27, %s7920_s27 }
  0x8f   : > { %v8083_v39 = vpop.permute.xlu0 %2608  ;;  %v8085_v40 = vpop.permute.xlu1 %1438 }
  0x90   : > { %v2645_v43 = vrot.slane %v8083_v39, 4  ;;  %v1475_v44 = vrot.slane %v8085_v40, 4 }
  0x91   : > { %865 = vrot.lane.b32.xlu0 %v2523_v32, %s7921_s28  ;;  %1158 = vrot.lane.b32.xlu1 %v2516_v27, %s7922_s29  ;;  %v8205_v32 = vld [vmem:[%s7972_s21 + $0x20] sm:$0xff] }
  0x92   : > { %v2666_v47 = vsel %vm615_vm0, %v2645_v43, %v2646_v41  ;;  %v1496_v48 = vsel %vm615_vm0, %v1475_v44, %v1476_v42  ;;  %7334 = vst.sshfl [vmem:[#allocation2 + $0x40] sm:$0xf pattern:$0x76325410] %v8205_v32 }
  0x93   : > { %v2667_v49 = vsel %vm2664_vm1, %v8083_v39, %v2666_v47  ;;  %v1497_v50 = vsel %vm1494_vm2, %v8085_v40, %v1496_v48  ;;  %v8108_v51 = vpop.permute.xlu0 %2023  ;;  %v8110_v52 = vpop.permute.xlu1 %1733 }
  0x94   : > { %2719 = vst [vmem:[#allocation2 + $0x248] sm:$0x33] %v2667_v49  ;;  %1549 = vst [vmem:[#allocation2 + $0x128] sm:$0x33] %v1497_v50  ;;  %v2060_v55 = vrot.slane %v8108_v51, 4  ;;  %v1769_v56 = vrot.slane %v8110_v52, 4 }
  0x95   : > { %2622 = vrot.lane.b32.xlu0 %v8094_v45, %s7915_s22  ;;  %1452 = vrot.lane.b32.xlu1 %v8094_v45, %s7916_s23 }
  0x96   : > { %v2081_v59 = vsel %vm615_vm0, %v2060_v55, %v2061_v54  ;;  %v1789_v60 = vsel %vm615_vm0, %v1768_v53, %v1769_v56 }
  0x97   : > { %v2082_v61 = vsel %vm2079_vm3, %v8108_v51, %v2081_v59  ;;  %v1790_v62 = vsel %vm1787_vm4, %v8076_v36, %v1789_v60  ;;  %v8135_v63 = vpop.permute.xlu0 %2316  ;;  %v8137_v1 = vpop.permute.xlu1 %2318 }
  0x98   : > { %2134 = vst [vmem:[#allocation2 + $0x1b8] sm:$0x33] %v2082_v61  ;;  %1842 = vst [vmem:[#allocation2 + $0x128] sm:$0xcc] %v1790_v62  ;;  %v2353_v2 = vrot.slane %v8135_v63, 4  ;;  %v2354_v4 = vrot.slane %v8137_v1, 4 }
  0x99   : > { %1745 = vrot.lane.b32.xlu0 %v1653_v57, %s7917_s24  ;;  %2037 = vrot.lane.b32.xlu1 %v8094_v45, %s7918_s25 }
  0x9a   : > { %v2374_v8 = vsel %vm615_vm0, %v2353_v2, %v2354_v4 }
  0x9b   : > { %v2375_v9 = vsel %vm2372_vm5, %v8135_v63, %v2374_v8  ;;  %v8154_v10 = vpop.permute.xlu0 %2612  ;;  %v8156_v11 = vpop.permute.xlu1 %560  ;;  %v2753_v12 = vld [vmem:[#allocation2 + $0x248] sm:$0x33] }
  0x9c   : > { %2427 = vst [vmem:[#allocation2 + $0x1b8] sm:$0xcc] %v2375_v9  ;;  %v2647_v13 = vrot.slane %v8154_v10, 4  ;;  %v8159_v14 = vcombine.high %v2753_v12, %v2753_v12  ;;  %v7365_v15 = vcombine.low %v2753_v12, %v2753_v12  ;;  %v597_v22 = vrot.slane %v8156_v11, 4 }
  0x9d   : > { %2330 = vrot.lane.b32.xlu0 %v1653_v57, %s7919_s26  ;;  %2624 = vrot.lane.b32.xlu1 %v8145_v7, %s7915_s22 }
  0x9e   : > { %v2668_v16 = vsel %vm615_vm0, %v2646_v41, %v2647_v13  ;;  %7373 = vmatprep.subr.msk.bf16.mxu0 %vm2870_vm6, %v8159_v14  ;;  %v8170_v17 = vsel %vm2870_vm6, %v7365_v15, 0  ;;  %v8269_v15 = vld [vmem:[%s7972_s21 + $0x28] sm:$0xff] }
  0x9f   : > { %v2669_v18 = vsel %vm2664_vm1, %v8070_v34, %v2668_v16  ;;  %2906 = vmatpush1.bf16.msra.mxu0 %v8170_v17  ;;  %v8175_v19 = vpop.permute.xlu0 %562  ;;  %v8177_v20 = vpop.permute.xlu1 %853 }
  0xa0   : > { %2720 = vst [vmem:[#allocation2 + $0x250] sm:$0x33] %v2669_v18  ;;  %v598_v23 = vrot.slane %v8175_v19, 4  ;;  %v890_v30 = vrot.slane %v8177_v20, 4 }
  0xa1   : > { %574 = vrot.lane.b32.xlu0 %v1653_v57, %s7920_s27  ;;  %867 = vrot.lane.b32.xlu1 %v8094_v45, %s7921_s28 }
  0xa2   : > { %v619_v24 = vsel %vm615_vm0, %v597_v22, %v598_v23 }
  0xa3   : > { %v620_v25 = vsel %vm617_vm7, %v8156_v11, %v619_v24  ;;  %v8191_v26 = vpop.permute.xlu0 %855  ;;  %v8193_v27 = vpop.permute.xlu1 %1146  ;;  %v8195_v28 = vld [vmem:[#allocation2 + $0x12c] ss:$144 sps:$4 sm:$0xff]   ;;  %v8197_v29 = vld [vmem:[#allocation2 + $0x128] ss:$144 sps:$4 sm:$0xff]  }
  0xa4   : > { %672 = vst [vmem:[#allocation2 + $0x8] sm:$0xcc] %v620_v25  ;;  %v891_v31 = vrot.slane %v8191_v26, 4  ;;  %2907 = vmatprep.subr.bf16.mxu0 %v8195_v28  ;;  %v11640_v38 = vrot.slane %v8193_v27, 4 }
  0xa5   : > { %1160 = vrot.lane.b32.xlu0 %v1653_v57, %s7922_s29  ;;  %1454 = vrot.lane.b32.xlu1 %v8145_v7, %s7916_s23 }
  0xa6   : > { %v911_v33 = vsel %vm615_vm0, %v890_v30, %v891_v31  ;;  %2908 = vmatpush1.bf16.msra.mxu0 %v8197_v29 }
  0xa7   : > { %v912_v34 = vsel %vm909_vm8, %v8177_v20, %v911_v33  ;;  %v8218_v41 = vpop.permute.xlu0 %1148  ;;  %v8220_v46 = vpop.permute.xlu1 %1442  ;;  %v2754_v47 = vld [vmem:[#allocation2 + $0x250] sm:$0x33] }
  0xa8   : > { %964 = vst [vmem:[#allocation2 + $0x98] sm:$0x33] %v912_v34  ;;  %v1184_v48 = vrot.slane %v8218_v41, 4  ;;  %v1477_v49 = vrot.slane %v8220_v46, 4  ;;  %v8224_v50 = vcombine.high %v2754_v47, %v2754_v47  ;;  %v7367_v57 = vcombine.low %v2754_v47, %v2754_v47 }
  0xa9   : > { %1747 = vrot.lane.b32.xlu0 %v8094_v45, %s7917_s24  ;;  %2039 = vrot.lane.b32.xlu1 %v8145_v7, %s7918_s25 }
  0xaa   : > { %v1204_v58 = vsel %vm615_vm0, %v11640_v38, %v1184_v48  ;;  %v1498_v59 = vsel %vm615_vm0, %v1476_v42, %v1477_v49  ;;  %7375 = vmatprep.subr.msk.bf16.mxu1 %vm2870_vm6, %v8224_v50  ;;  %v8241_v60 = vsel %vm2870_vm6, %v7367_v57, 0 }
  0xab   : > { %v1205_v61 = vsel %vm1202_vm9, %v8193_v27, %v1204_v58  ;;  %v1499_v62 = vsel %vm1494_vm2, %v8072_v35, %v1498_v59  ;;  %2949 = vmatpush1.bf16.msra.mxu1 %v8241_v60  ;;  %v8248_v6 = vpop.permute.xlu0 %1735  ;;  %v8250_v8 = vpop.permute.xlu1 %2027  ;;  %v2737_v58 = vld [vmem:[#allocation2 + $0x8] sm:$0xff] }
  0xac   : > { %1257 = vst [vmem:[#allocation2 + $0x98] sm:$0xcc] %v1205_v61  ;;  %1550 = vst [vmem:[#allocation2 + $0x130] sm:$0x33] %v1499_v62  ;;  %v1770_v42 = vrot.slane %v8248_v6, 4  ;;  %v2062_v9 = vrot.slane %v8250_v8, 4 }
  0xad   : > { %2332 = vrot.lane.b32.xlu0 %v8094_v45, %s7919_s26  ;;  %576 = vrot.lane.b32.xlu1 %v8094_v45, %s7920_s27 }
  0xae   : > { %v1791_v35 = vsel %vm615_vm0, %v1769_v56, %v1770_v42  ;;  %v2083_v12 = vsel %vm615_vm0, %v2061_v54, %v2062_v9 }
  0xaf   : > { %v1792_v16 = vsel %vm1787_vm4, %v8110_v52, %v1791_v35  ;;  %v2084_v18 = vsel %vm2079_vm3, %v8078_v37, %v2083_v12  ;;  %v8275_v24 = vpop.permute.xlu0 %2320  ;;  %v8277_v25 = vpop.permute.xlu1 %564  ;;  %v8287_v52 = vrot.slane %v8269_v15, %v7967_v5  ;;  %v1661_v37 = vcombine.low %v8269_v15, %v8269_v15 }
  0xb0   : > { %1843 = vst [vmem:[#allocation2 + $0x130] sm:$0xcc] %v1792_v16  ;;  %2135 = vst [vmem:[#allocation2 + $0x1c0] sm:$0x33] %v2084_v18  ;;  %v2355_v56 = vrot.slane %v8275_v24, 4  ;;  %v599_v33 = vrot.slane %v8277_v25, 4 }
  0xb1   : > { %869 = vrot.lane.b32.xlu0 %v8145_v7, %s7921_s28  ;;  %1162 = vrot.lane.b32.xlu1 %v8094_v45, %s7922_s29  ;;  %v8334_v16 = vld [vmem:[%s11633_s1 + $0x8] sm:$0xff]  }
  0xb2   : > { %v2376_v54 = vsel %vm615_vm0, %v2354_v4, %v2355_v56  ;;  %v621_v7 = vsel %vm615_vm0, %v598_v23, %v599_v33 }
  0xb3   : > { %v2377_v45 = vsel %vm2372_vm5, %v8137_v1, %v2376_v54  ;;  %v622_v34 = vsel %vm617_vm7, %v8175_v19, %v621_v7  ;;  %v8305_v47 = vpop.permute.xlu0 %857  ;;  %v8307_v57 = vpop.permute.xlu1 %1150  ;;  %v2741_v59 = vld [vmem:[#allocation2 + $0x98] sm:$0xff]  ;;  %v1668_v1 = vrot.slane %v1661_v37, %v7967_v5  ;;  %v284_v19 = vcombine.high %v8205_v32, %v8205_v32 }
  0xb4   : > { %v8309_v61 = vld [vmem:[#allocation2 + $0xc] ss:$144 sps:$4 sm:$0xff]   ;;  %2428 = vst [vmem:[#allocation2 + $0x1c0] sm:$0xcc] %v2377_v45  ;;  %673 = vst [vmem:[#allocation2 + $0x10] sm:$0xcc] %v622_v34  ;;  %v8313_v62 = vcombine.low %v2737_v58, %v2741_v59 }
  0xb5   : > { %v892_v4 = vrot.slane %v8305_v47, 4  ;;  %v1185_v23 = vrot.slane %v8307_v57, 4  ;;  %2626 = vrot.lane.b32.xlu0 %v8287_v52, %s7915_s22  ;;  %1456 = vrot.lane.b32.xlu1 %v8287_v52, %s7916_s23  ;;  %7335 = vst.sshfl [vmem:[#allocation2 + $0x48] sm:$0xf pattern:$0x76325410] %v284_v19 }
  0xb6   : > { %2909 = vmatprep.subr.bf16.mxu0 %v8309_v61 }
  0xb7   : > { %v913_v35 = vsel %vm615_vm0, %v891_v31, %v892_v4  ;;  %v1206_v12 = vsel %vm615_vm0, %v1184_v48, %v1185_v23  ;;  %v2615_v37 = vpop.permute.xlu0 %2614  ;;  %v8340_v54 = vpop.permute.xlu1 %1444  ;;  %2910 = vmatpush1.bf16.msra.mxu0 %v8313_v62 }
  0xb8   : > { %v914_v32 = vsel %vm909_vm8, %v8191_v26, %v913_v35  ;;  %v1207_v18 = vsel %vm1202_vm9, %v8218_v41, %v1206_v12  ;;  %v2648_v31 = vrot.slane %v2615_v37, 4  ;;  %v1478_v48 = vrot.slane %v8340_v54, 4 }
  0xb9   : > { %965 = vst [vmem:[#allocation2 + $0xa0] sm:$0x33] %v914_v32  ;;  %1258 = vst [vmem:[#allocation2 + $0xa0] sm:$0xcc] %v1207_v18  ;;  %1749 = vrot.lane.b32.xlu0 %v1668_v1, %s7917_s24  ;;  %2041 = vrot.lane.b32.xlu1 %v8287_v52, %s7918_s25 }
  0xba   : > { %v2670_v26 = vsel %vm615_vm0, %v2647_v13, %v2648_v31  ;;  %v1500_v41 = vsel %vm615_vm0, %v1477_v49, %v1478_v48  ;;  %7374 = vmatmul.mubr.msk.bf16.vlgmr.msra.gmra.mxu0 %vm2866_vm10, %v8334_v16 }
  0xbb   : > { %v2671_v7 = vsel %vm2664_vm1, %v8154_v10, %v2670_v26  ;;  %v1501_v45 = vsel %vm1494_vm2, %v8220_v46, %v1500_v41  ;;  %v8361_v34 = vpop.permute.xlu0 %1737  ;;  %v8363_v58 = vpop.permute.xlu1 %2029  ;;  %v8365_v13 = vld [vmem:[#allocation2 + $0x134] ss:$144 sps:$4 sm:$0xff]   ;;  %v8367_v59 = vld [vmem:[#allocation2 + $0x130] ss:$144 sps:$4 sm:$0xff]   ;;  %3013 = vmatprep.mubr.bf16.mxu0 %v7923_v21  ;;  %v2539_v10 = vcombine.high %v8269_v15, %v8269_v15 }
  0xbc   : > { %2721 = vst [vmem:[#allocation2 + $0x258] sm:$0x33] %v2671_v7  ;;  %1551 = vst [vmem:[#allocation2 + $0x138] sm:$0x33] %v1501_v45  ;;  %v1771_v49 = vrot.slane %v8361_v34, 4  ;;  %v2063_v19 = vrot.slane %v8363_v58, 4  ;;  %2950 = vmatprep.subr.bf16.mxu1 %v8365_v13 }
  0xbd   : > { %2334 = vrot.lane.b32.xlu0 %v1668_v1, %s7919_s26  ;;  %578 = vrot.lane.b32.xlu1 %v1668_v1, %s7920_s27 }
  0xbe   : > { %v1793_v46 = vsel %vm615_vm0, %v1770_v42, %v1771_v49  ;;  %v2085_v35 = vsel %vm615_vm0, %v2062_v9, %v2063_v19  ;;  %2951 = vmatpush1.bf16.msra.mxu1 %v8367_v59 }
  0xbf   : > { %v1794_v12 = vsel %vm1787_vm4, %v8248_v6, %v1793_v46  ;;  %v2086_v15 = vsel %vm2079_vm3, %v8250_v8, %v2085_v35  ;;  %v8391_v32 = vpop.permute.xlu0 %2322  ;;  %v8394_v18 = vpop.permute.xlu1 %2616  ;;  %v8406_v6 = vrot.slane %v2539_v10, %v7967_v5 }
  0xc0   : > { %v8396_v42 = vld [vmem:[#allocation2 + $0x14] ss:$144 sps:$4 sm:$0xff]   ;;  %v8398_v26 = vld [vmem:[#allocation2 + $0x10] ss:$144 sps:$4 sm:$0xff]   ;;  %1844 = vst [vmem:[#allocation2 + $0x138] sm:$0xcc] %v1794_v12 }
  0xc1   : > { %2136 = vst [vmem:[#allocation2 + $0x1c8] sm:$0x33] %v2086_v15  ;;  %v2356_v9 = vrot.slane %v8391_v32, 4  ;;  %v11638_v41 = vrot.slane %v8394_v18, 4  ;;  %871 = vrot.lane.b32.xlu0 %v8287_v52, %s7921_s28  ;;  %1164 = vrot.lane.b32.xlu1 %v1668_v1, %s7922_s29 }
  0xc2   : > { %2952 = vmatprep.subr.bf16.mxu1 %v8396_v42 }
  0xc3   : > { %v2378_v8 = vsel %vm615_vm0, %v2355_v56, %v2356_v9  ;;  %v2672_v7 = vsel %vm615_vm0, %v2648_v31, %v11638_v41  ;;  %v8420_v46 = vpop.permute.xlu0 %566  ;;  %v8422_v10 = vpop.permute.xlu1 %859  ;;  %2953 = vmatpush1.bf16.msra.mxu1 %v8398_v26  ;;  %v2755_v35 = vld [vmem:[#allocation2 + $0x258] sm:$0x33] }
  0xc4   : > { %v2379_v45 = vsel %vm2372_vm5, %v8275_v24, %v2378_v8  ;;  %v2673_v1 = vsel %vm2664_vm1, %v2615_v37, %v2672_v7  ;;  %v600_v56 = vrot.slane %v8420_v46, 4  ;;  %v893_v31 = vrot.slane %v8422_v10, 4  ;;  %v8451_v7 = vld [vmem:[%s7972_s21 + $0x28] sm:$0xff] }
  0xc5   : > { %2429 = vst [vmem:[#allocation2 + $0x1c8] sm:$0xcc] %v2379_v45  ;;  %2722 = vst [vmem:[#allocation2 + $0x260] sm:$0x33] %v2673_v1  ;;  %v8427_v12 = vcombine.high %v2755_v35, %v2755_v35  ;;  %v7369_v15 = vcombine.low %v2755_v35, %v2755_v35  ;;  %2628 = vrot.lane.b32.xlu0 %v8406_v6, %s7915_s22  ;;  %1458 = vrot.lane.b32.xlu1 %v8406_v6, %s7916_s23 }
  0xc6   : > { %v623_v24 = vsel %vm615_vm0, %v599_v33, %v600_v56  ;;  %v915_v37 = vsel %vm615_vm0, %v892_v4, %v893_v31  ;;  %7376 = vmatmul.mubr.msk.bf16.vlgmr.msra.gmra.mxu1 %vm2866_vm10, %v8334_v16  ;;  %7336 = vst.sshfl [vmem:[#allocation2 + $0x50] sm:$0xf pattern:$0x76325410] %v8451_v7 }
  0xc7   : > { %7377 = vmatprep.subr.msk.bf16.mxu0 %vm2870_vm6, %v8427_v12  ;;  %v8446_v8 = vsel %vm2870_vm6, %v7369_v15, 0  ;;  %v624_v33 = vsel %vm617_vm7, %v8277_v25, %v623_v24  ;;  %v916_v45 = vsel %vm909_vm8, %v8305_v47, %v915_v37  ;;  %v8457_v1 = vpop.permute.xlu0 %1152  ;;  %v8459_v4 = vpop.permute.xlu1 %1446  ;;  %3056 = vmatprep.mubr.bf16.mxu1 %v7923_v21 }
  0xc8   : > { %2992 = vmatpush1.bf16.msra.mxu0 %v8446_v8  ;;  %674 = vst [vmem:[#allocation2 + $0x18] sm:$0xcc] %v624_v33  ;;  %966 = vst [vmem:[#allocation2 + $0xa8] sm:$0x33] %v916_v45  ;;  %v1186_v35 = vrot.slane %v8457_v1, 4  ;;  %v11639_v15 = vrot.slane %v8459_v4, 4 }
  0xc9   : > { %1751 = vrot.lane.b32.xlu0 %v8287_v52, %s7917_s24  ;;  %2043 = vrot.lane.b32.xlu1 %v8406_v6, %s7918_s25 }
  0xca   : > { %v1208_v25 = vsel %vm615_vm0, %v1185_v23, %v1186_v35  ;;  %v1502_v47 = vsel %vm615_vm0, %v1478_v48, %v11639_v15 }
  0xcb   : > { %v1209_v24 = vsel %vm1202_vm9, %v8307_v57, %v1208_v25  ;;  %v1503_v37 = vsel %vm1494_vm2, %v8340_v54, %v1502_v47  ;;  %v8482_v33 = vpop.permute.xlu0 %1739  ;;  %v8484_v45 = vpop.permute.xlu1 %2031 }
  0xcc   : > { %v8486_v0 = vld [vmem:[#allocation2 + $0x138] ss:$144 sps:$4 sm:$0xff]   ;;  %v8488_v23 = vld [vmem:[#allocation2 + $0x13c] ss:$144 sps:$4 sm:$0xff]   ;;  %1259 = vst [vmem:[#allocation2 + $0xa8] sm:$0xcc] %v1209_v24 }
  0xcd   : > { %1552 = vst [vmem:[#allocation2 + $0x140] sm:$0x33] %v1503_v37  ;;  %v11641_v41 = vrot.slane %v8482_v33, 4  ;;  %v11642_v48 = vrot.slane %v8484_v45, 4  ;;  %v2760_v15 = vld [vmem:[#allocation2 + $0x260] sm:$0x33]  ;;  %2336 = vrot.lane.b32.xlu0 %v8287_v52, %s7919_s26  ;;  %580 = vrot.lane.b32.xlu1 %v8287_v52, %s7920_s27 }
  0xce   : > { %v7372_v57 = vcombine.high %v2760_v15, %v2760_v15  ;;  %v7371_v54 = vcombine.low %v2760_v15, %v2760_v15  ;;  %2993 = vmatprep.subr.bf16.mxu0 %v8488_v23  ;;  %v2450_v24 = vld [vmem:[%s7972_s21 + $0x30] sm:$0xff] }
  0xcf   : > { %v1795_v25 = vsel %vm615_vm0, %v1771_v49, %v11641_v41  ;;  %v2087_v47 = vsel %vm615_vm0, %v2063_v19, %v11642_v48  ;;  %v8513_v38 = vpop.permute.xlu0 %2324  ;;  %v8515_v49 = vpop.permute.xlu1 %568  ;;  %2994 = vmatpush1.bf16.msra.mxu0 %v8486_v0 }
  0xd0   : > { %v1796_v37 = vsel %vm1787_vm4, %v8361_v34, %v1795_v25  ;;  %v2088_v15 = vsel %vm2079_vm3, %v8363_v58, %v2087_v47  ;;  %7379 = vmatprep.subr.msk.bf16.mxu1 %vm2870_vm6, %v7372_v57  ;;  %v2890_v41 = vsel %vm2870_vm6, %v7371_v54, 0  ;;  %v2357_v19 = vrot.slane %v8513_v38, 4 }
  0xd1   : > { %1845 = vst [vmem:[#allocation2 + $0x140] sm:$0xcc] %v1796_v37  ;;  %2137 = vst [vmem:[#allocation2 + $0x1d0] sm:$0x33] %v2088_v15  ;;  %v601_v48 = vrot.slane %v8515_v49, 4  ;;  %3035 = vmatpush1.bf16.msra.mxu1 %v2890_v41  ;;  %873 = vrot.lane.b32.xlu0 %v8406_v6, %s7921_s28  ;;  %v8526_v34 = vrot.slane %v2450_v24, %v7967_v5  ;;  %v1676_v58 = vcombine.low %v2450_v24, %v2450_v24 }
  0xd2   : > { %1166 = vrot.lane.b32.xlu1 %v8287_v52, %s7922_s29  ;;  %v2380_v57 = vsel %vm615_vm0, %v2356_v9, %v2357_v19  ;;  %v2554_v15 = vcombine.high %v2450_v24, %v2450_v24 }
  0xd3   : > { %v625_v41 = vsel %vm615_vm0, %v600_v56, %v601_v48  ;;  %v2381_v6 = vsel %vm2372_vm5, %v8391_v32, %v2380_v57  ;;  %v8542_v54 = vpop.permute.xlu0 %861  ;;  %v8544_v25 = vpop.permute.xlu1 %1154  ;;  %v8546_v47 = vld [vmem:[#allocation2 + $0x18] ss:$144 sps:$4 sm:$0xff]   ;;  %v8548_v37 = vld [vmem:[#allocation2 + $0x1c] ss:$144 sps:$4 sm:$0xff]   ;;  %v8557_v32 = vrot.slane %v1676_v58, %v7967_v5 }
  0xd4   : > { %v626_v52 = vsel %vm617_vm7, %v8420_v46, %v625_v41  ;;  %2430 = vst [vmem:[#allocation2 + $0x1d0] sm:$0xcc] %v2381_v6  ;;  %v894_v9 = vrot.slane %v8542_v54, 4  ;;  %v11643_v56 = vrot.slane %v8544_v25, 4  ;;  %2995 = vmatprep.subr.bf16.mxu0 %v8548_v37 }
  0xd5   : > { %675 = vst [vmem:[#allocation2 + $0x20] sm:$0xcc] %v626_v52  ;;  %2630 = vrot.lane.b32.xlu0 %v8526_v34, %s7915_s22  ;;  %2996 = vmatpush1.bf16.msra.mxu0 %v8546_v47 }
  0xd6   : > { %1460 = vrot.lane.b32.xlu1 %v8526_v34, %s7916_s23  ;;  %v917_v46 = vsel %vm615_vm0, %v893_v31, %v894_v9  ;;  %v1210_v57 = vsel %vm615_vm0, %v1186_v35, %v11643_v56  ;;  %v8578_v35 = vrot.slane %v2554_v15, %v7967_v5 }
  0xd7   : > { %v918_v24 = vsel %vm909_vm8, %v8422_v10, %v917_v46  ;;  %v1211_v41 = vsel %vm1202_vm9, %v8457_v1, %v1210_v57  ;;  %v2607_v58 = vpop.permute.xlu0 %2606  ;;  %v1437_v6 = vpop.permute.xlu1 %1436  ;;  %v299_v10 = vcombine.high %v8451_v7, %v8451_v7 }
  0xd8   : > { %967 = vst [vmem:[#allocation2 + $0xb0] sm:$0x33] %v918_v24  ;;  %1260 = vst [vmem:[#allocation2 + $0xb0] sm:$0xcc] %v1211_v41  ;;  %v2644_v52 = vrot.slane %v2607_v58, 4  ;;  %v1474_v31 = vrot.slane %v1437_v6, 4  ;;  %7378 = vmatmul.mubr.msk.bf16.vlgmr.msra.gmra.mxu0 %vm2866_vm10, %v8334_v16 }
  0xd9   : > { %1753 = vrot.lane.b32.xlu0 %v8557_v32, %s7917_s24  ;;  %3138 = vmatprep.mubr.bf16.mxu0 %v7923_v21  ;;  %7337 = vst.sshfl [vmem:[#allocation2 + $0x58] sm:$0xf pattern:$0x76325410] %v299_v10 }
  0xda   : > { %2045 = vrot.lane.b32.xlu1 %v8526_v34, %s7918_s25  ;;  %v2663_v1 = vsel %vm615_vm0, %v2644_v52, %v2645_v43  ;;  %v1493_v46 = vsel %vm615_vm0, %v1474_v31, %v1475_v44 }
  0xdb   : > { %v2665_v57 = vsel %vm2664_vm1, %v2607_v58, %v2663_v1  ;;  %v1495_v24 = vsel %vm1494_vm2, %v1437_v6, %v1493_v46  ;;  %v1730_v15 = vpop.permute.xlu0 %1729  ;;  %v2022_v41 = vpop.permute.xlu1 %2021  ;;  %v8592_v56 = vld [vmem:[#allocation2 + $0x140] ss:$144 sps:$4 sm:$0xff]   ;;  %v8594_v7 = vld [vmem:[#allocation2 + $0x144] ss:$144 sps:$4 sm:$0xff]  }
  0xdc   : > { %2718 = vst [vmem:[#allocation2 + $0x240] sm:$0x33] %v2665_v57  ;;  %1548 = vst [vmem:[#allocation2 + $0x120] sm:$0x33] %v1495_v24  ;;  %v1767_v39 = vrot.slane %v1730_v15, 4  ;;  %v2059_v40 = vrot.slane %v2022_v41, 4  ;;  %3036 = vmatprep.subr.bf16.mxu1 %v8594_v7 }
  0xdd   : > { %2338 = vrot.lane.b32.xlu0 %v8557_v32, %s7919_s26  ;;  %3037 = vmatpush1.bf16.msra.mxu1 %v8592_v56 }
  0xde   : > { %2632 = vrot.lane.b32.xlu1 %v8578_v35, %s7915_s22  ;;  %v1786_v43 = vsel %vm615_vm0, %v1767_v39, %v1768_v53  ;;  %v2078_v44 = vsel %vm615_vm0, %v2059_v40, %v2060_v55  ;;  %v11702_v40 = vrot.slane %v8193_v27, 4  ;;  %v8653_v27 = vld [vmem:[%s7972_s21 + $0x30] sm:$0xff] }
  0xdf   : > { %v1788_v58 = vsel %vm1787_vm4, %v1730_v15, %v1786_v43  ;;  %v2080_v6 = vsel %vm2079_vm3, %v2022_v41, %v2078_v44  ;;  %v2315_v52 = vpop.permute.xlu0 %2314  ;;  %v559_v31 = vpop.permute.xlu1 %558  ;;  %v8611_v10 = vld [vmem:[#allocation2 + $0x20] ss:$144 sps:$4 sm:$0xff]   ;;  %v8613_v1 = vld [vmem:[#allocation2 + $0x24] ss:$144 sps:$4 sm:$0xff]  }
  0xe0   : > { %1841 = vst [vmem:[#allocation2 + $0x120] sm:$0xcc] %v1788_v58  ;;  %2133 = vst [vmem:[#allocation2 + $0x1b0] sm:$0x33] %v2080_v6  ;;  %v2352_v36 = vrot.slane %v2315_v52, 4  ;;  %v596_v51 = vrot.slane %v559_v31, 4  ;;  %3038 = vmatprep.subr.bf16.mxu1 %v8613_v1 }
  0xe1   : > { %582 = vrot.lane.b32.xlu0 %v8557_v32, %s7920_s27  ;;  %3039 = vmatpush1.bf16.msra.mxu1 %v8611_v10  ;;  %7338 = vst.sshfl [vmem:[#allocation2 + $0x60] sm:$0xf pattern:$0x76325410] %v8653_v27 }
  0xe2   : > { %875 = vrot.lane.b32.xlu1 %v8526_v34, %s7921_s28  ;;  %v2371_v53 = vsel %vm615_vm0, %v2352_v36, %v2353_v2  ;;  %v616_v55 = vsel %vm615_vm0, %v596_v51, %v597_v22  ;;  %7390 = vmatprep.subr.msk.bf16.mxu1 %vm2870_vm6, %v8159_v14 }
  0xe3   : > { %v2373_v46 = vsel %vm2372_vm5, %v2315_v52, %v2371_v53  ;;  %v618_v57 = vsel %vm617_vm7, %v559_v31, %v616_v55  ;;  %v852_v24 = vpop.permute.xlu0 %851  ;;  %v1145_v15 = vpop.permute.xlu1 %1144  ;;  %v2752_v41 = vld [vmem:[#allocation2 + $0x240] sm:$0x33] }
  0xe4   : > { %2426 = vst [vmem:[#allocation2 + $0x1b0] sm:$0xcc] %v2373_v46  ;;  %671 = vst [vmem:[#allocation2] sm:$0xcc] %v618_v57  ;;  %v889_v63 = vrot.slane %v852_v24, 4  ;;  %v1182_v39 = vrot.slane %v1145_v15, 4  ;;  %v7387_v2 = vcombine.high %v2752_v41, %v2752_v41  ;;  %v7386_v11 = vcombine.low %v2752_v41, %v2752_v41  ;;  %7380 = vmatmul.mubr.msk.bf16.vlgmr.msra.gmra.mxu1 %vm2866_vm10, %v8334_v16 }
  0xe5   : > { %1168 = vrot.lane.b32.xlu0 %v8557_v32, %s7922_s29  ;;  %3160 = vmatpush1.bf16.msra.mxu1 %v8170_v17  ;;  %v11703_v17 = vrot.slane %v8394_v18, 4  ;;  %v8706_v41 = vld [vmem:[%s7972_s21 + $0x38] sm:$0xff] }
  0xe6   : > { %1462 = vrot.lane.b32.xlu1 %v8578_v35, %s7916_s23  ;;  %v908_v22 = vsel %vm615_vm0, %v889_v63, %v890_v30  ;;  %v1201_v43 = vsel %vm615_vm0, %v1182_v39, %v11702_v40  ;;  %7388 = vmatprep.subr.msk.bf16.mxu0 %vm2870_vm6, %v7387_v2  ;;  %v3101_v14 = vsel %vm2870_vm6, %v7386_v11, 0 }
  0xe7   : > { %v910_v32 = vsel %vm909_vm8, %v852_v24, %v908_v22  ;;  %v1203_v44 = vsel %vm1202_vm9, %v1145_v15, %v1201_v43  ;;  %v8647_v58 = vpop.permute.xlu0 %2618  ;;  %v8649_v20 = vpop.permute.xlu1 %1448  ;;  %3117 = vmatpush1.bf16.msra.mxu0 %v3101_v14  ;;  %3161 = vmatprep.subr.bf16.mxu1 %v8195_v28  ;;  %v11704_v28 = vrot.slane %v8459_v4, 4 }
  0xe8   : > { %963 = vst [vmem:[#allocation2 + $0x90] sm:$0x33] %v910_v32  ;;  %1256 = vst [vmem:[#allocation2 + $0x90] sm:$0xcc] %v1203_v44  ;;  %v2650_v30 = vrot.slane %v8647_v58, 4  ;;  %v1480_v16 = vrot.slane %v8649_v20, 4  ;;  %3181 = vmatprep.mubr.bf16.mxu1 %v7923_v21 }
  0xe9   : > { %1755 = vrot.lane.b32.xlu0 %v8526_v34, %s7917_s24  ;;  %3162 = vmatpush1.bf16.msra.mxu1 %v8197_v29  ;;  %v11705_v29 = vrot.slane %v8482_v33, 4 }
  0xea   : > { %2047 = vrot.lane.b32.xlu1 %v8578_v35, %s7918_s25  ;;  %v2674_v6 = vsel %vm615_vm0, %v11703_v17, %v2650_v30  ;;  %v1504_v52 = vsel %vm615_vm0, %v11704_v28, %v1480_v16  ;;  %3163 = vmatprep.subr.bf16.mxu1 %v8309_v61  ;;  %v8703_v61 = vld [vmem:[%s11633_s1] sm:$0xff]  }
  0xeb   : > { %v2675_v31 = vsel %vm2664_vm1, %v8394_v18, %v2674_v6  ;;  %v1505_v36 = vsel %vm1494_vm2, %v8459_v4, %v1504_v52  ;;  %v8678_v51 = vpop.permute.xlu0 %1741  ;;  %v8680_v53 = vpop.permute.xlu1 %2033  ;;  %v7740_v55 = vld [vmem:[#allocation2 + $0x120] ss:$144 sps:$4 sm:$0xff]   ;;  %v7742_v46 = vld [vmem:[#allocation2 + $0x124] ss:$144 sps:$4 sm:$0xff]   ;;  %v11706_v4 = vrot.slane %v8484_v45, 4 }
  0xec   : > { %2723 = vst [vmem:[#allocation2 + $0x268] sm:$0x33] %v2675_v31  ;;  %1553 = vst [vmem:[#allocation2 + $0x148] sm:$0x33] %v1505_v36  ;;  %v1773_v57 = vrot.slane %v8678_v51, 4  ;;  %v2065_v24 = vrot.slane %v8680_v53, 4  ;;  %3118 = vmatprep.subr.bf16.mxu0 %v7742_v46 }
  0xed   : > { %2340 = vrot.lane.b32.xlu0 %v8526_v34, %s7919_s26  ;;  %3119 = vmatpush1.bf16.msra.mxu0 %v7740_v55  ;;  %v3295_v52 = vld [vmem:[#allocation2 + $0x258] sm:$0x33]  ;;  %v3294_v46 = vld [vmem:[#allocation2 + $0x250] sm:$0x33] }
  0xee   : > { %584 = vrot.lane.b32.xlu1 %v8526_v34, %s7920_s27  ;;  %v1797_v18 = vsel %vm615_vm0, %v11705_v29, %v1773_v57  ;;  %v2089_v15 = vsel %vm615_vm0, %v11706_v4, %v2065_v24  ;;  %3164 = vmatpush1.bf16.msra.mxu1 %v8313_v62  ;;  %v8727_v62 = vrot.slane %v8706_v41, %v7967_v5 }
  0xef   : > { %v1798_v63 = vsel %vm1787_vm4, %v8482_v33, %v1797_v18  ;;  %v2090_v39 = vsel %vm2079_vm3, %v8484_v45, %v2089_v15  ;;  %v8712_v2 = vpop.permute.xlu0 %2326  ;;  %v8714_v11 = vpop.permute.xlu1 %570  ;;  %v7743_v22 = vld [vmem:[#allocation2] ss:$144 sps:$4 sm:$0xff]   ;;  %v7745_v40 = vld [vmem:[#allocation2 + $0x4] ss:$144 sps:$4 sm:$0xff]   ;;  %7394 = vmatprep.subr.msk.bf16.mxu1 %vm2870_vm6, %v8427_v12  ;;  %v1691_v33 = vcombine.low %v8706_v41, %v8706_v41  ;;  %v7415_v55 = vcombine.low %v3295_v52, %v3295_v52 }
  0xf0   : > { %1846 = vst [vmem:[#allocation2 + $0x148] sm:$0xcc] %v1798_v63  ;;  %2138 = vst [vmem:[#allocation2 + $0x1d8] sm:$0x33] %v2090_v39  ;;  %v2358_v43 = vrot.slane %v8712_v2, 4  ;;  %v602_v14 = vrot.slane %v8714_v11, 4  ;;  %3120 = vmatprep.subr.bf16.mxu0 %v7745_v40  ;;  %v7413_v40 = vcombine.low %v3294_v46, %v3294_v46 }
  0xf1   : > { %877 = vrot.lane.b32.xlu0 %v8578_v35, %s7921_s28  ;;  %7391 = vmatmul.mubr.msk.bf16.vlgmr.msra.gmra.mxu1 %vm2866_vm10, %v8703_v61 }
  0xf2   : > { %1170 = vrot.lane.b32.xlu1 %v8526_v34, %s7922_s29  ;;  %v2382_v45 = vsel %vm615_vm0, %v2357_v19, %v2358_v43  ;;  %v627_v12 = vsel %vm615_vm0, %v601_v48, %v602_v14  ;;  %3121 = vmatpush1.bf16.msra.mxu0 %v7743_v22  ;;  %v3413_v22 = vsel %vm2870_vm6, %v7415_v55, 0 }
  0xf3   : > { %v2383_v34 = vsel %vm2372_vm5, %v8513_v38, %v2382_v45  ;;  %v628_v35 = vsel %vm617_vm7, %v8515_v49, %v627_v12  ;;  %v8747_v32 = vpop.permute.xlu0 %863  ;;  %v8749_v44 = vpop.permute.xlu1 %1156  ;;  %3246 = vmatpush1.bf16.msra.mxu1 %v8446_v8  ;;  %7392 = vmatprep.subr.msk.bf16.mxu0 %vm2870_vm6, %v8224_v50  ;;  %v1698_v38 = vrot.slane %v1691_v33, %v7967_v5  ;;  %v11707_v50 = vrot.slane %v8544_v25, 4 }
  0xf4   : > { %2431 = vst [vmem:[#allocation2 + $0x1d8] sm:$0xcc] %v2383_v34  ;;  %676 = vst [vmem:[#allocation2 + $0x28] sm:$0xcc] %v628_v35  ;;  %v895_v48 = vrot.slane %v8747_v32, 4  ;;  %v1188_v19 = vrot.slane %v8749_v44, 4  ;;  %3247 = vmatprep.subr.bf16.mxu1 %v8488_v23  ;;  %v314_v8 = vcombine.high %v8653_v27, %v8653_v27  ;;  %3267 = vmatprep.mubr.bf16.mxu1 %v7923_v21 }
  0xf5   : > { %2634 = vrot.lane.b32.xlu0 %v8727_v62, %s7915_s22  ;;  %7389 = vmatmul.mubr.msk.bf16.vlgmr.msra.gmra.mxu0 %vm2866_vm10, %v8703_v61  ;;  %v3407_v34 = vsel %vm2870_vm6, %v7413_v40, 0 }
  0xf6   : > { %1464 = vrot.lane.b32.xlu1 %v8727_v62, %s7916_s23  ;;  %v919_v49 = vsel %vm615_vm0, %v894_v9, %v895_v48  ;;  %v1212_v17 = vsel %vm615_vm0, %v11707_v50, %v1188_v19  ;;  %3203 = vmatpush1.bf16.msra.mxu0 %v8241_v60  ;;  %7339 = vst.sshfl [vmem:[#allocation2 + $0x68] sm:$0xf pattern:$0x76325410] %v314_v8 }
  0xf7   : > { %v920_v27 = vsel %vm909_vm8, %v8542_v54, %v919_v49  ;;  %v1213_v6 = vsel %vm1202_vm9, %v8544_v25, %v1212_v17  ;;  %v8781_v28 = vpop.permute.xlu0 %2620  ;;  %v8783_v9 = vpop.permute.xlu1 %1450  ;;  %3248 = vmatpush1.bf16.msra.mxu1 %v8486_v0  ;;  %3204 = vmatprep.subr.bf16.mxu0 %v8365_v13  ;;  %v7416_v25 = vcombine.high %v3295_v52, %v3295_v52  ;;  %v3296_v17 = vld [vmem:[#allocation2 + $0x260] sm:$0x33] }
  0xf8   : > { %968 = vst [vmem:[#allocation2 + $0xb8] sm:$0x33] %v920_v27  ;;  %1261 = vst [vmem:[#allocation2 + $0xb8] sm:$0xcc] %v1213_v6  ;;  %v2651_v31 = vrot.slane %v8781_v28, 4  ;;  %v1481_v36 = vrot.slane %v8783_v9, 4  ;;  %3249 = vmatprep.subr.bf16.mxu1 %v8548_v37  ;;  %3224 = vmatprep.mubr.bf16.mxu0 %v7923_v21 }
  0xf9   : > { %1757 = vrot.lane.b32.xlu0 %v1698_v38, %s7917_s24 }
  0xfa   : > { %2049 = vrot.lane.b32.xlu1 %v8727_v62, %s7918_s25  ;;  %v2676_v60 = vsel %vm615_vm0, %v2650_v30, %v2651_v31  ;;  %v1506_v54 = vsel %vm615_vm0, %v1480_v16, %v1481_v36  ;;  %3205 = vmatpush1.bf16.msra.mxu0 %v8367_v59 }
  0xfb   : > { %v2677_v29 = vsel %vm2664_vm1, %v8647_v58, %v2676_v60  ;;  %v1507_v18 = vsel %vm1494_vm2, %v8649_v20, %v1506_v54  ;;  %v8809_v4 = vpop.permute.xlu0 %1743  ;;  %v8811_v30 = vpop.permute.xlu1 %2035  ;;  %3250 = vmatpush1.bf16.msra.mxu1 %v8546_v47  ;;  %3206 = vmatprep.subr.bf16.mxu0 %v8396_v42  ;;  %v7414_v58 = vcombine.high %v3294_v46, %v3294_v46 }
  0xfc   : > { %2724 = vst [vmem:[#allocation2 + $0x270] sm:$0x33] %v2677_v29  ;;  %1554 = vst [vmem:[#allocation2 + $0x150] sm:$0x33] %v1507_v18  ;;  %v1774_v16 = vrot.slane %v8809_v4, 4  ;;  %v2066_v15 = vrot.slane %v8811_v30, 4  ;;  %7423 = vmatprep.subr.msk.bf16.mxu1 %vm2870_vm6, %v7416_v25  ;;  %v2569_v20 = vcombine.high %v8706_v41, %v8706_v41  ;;  %v7417_v54 = vcombine.low %v3296_v17, %v3296_v17 }
  0xfd   : > { %2342 = vrot.lane.b32.xlu0 %v1698_v38, %s7919_s26 }
  0xfe   : > { %586 = vrot.lane.b32.xlu1 %v1698_v38, %s7920_s27  ;;  %v1799_v63 = vsel %vm615_vm0, %v1773_v57, %v1774_v16  ;;  %v2091_v39 = vsel %vm615_vm0, %v2065_v24, %v2066_v15  ;;  %7395 = vmatmul.mubr.msk.bf16.vlgmr.msra.gmra.mxu1 %vm2866_vm10, %v8703_v61 }
  0xff   : > { %v1800_v41 = vsel %vm1787_vm4, %v8678_v51, %v1799_v63  ;;  %v2092_v33 = vsel %vm2079_vm3, %v8680_v53, %v2091_v39  ;;  %v8840_v45 = vpop.permute.xlu0 %2328  ;;  %v8842_v57 = vpop.permute.xlu1 %572  ;;  %3207 = vmatpush1.bf16.msra.mxu0 %v8398_v26  ;;  %3484 = vmatpush1.bf16.msra.mxu1 %v3413_v22  ;;  %v8853_v51 = vrot.slane %v2569_v20, %v7967_v5  ;;  %v8969_v20 = vld [vmem:[#allocation2 + $0x2c] ss:$144 sps:$4 sm:$0xff]   ;;  %v8972_v63 = vld [vmem:[%s7972_s21 + $0x40] sm:$0xff] }
 0x100   : > { %1847 = vst [vmem:[#allocation2 + $0x150] sm:$0xcc] %v1800_v41  ;;  %2139 = vst [vmem:[#allocation2 + $0x1e0] sm:$0x33] %v2092_v33  ;;  %v2359_v24 = vrot.slane %v8840_v45, 4  ;;  %v603_v12 = vrot.slane %v8842_v57, 4  ;;  %7421 = vmatprep.subr.msk.bf16.mxu0 %vm2870_vm6, %v7414_v58  ;;  %3485 = vmatprep.subr.bf16.mxu1 %v8488_v23 }
 0x101   : > { %879 = vrot.lane.b32.xlu0 %v8727_v62, %s7921_s28  ;;  %3505 = vmatprep.mubr.bf16.mxu1 %v7923_v21  ;;  %v3419_v58 = vsel %vm2870_vm6, %v7417_v54, 0 }
 0x102   : > { %1172 = vrot.lane.b32.xlu1 %v1698_v38, %s7922_s29  ;;  %v2384_v53 = vsel %vm615_vm0, %v2358_v43, %v2359_v24  ;;  %v629_v23 = vsel %vm615_vm0, %v602_v14, %v603_v12  ;;  %7393 = vmatmul.mubr.msk.bf16.vlgmr.msra.gmra.mxu0 %vm2866_vm10, %v8703_v61  ;;  %v3297_v14 = vld [vmem:[#allocation2 + $0x268] sm:$0x33] }
 0x103   : > { %v2385_v35 = vsel %vm2372_vm5, %v8712_v2, %v2384_v53  ;;  %v630_v38 = vsel %vm617_vm7, %v8714_v11, %v629_v23  ;;  %v8873_v43 = vpop.permute.xlu0 %865  ;;  %v8875_v8 = vpop.permute.xlu1 %1158  ;;  %3441 = vmatpush1.bf16.msra.mxu0 %v3407_v34  ;;  %3486 = vmatpush1.bf16.msra.mxu1 %v8486_v0  ;;  %v7420_v2 = vcombine.high %v3297_v14, %v3297_v14  ;;  %v3906_v40 = vld [vmem:[#allocation2 + $0x270] sm:$0x33]  ;;  %v3905_v34 = vld [vmem:[#allocation2 + $0x268] sm:$0x33] }
 0x104   : > { %2432 = vst [vmem:[#allocation2 + $0x1e0] sm:$0xcc] %v2385_v35  ;;  %677 = vst [vmem:[#allocation2 + $0x30] sm:$0xcc] %v630_v38  ;;  %v896_v49 = vrot.slane %v8873_v43, 4  ;;  %v1189_v50 = vrot.slane %v8875_v8, 4  ;;  %3442 = vmatprep.subr.bf16.mxu0 %v8365_v13  ;;  %3487 = vmatprep.subr.bf16.mxu1 %v8548_v37  ;;  %v7419_v11 = vcombine.low %v3297_v14, %v3297_v14 }
 0x105   : > { %2636 = vrot.lane.b32.xlu0 %v8853_v51, %s7915_s22  ;;  %v8899_v37 = vld [vmem:[%s11633_s1 + $0x10] sm:$0xff]   ;;  %3462 = vmatprep.mubr.bf16.mxu0 %v7923_v21  ;;  %v1706_v53 = vcombine.low %v8972_v63, %v8972_v63  ;;  %v9008_v23 = vcombine.high %v3906_v40, %v3906_v40 }
 0x106   : > { %1466 = vrot.lane.b32.xlu1 %v8853_v51, %s7916_s23  ;;  %v921_v0 = vsel %vm615_vm0, %v895_v48, %v896_v49  ;;  %v1214_v13 = vsel %vm615_vm0, %v1188_v19, %v1189_v50 }
 0x107   : > { %v922_v27 = vsel %vm909_vm8, %v8747_v32, %v921_v0  ;;  %v1215_v48 = vsel %vm1202_vm9, %v8749_v44, %v1214_v13  ;;  %v8906_v6 = vpop.permute.xlu0 %2622  ;;  %v8908_v52 = vpop.permute.xlu1 %1452  ;;  %3443 = vmatpush1.bf16.msra.mxu0 %v8367_v59  ;;  %3488 = vmatpush1.bf16.msra.mxu1 %v8546_v47  ;;  %v7418_v32 = vcombine.high %v3296_v17, %v3296_v17  ;;  %v8931_v44 = vld [vmem:[#allocation2 + $0x14c] ss:$144 sps:$4 sm:$0xff]  }
 0x108   : > { %969 = vst [vmem:[#allocation2 + $0xc0] sm:$0x33] %v922_v27  ;;  %1262 = vst [vmem:[#allocation2 + $0xc0] sm:$0xcc] %v1215_v48  ;;  %v2652_v19 = vrot.slane %v8906_v6, 4  ;;  %v1482_v60 = vrot.slane %v8908_v52, 4  ;;  %3444 = vmatprep.subr.bf16.mxu0 %v8396_v42  ;;  %7427 = vmatprep.subr.msk.bf16.mxu1 %vm2870_vm6, %v7420_v2  ;;  %v2584_v2 = vcombine.high %v8972_v63, %v8972_v63 }
 0x109   : > { %1759 = vrot.lane.b32.xlu0 %v8727_v62, %s7917_s24  ;;  %v3425_v42 = vsel %vm2870_vm6, %v7419_v11, 0  ;;  %v7445_v48 = vcombine.low %v3905_v34, %v3905_v34 }
 0x10a   : > { %2051 = vrot.lane.b32.xlu1 %v8853_v51, %s7918_s25  ;;  %v2678_v59 = vsel %vm615_vm0, %v2651_v31, %v2652_v19  ;;  %v1508_v47 = vsel %vm615_vm0, %v1481_v36, %v1482_v60  ;;  %7424 = vmatmul.mubr.msk.bf16.vlgmr.msra.gmra.mxu1 %vm2866_vm10, %v8899_v37 }
 0x10b   : > { %v2679_v25 = vsel %vm2664_vm1, %v8781_v28, %v2678_v59  ;;  %v1509_v31 = vsel %vm1494_vm2, %v8783_v9, %v1508_v47  ;;  %v8937_v55 = vpop.permute.xlu0 %1745  ;;  %v8939_v46 = vpop.permute.xlu1 %2037  ;;  %3445 = vmatpush1.bf16.msra.mxu0 %v8398_v26  ;;  %3570 = vmatpush1.bf16.msra.mxu1 %v3425_v42  ;;  %v8947_v28 = vld [vmem:[%s7972_s21 + $0x38] sm:$0xff]  ;;  %v9052_v27 = vld [vmem:[#allocation2 + $0x154] ss:$144 sps:$4 sm:$0xff]   ;;  %v9091_v42 = vsel %vm2870_vm6, %v7445_v48, 0 }
 0x10c   : > { %2725 = vst [vmem:[#allocation2 + $0x278] sm:$0x33] %v2679_v25  ;;  %1555 = vst [vmem:[#allocation2 + $0x158] sm:$0x33] %v1509_v31  ;;  %v1775_v36 = vrot.slane %v8937_v55, 4  ;;  %v2067_v29 = vrot.slane %v8939_v46, 4  ;;  %7425 = vmatprep.subr.msk.bf16.mxu0 %vm2870_vm6, %v7418_v32  ;;  %3571 = vmatprep.subr.bf16.mxu1 %v8931_v44  ;;  %v329_v25 = vcombine.high %v8947_v28, %v8947_v28 }
 0x10d   : > { %v8949_v9 = vld [vmem:[#allocation2 + $0x148] ss:$144 sps:$4 sm:$0xff]   ;;  %2344 = vrot.lane.b32.xlu0 %v8727_v62, %s7919_s26  ;;  %7340 = vst.sshfl [vmem:[#allocation2 + $0x70] sm:$0xf pattern:$0x76325410] %v8947_v28  ;;  %3591 = vmatprep.mubr.bf16.mxu1 %v7923_v21 }
 0x10e   : > { %588 = vrot.lane.b32.xlu1 %v8727_v62, %s7920_s27  ;;  %v1801_v26 = vsel %vm615_vm0, %v1774_v16, %v1775_v36  ;;  %v2093_v18 = vsel %vm615_vm0, %v2066_v15, %v2067_v29  ;;  %7422 = vmatmul.mubr.msk.bf16.vlgmr.msra.gmra.mxu0 %vm2866_vm10, %v8899_v37  ;;  %7341 = vst.sshfl [vmem:[#allocation2 + $0x78] sm:$0xf pattern:$0x76325410] %v329_v25 }
 0x10f   : > { %v1802_v16 = vsel %vm1787_vm4, %v8809_v4, %v1801_v26  ;;  %v2094_v39 = vsel %vm2079_vm3, %v8811_v30, %v2093_v18  ;;  %v8979_v22 = vpop.permute.xlu0 %2330  ;;  %v8981_v15 = vpop.permute.xlu1 %2624  ;;  %3527 = vmatpush1.bf16.msra.mxu0 %v3419_v58  ;;  %3572 = vmatpush1.bf16.msra.mxu1 %v8949_v9  ;;  %v8988_v4 = vld [vmem:[#allocation2 + $0x28] ss:$144 sps:$4 sm:$0xff]   ;;  %v8996_v30 = vrot.slane %v8972_v63, %v7967_v5  ;;  %v9093_v54 = vld [vmem:[#allocation2 + $0x34] ss:$144 sps:$4 sm:$0xff]  }
 0x110   : > { %1848 = vst [vmem:[#allocation2 + $0x158] sm:$0xcc] %v1802_v16  ;;  %2140 = vst [vmem:[#allocation2 + $0x1e8] sm:$0x33] %v2094_v39  ;;  %v2360_v41 = vrot.slane %v8979_v22, 4  ;;  %v2653_v33 = vrot.slane %v8981_v15, 4  ;;  %3528 = vmatprep.subr.bf16.mxu0 %v8594_v7  ;;  %3573 = vmatprep.subr.bf16.mxu1 %v8969_v20 }
 0x111   : > { %881 = vrot.lane.b32.xlu0 %v8853_v51, %s7921_s28  ;;  %3548 = vmatprep.mubr.bf16.mxu0 %v7923_v21 }
 0x112   : > { %1174 = vrot.lane.b32.xlu1 %v8727_v62, %s7922_s29  ;;  %v2386_v7 = vsel %vm615_vm0, %v2359_v24, %v2360_v41  ;;  %v2680_v51 = vsel %vm615_vm0, %v2652_v19, %v2653_v33  ;;  %v7447_v62 = vcombine.low %v3906_v40, %v3906_v40 }
 0x113   : > { %v2387_v35 = vsel %vm2372_vm5, %v8840_v45, %v2386_v7  ;;  %v2681_v38 = vsel %vm2664_vm1, %v8906_v6, %v2680_v51  ;;  %v9015_v14 = vpop.permute.xlu0 %574  ;;  %v9017_v0 = vpop.permute.xlu1 %867  ;;  %3529 = vmatpush1.bf16.msra.mxu0 %v8592_v56  ;;  %3574 = vmatpush1.bf16.msra.mxu1 %v8988_v4  ;;  %v9030_v56 = vcombine.high %v3905_v34, %v3905_v34  ;;  %v3907_v40 = vld [vmem:[#allocation2 + $0x278] sm:$0x33] }
 0x114   : > { %2433 = vst [vmem:[#allocation2 + $0x1e8] sm:$0xcc] %v2387_v35  ;;  %2726 = vst [vmem:[#allocation2 + $0x280] sm:$0x33] %v2681_v38  ;;  %v604_v24 = vrot.slane %v9015_v14, 4  ;;  %v897_v13 = vrot.slane %v9017_v0, 4  ;;  %3530 = vmatprep.subr.bf16.mxu0 %v8613_v1  ;;  %7455 = vmatprep.subr.msk.bf16.mxu1 %vm2870_vm6, %v9008_v23  ;;  %v9033_v45 = vrot.slane %v1706_v53, %v7967_v5 }
 0x115   : > { %2638 = vrot.lane.b32.xlu0 %v8996_v30, %s7915_s22  ;;  %v9050_v17 = vsel %vm2870_vm6, %v7447_v62, 0  ;;  %v9162_v35 = vld [vmem:[%s11633_s1 + $0x8] sm:$0xff]  }
 0x116   : > { %1468 = vrot.lane.b32.xlu1 %v8996_v30, %s7916_s23  ;;  %v631_v1 = vsel %vm615_vm0, %v603_v12, %v604_v24  ;;  %v923_v11 = vsel %vm615_vm0, %v896_v49, %v897_v13  ;;  %7428 = vmatmul.mubr.msk.bf16.vlgmr.msra.gmra.mxu1 %vm2866_vm10, %v8899_v37 }
 0x117   : > { %v632_v6 = vsel %vm617_vm7, %v8842_v57, %v631_v1  ;;  %v924_v12 = vsel %vm909_vm8, %v8873_v43, %v923_v11  ;;  %v9058_v19 = vpop.permute.xlu0 %1160  ;;  %v9060_v32 = vpop.permute.xlu1 %1454  ;;  %3531 = vmatpush1.bf16.msra.mxu0 %v8611_v10  ;;  %4091 = vmatpush1.bf16.msra.mxu1 %v9050_v17  ;;  %v9069_v57 = vld [vmem:[#allocation2 + $0x150] ss:$144 sps:$4 sm:$0xff]   ;;  %v9076_v10 = vrot.slane %v2584_v2, %v7967_v5 }
 0x118   : > { %678 = vst [vmem:[#allocation2 + $0x38] sm:$0xcc] %v632_v6  ;;  %970 = vst [vmem:[#allocation2 + $0xc8] sm:$0x33] %v924_v12  ;;  %v1190_v49 = vrot.slane %v9058_v19, 4  ;;  %v1483_v59 = vrot.slane %v9060_v32, 4  ;;  %7453 = vmatprep.subr.msk.bf16.mxu0 %vm2870_vm6, %v9030_v56  ;;  %4092 = vmatprep.subr.bf16.mxu1 %v9052_v27  ;;  %v7449_v2 = vcombine.low %v3907_v40, %v3907_v40 }
 0x119   : > { %1761 = vrot.lane.b32.xlu0 %v9033_v45, %s7917_s24  ;;  %4112 = vmatprep.mubr.bf16.mxu1 %v7923_v21 }
 0x11a   : > { %2053 = vrot.lane.b32.xlu1 %v8996_v30, %s7918_s25  ;;  %v1216_v43 = vsel %vm615_vm0, %v1189_v50, %v1190_v49  ;;  %v1510_v47 = vsel %vm615_vm0, %v1482_v60, %v1483_v59  ;;  %7426 = vmatmul.mubr.msk.bf16.vlgmr.msra.gmra.mxu0 %vm2866_vm10, %v8899_v37 }
 0x11b   : > { %v1217_v50 = vsel %vm1202_vm9, %v8875_v8, %v1216_v43  ;;  %v1511_v31 = vsel %vm1494_vm2, %v8908_v52, %v1510_v47  ;;  %v9102_v60 = vpop.permute.xlu0 %1747  ;;  %v9104_v26 = vpop.permute.xlu1 %2039  ;;  %4048 = vmatpush1.bf16.msra.mxu0 %v9091_v42  ;;  %4093 = vmatpush1.bf16.msra.mxu1 %v9069_v57  ;;  %v3912_v18 = vld [vmem:[#allocation2 + $0x280] sm:$0x33]  ;;  %v9200_v12 = vld [vmem:[#allocation2 + $0x15c] ss:$144 sps:$4 sm:$0xff]  }
 0x11c   : > { %1263 = vst [vmem:[#allocation2 + $0xc8] sm:$0xcc] %v1217_v50  ;;  %1556 = vst [vmem:[#allocation2 + $0x160] sm:$0x33] %v1511_v31  ;;  %v1776_v58 = vrot.slane %v9102_v60, 4  ;;  %v2068_v28 = vrot.slane %v9104_v26, 4  ;;  %4049 = vmatprep.subr.bf16.mxu0 %v8931_v44  ;;  %4094 = vmatprep.subr.bf16.mxu1 %v9093_v54  ;;  %v7452_v8 = vcombine.high %v3912_v18, %v3912_v18 }
 0x11d   : > { %v9112_v52 = vld [vmem:[#allocation2 + $0x30] ss:$144 sps:$4 sm:$0xff]   ;;  %2346 = vrot.lane.b32.xlu0 %v9033_v45, %s7919_s26  ;;  %v7451_v39 = vcombine.low %v3912_v18, %v3912_v18  ;;  %4069 = vmatprep.mubr.bf16.mxu0 %v7923_v21 }
 0x11e   : > { %2640 = vrot.lane.b32.xlu1 %v9076_v10, %s7915_s22  ;;  %v1803_v63 = vsel %vm615_vm0, %v1775_v36, %v1776_v58  ;;  %v2095_v16 = vsel %vm615_vm0, %v2067_v29, %v2068_v28 }
 0x11f   : > { %v1804_v53 = vsel %vm1787_vm4, %v8937_v55, %v1803_v63  ;;  %v2096_v7 = vsel %vm2079_vm3, %v8939_v46, %v2095_v16  ;;  %v9133_v51 = vpop.permute.xlu0 %2332  ;;  %v9135_v62 = vpop.permute.xlu1 %576  ;;  %4050 = vmatpush1.bf16.msra.mxu0 %v8949_v9  ;;  %4095 = vmatpush1.bf16.msra.mxu1 %v9112_v52  ;;  %v9147_v55 = vcombine.high %v3907_v40, %v3907_v40  ;;  %v4032_v38 = vsel %vm2870_vm6, %v7451_v39, 0 }
 0x120   : > { %1849 = vst [vmem:[#allocation2 + $0x160] sm:$0xcc] %v1804_v53  ;;  %2141 = vst [vmem:[#allocation2 + $0x1f0] sm:$0x33] %v2096_v7  ;;  %v2361_v36 = vrot.slane %v9133_v51, 4  ;;  %v605_v29 = vrot.slane %v9135_v62, 4  ;;  %4051 = vmatprep.subr.bf16.mxu0 %v8969_v20  ;;  %7459 = vmatprep.subr.msk.bf16.mxu1 %vm2870_vm6, %v7452_v8 }
 0x121   : > { %590 = vrot.lane.b32.xlu0 %v9033_v45, %s7920_s27  ;;  %v3904_v8 = vld [vmem:[#allocation2 + $0x260] sm:$0x33] }
 0x122   : > { %883 = vrot.lane.b32.xlu1 %v8996_v30, %s7921_s28  ;;  %v2388_v46 = vsel %vm615_vm0, %v2360_v41, %v2361_v36  ;;  %v633_v34 = vsel %vm615_vm0, %v604_v24, %v605_v29  ;;  %7456 = vmatmul.mubr.msk.bf16.vlgmr.msra.gmra.mxu1 %vm2866_vm10, %v9162_v35 }
 0x123   : > { %v2389_v41 = vsel %vm2372_vm5, %v8979_v22, %v2388_v46  ;;  %v634_v1 = vsel %vm617_vm7, %v9015_v14, %v633_v34  ;;  %v9171_v11 = vpop.permute.xlu0 %869  ;;  %v9173_v24 = vpop.permute.xlu1 %1162  ;;  %4052 = vmatpush1.bf16.msra.mxu0 %v8988_v4  ;;  %4177 = vmatpush1.bf16.msra.mxu1 %v4032_v38  ;;  %v9231_v18 = vld [vmem:[#allocation2 + $0x3c] ss:$144 sps:$4 sm:$0xff]   ;;  %v7466_v34 = vcombine.high %v3904_v8, %v3904_v8 }
 0x124   : > { %2434 = vst [vmem:[#allocation2 + $0x1f0] sm:$0xcc] %v2389_v41  ;;  %679 = vst [vmem:[#allocation2 + $0x40] sm:$0xcc] %v634_v1  ;;  %v898_v48 = vrot.slane %v9171_v11, 4  ;;  %v1191_v6 = vrot.slane %v9173_v24, 4  ;;  %7457 = vmatprep.subr.msk.bf16.mxu0 %vm2870_vm6, %v9147_v55  ;;  %4198 = vmatprep.mubr.bf16.mxu1 %v7923_v21  ;;  %v7465_v38 = vcombine.low %v3904_v8, %v3904_v8 }
 0x125   : > { %1176 = vrot.lane.b32.xlu0 %v9033_v45, %s7922_s29  ;;  %v9198_v45 = vsel %vm2870_vm6, %v7449_v2, 0 }
 0x126   : > { %1470 = vrot.lane.b32.xlu1 %v9076_v10, %s7916_s23  ;;  %v925_v22 = vsel %vm615_vm0, %v897_v13, %v898_v48  ;;  %v1218_v14 = vsel %vm615_vm0, %v1190_v49, %v1191_v6  ;;  %7454 = vmatmul.mubr.msk.bf16.vlgmr.msra.gmra.mxu0 %vm2866_vm10, %v9162_v35 }
 0x127   : > { %v926_v43 = vsel %vm909_vm8, %v9017_v0, %v925_v22  ;;  %v1219_v13 = vsel %vm1202_vm9, %v9058_v19, %v1218_v14  ;;  %v9206_v47 = vpop.permute.xlu0 %2626  ;;  %v9208_v25 = vpop.permute.xlu1 %1456  ;;  %4134 = vmatpush1.bf16.msra.mxu0 %v9198_v45  ;;  %4155 = vmatprep.mubr.bf16.mxu0 %v7923_v21  ;;  %v9215_v0 = vld [vmem:[#allocation2 + $0x158] ss:$144 sps:$4 sm:$0xff]  }
 0x128   : > { %971 = vst [vmem:[#allocation2 + $0xd0] sm:$0x33] %v926_v43  ;;  %1264 = vst [vmem:[#allocation2 + $0xd0] sm:$0xcc] %v1219_v13  ;;  %v2654_v49 = vrot.slane %v9206_v47, 4  ;;  %v1484_v50 = vrot.slane %v9208_v25, 4  ;;  %4135 = vmatprep.subr.bf16.mxu0 %v9200_v12 }
 0x129   : > { %1763 = vrot.lane.b32.xlu0 %v8996_v30, %s7917_s24  ;;  %v9287_v43 = vld [vmem:[%s7972_s21 + $0x40] sm:$0xff]  ;;  %v7798_v13 = vld [vmem:[%s7972_s21 + $0x48] ss:$0 sps:$4 sm:$0x33]  }
 0x12a   : > { %2055 = vrot.lane.b32.xlu1 %v9076_v10, %s7918_s25  ;;  %v2682_v19 = vsel %vm615_vm0, %v2653_v33, %v2654_v49  ;;  %v1512_v31 = vsel %vm615_vm0, %v1483_v59, %v1484_v50  ;;  %7342 = vst.sshfl [vmem:[#allocation2 + $0x80] sm:$0xf pattern:$0x76325410] %v9287_v43 }
 0x12b   : > { %v2683_v63 = vsel %vm2664_vm1, %v8981_v15, %v2682_v19  ;;  %v1513_v16 = vsel %vm1494_vm2, %v9060_v32, %v1512_v31  ;;  %v9237_v39 = vpop.permute.xlu0 %1749  ;;  %v9239_v40 = vpop.permute.xlu1 %2041  ;;  %4136 = vmatpush1.bf16.msra.mxu0 %v9215_v0  ;;  %v9242_v33 = vld [vmem:[#allocation2 + $0x160] ss:$144 sps:$4 sm:$0xff]   ;;  %v9244_v53 = vld [vmem:[#allocation2 + $0x164] ss:$144 sps:$4 sm:$0xff]   ;;  %v9249_v15 = vld [vmem:[#allocation2 + $0x38] ss:$144 sps:$4 sm:$0xff]  }
 0x12c   : > { %2727 = vst [vmem:[#allocation2 + $0x288] sm:$0x33] %v2683_v63  ;;  %1557 = vst [vmem:[#allocation2 + $0x168] sm:$0x33] %v1513_v16  ;;  %v1777_v59 = vrot.slane %v9237_v39, 4  ;;  %v2069_v7 = vrot.slane %v9239_v40, 4  ;;  %4137 = vmatprep.subr.bf16.mxu0 %v9231_v18  ;;  %4178 = vmatprep.subr.bf16.mxu1 %v9244_v53 }
 0x12d   : > { %2348 = vrot.lane.b32.xlu0 %v8996_v30, %s7919_s26  ;;  %4179 = vmatpush1.bf16.msra.mxu1 %v9242_v33 }
 0x12e   : > { %592 = vrot.lane.b32.xlu1 %v8996_v30, %s7920_s27  ;;  %v1805_v32 = vsel %vm615_vm0, %v1776_v58, %v1777_v59  ;;  %v2097_v46 = vsel %vm615_vm0, %v2068_v28, %v2069_v7 }
 0x12f   : > { %v1806_v2 = vsel %vm1787_vm4, %v9102_v60, %v1805_v32  ;;  %v2098_v41 = vsel %vm2079_vm3, %v9104_v26, %v2097_v46  ;;  %v9270_v58 = vpop.permute.xlu0 %2334  ;;  %v9272_v1 = vpop.permute.xlu1 %578  ;;  %4138 = vmatpush1.bf16.msra.mxu0 %v9249_v15  ;;  %v9276_v28 = vld [vmem:[#allocation2 + $0x40] ss:$144 sps:$4 sm:$0xff]   ;;  %v9278_v22 = vld [vmem:[#allocation2 + $0x44] ss:$144 sps:$4 sm:$0xff]   ;;  %v1728_v46 = vrot.slane %v7798_v13, %v7967_v5 }
 0x130   : > { %1850 = vst [vmem:[#allocation2 + $0x168] sm:$0xcc] %v1806_v2  ;;  %2142 = vst [vmem:[#allocation2 + $0x1f8] sm:$0x33] %v2098_v41  ;;  %v2362_v60 = vrot.slane %v9270_v58, 4  ;;  %v606_v14 = vrot.slane %v9272_v1, 4  ;;  %7467 = vmatprep.subr.msk.bf16.mxu0 %vm2870_vm6, %v7466_v34  ;;  %4180 = vmatprep.subr.bf16.mxu1 %v9278_v22 }
 0x131   : > { %v9284_v26 = vld.sshfl [vmem:[%s7972_s21 + $0x48] sm:$0x3 pattern:$0x76325410]  ;;  %885 = vrot.lane.b32.xlu0 %v9076_v10, %s7921_s28  ;;  %v7794_v10 = vld [vmem:[#allocation2 + $0x144] ss:$144 sps:$4 sm:$0xff]   ;;  %4181 = vmatpush1.bf16.msra.mxu1 %v9276_v28 }
 0x132   : > { %1178 = vrot.lane.b32.xlu1 %v8996_v30, %s7922_s29  ;;  %v2390_v19 = vsel %vm615_vm0, %v2361_v36, %v2362_v60  ;;  %v635_v31 = vsel %vm615_vm0, %v605_v29, %v606_v14  ;;  %7458 = vmatmul.mubr.msk.bf16.vlgmr.msra.gmra.mxu0 %vm2866_vm10, %v9162_v35  ;;  %v4235_v30 = vsel %vm2870_vm6, %v7465_v38, 0  ;;  %v7800_v34 = vld [vmem:[%s7972_s21 + $0x48] ss:$0 sps:$4 sm:$0x33]   ;;  %v7797_v2 = vld [vmem:[#allocation2 + $0x24] ss:$144 sps:$4 sm:$0xff]  }
 0x133   : > { %v2391_v8 = vsel %vm2372_vm5, %v9133_v51, %v2390_v19  ;;  %v636_v36 = vsel %vm617_vm7, %v9135_v62, %v635_v31  ;;  %v9313_v63 = vpop.permute.xlu0 %871  ;;  %v9315_v16 = vpop.permute.xlu1 %1164  ;;  %4251 = vmatpush1.bf16.msra.mxu0 %v4235_v30  ;;  %7469 = vmatprep.subr.msk.bf16.mxu1 %vm2870_vm6, %v9030_v56  ;;  %v7799_v51 = vld [vmem:[%s7972_s21 + $0x48] ss:$0 sps:$4 sm:$0x33]   ;;  %v7792_v62 = vld [vmem:[#allocation2 + $0x140] ss:$144 sps:$4 sm:$0xff]   ;;  %v557_v30 = vrot.slane %v7800_v34, %v7967_v5 }
 0x134   : > { %2435 = vst [vmem:[#allocation2 + $0x1f8] sm:$0xcc] %v2391_v8  ;;  %680 = vst [vmem:[#allocation2 + $0x48] sm:$0xcc] %v636_v36  ;;  %v899_v29 = vrot.slane %v9313_v63, 4  ;;  %v1192_v32 = vrot.slane %v9315_v16, 4  ;;  %4252 = vmatprep.subr.bf16.mxu0 %v7794_v10  ;;  %7460 = vmatmul.mubr.msk.bf16.vlgmr.msra.gmra.mxu1 %vm2866_vm10, %v9162_v35  ;;  %v344_v8 = vcombine.high %v9287_v43, %v9287_v43 }
 0x135   : > { %2642 = vrot.lane.b32.xlu0 %v9284_v26, %s7915_s22  ;;  %4272 = vmatprep.mubr.bf16.mxu0 %v7923_v21 }
 0x136   : > { %1472 = vrot.lane.b32.xlu1 %v9284_v26, %s7916_s23  ;;  %v927_v38 = vsel %vm615_vm0, %v898_v48, %v899_v29  ;;  %v1220_v56 = vsel %vm615_vm0, %v1191_v6, %v1192_v32  ;;  %4294 = vmatpush1.bf16.msra.mxu1 %v9091_v42  ;;  %v7801_v42 = vld [vmem:[%s7972_s21 + $0x48] ss:$0 sps:$4 sm:$0x33]  }
 0x137   : > { %v928_v41 = vsel %vm909_vm8, %v9171_v11, %v927_v38  ;;  %v1221_v13 = vsel %vm1202_vm9, %v9173_v24, %v1220_v56  ;;  %v9346_v48 = vpop.permute.xlu0 %2628  ;;  %v9348_v19 = vpop.permute.xlu1 %1458  ;;  %4253 = vmatpush1.bf16.msra.mxu0 %v7792_v62  ;;  %4295 = vmatprep.subr.bf16.mxu1 %v8931_v44  ;;  %v7795_v11 = vld [vmem:[#allocation2 + $0x20] ss:$144 sps:$4 sm:$0xff]   ;;  %v2313_v24 = vrot.slane %v7799_v51, %v7967_v5 }
 0x138   : > { %972 = vst [vmem:[#allocation2 + $0xd8] sm:$0x33] %v928_v41  ;;  %1265 = vst [vmem:[#allocation2 + $0xd8] sm:$0xcc] %v1221_v13  ;;  %v2655_v6 = vrot.slane %v9346_v48, 4  ;;  %v1485_v31 = vrot.slane %v9348_v19, 4  ;;  %4254 = vmatprep.subr.bf16.mxu0 %v7797_v2  ;;  %4315 = vmatprep.mubr.bf16.mxu1 %v7923_v21 }
 0x139   : > { %1765 = vrot.lane.b32.xlu0 %v1728_v46, %s7917_s24  ;;  %7343 = vst.sshfl [vmem:[#allocation2 + $0x88] sm:$0xf pattern:$0x76325410] %v344_v8 }
 0x13a   : > { %2057 = vrot.lane.b32.xlu1 %v9284_v26, %s7918_s25  ;;  %v2684_v10 = vsel %vm615_vm0, %v2654_v49, %v2655_v6  ;;  %v1514_v44 = vsel %vm615_vm0, %v1484_v50, %v1485_v31  ;;  %4296 = vmatpush1.bf16.msra.mxu1 %v8949_v9 }
 0x13b   : > { %v2685_v36 = vsel %vm2664_vm1, %v9206_v47, %v2684_v10  ;;  %v1515_v51 = vsel %vm1494_vm2, %v9208_v25, %v1514_v44  ;;  %v9377_v62 = vpop.permute.xlu0 %1751  ;;  %v9379_v49 = vpop.permute.xlu1 %2043  ;;  %4255 = vmatpush1.bf16.msra.mxu0 %v7795_v11  ;;  %4297 = vmatprep.subr.bf16.mxu1 %v8969_v20  ;;  %v1143_v47 = vrot.slane %v7801_v42, %v7967_v5 }
 0x13c   : > { %2728 = vst [vmem:[#allocation2 + $0x290] sm:$0x33] %v2685_v36  ;;  %1558 = vst [vmem:[#allocation2 + $0x170] sm:$0x33] %v1515_v51  ;;  %v1778_v50 = vrot.slane %v9377_v62, 4  ;;  %v2070_v46 = vrot.slane %v9379_v49, 4  ;;  %7471 = vmatprep.subr.msk.bf16.mxu0 %vm2870_vm6, %v9008_v23 }
 0x13d   : > { %2350 = vrot.lane.b32.xlu0 %v2313_v24, %s7919_s26  ;;  %v4430_v51 = vld [vmem:[#allocation2 + $0x280] sm:$0x33] }
 0x13e   : > { %594 = vrot.lane.b32.xlu1 %v557_v30, %s7920_s27  ;;  %v1807_v9 = vsel %vm615_vm0, %v1777_v59, %v1778_v50  ;;  %v2099_v20 = vsel %vm615_vm0, %v2069_v7, %v2070_v46  ;;  %7468 = vmatmul.mubr.msk.bf16.vlgmr.msra.gmra.mxu0 %vm2866_vm10, %v8703_v61 }
 0x13f   : > { %v1808_v23 = vsel %vm1787_vm4, %v9237_v39, %v1807_v9  ;;  %v2100_v5 = vsel %vm2079_vm3, %v9239_v40, %v2099_v20  ;;  %v9406_v25 = vpop.permute.xlu0 %2336  ;;  %v9408_v43 = vpop.permute.xlu1 %580  ;;  %4298 = vmatpush1.bf16.msra.mxu1 %v8988_v4  ;;  %4337 = vmatpush1.bf16.msra.mxu0 %v9050_v17 }
 0x140   : > { %1851 = vst [vmem:[#allocation2 + $0x170] sm:$0xcc] %v1808_v23  ;;  %2143 = vst [vmem:[#allocation2 + $0x200] sm:$0x33] %v2100_v5  ;;  %v2363_v59 = vrot.slane %v9406_v25, 4  ;;  %v607_v7 = vrot.slane %v9408_v43, 4  ;;  %4338 = vmatprep.subr.bf16.mxu0 %v9052_v27  ;;  %7473 = vmatprep.subr.msk.bf16.mxu1 %vm2870_vm6, %v9147_v55  ;;  %v7496_v5 = vcombine.high %v4430_v51, %v4430_v51 }
 0x141   : > { %887 = vrot.lane.b32.xlu0 %v9284_v26, %s7921_s28  ;;  %v4428_v55 = vld [vmem:[#allocation2 + $0x270] sm:$0x33]  ;;  %4358 = vmatprep.mubr.bf16.mxu0 %v7923_v21 }
 0x142   : > { %1180 = vrot.lane.b32.xlu1 %v1143_v47, %s7922_s29  ;;  %v2392_v4 = vsel %vm615_vm0, %v2362_v60, %v2363_v59  ;;  %v637_v17 = vsel %vm615_vm0, %v606_v14, %v607_v7  ;;  %7470 = vmatmul.mubr.msk.bf16.vlgmr.msra.gmra.mxu1 %vm2866_vm10, %v8703_v61  ;;  %v7492_v38 = vcombine.high %v4428_v55, %v4428_v55 }
 0x143   : > { %v2393_v39 = vsel %vm2372_vm5, %v9270_v58, %v2392_v4  ;;  %v638_v40 = vsel %vm617_vm7, %v9272_v1, %v637_v17  ;;  %v9437_v26 = vpop.permute.xlu0 %873  ;;  %4339 = vmatpush1.bf16.msra.mxu0 %v9069_v57  ;;  %4380 = vmatpush1.bf16.msra.mxu1 %v9198_v45  ;;  %v7491_v58 = vcombine.low %v4428_v55, %v4428_v55  ;;  %v4431_v55 = vld [vmem:[#allocation2 + $0x288] sm:$0x33] }
 0x144   : > { %v9439_v60 = vpop.permute.xlu1 %1166  ;;  %2436 = vst [vmem:[#allocation2 + $0x200] sm:$0xcc] %v2393_v39  ;;  %681 = vst [vmem:[#allocation2 + $0x50] sm:$0xcc] %v638_v40  ;;  %v900_v14 = vrot.slane %v9437_v26, 4  ;;  %4340 = vmatprep.subr.bf16.mxu0 %v9093_v54  ;;  %4381 = vmatprep.subr.bf16.mxu1 %v9200_v12  ;;  %v7497_v40 = vcombine.low %v4431_v55, %v4431_v55 }
 0x145   : > { %v1193_v34 = vrot.slane %v9439_v60, 4  ;;  %4401 = vmatprep.mubr.bf16.mxu1 %v7923_v21 }
 0x146   : > { %v929_v1 = vsel %vm615_vm0, %v899_v29, %v900_v14  ;;  %v4429_v29 = vld [vmem:[#allocation2 + $0x278] sm:$0x33] }
 0x147   : > { %v1222_v45 = vsel %vm615_vm0, %v1192_v32, %v1193_v34  ;;  %v930_v56 = vsel %vm909_vm8, %v9313_v63, %v929_v1  ;;  %v2631_v41 = vpop.permute.xlu0 %2630  ;;  %4341 = vmatpush1.bf16.msra.mxu0 %v9112_v52  ;;  %4382 = vmatpush1.bf16.msra.mxu1 %v9215_v0  ;;  %v4533_v63 = vsel %vm2870_vm6, %v7491_v58, 0  ;;  %v7494_v30 = vcombine.high %v4429_v29, %v4429_v29 }
 0x148   : > { %v1223_v2 = vsel %vm1202_vm9, %v9315_v16, %v1222_v45  ;;  %v9462_v13 = vpop.permute.xlu1 %1460  ;;  %973 = vst [vmem:[#allocation2 + $0xe0] sm:$0x33] %v930_v56  ;;  %v2656_v11 = vrot.slane %v2631_v41, 4  ;;  %4383 = vmatprep.subr.bf16.mxu1 %v9231_v18  ;;  %7499 = vmatprep.subr.msk.bf16.mxu0 %vm2870_vm6, %v7492_v38  ;;  %v7493_v42 = vcombine.low %v4429_v29, %v4429_v29  ;;  %v9587_v56 = vld [vmem:[#allocation2 + $0x16c] ss:$144 sps:$4 sm:$0xff]  }
 0x149   : > { %1266 = vst [vmem:[#allocation2 + $0xe0] sm:$0xcc] %v1223_v2  ;;  %v1486_v32 = vrot.slane %v9462_v13, 4  ;;  %v5029_v2 = vld [vmem:[#allocation2 + $0x288] sm:$0x33] }
 0x14a   : > { %v2686_v16 = vsel %vm615_vm0, %v2655_v6, %v2656_v11  ;;  %7472 = vmatmul.mubr.msk.bf16.vlgmr.msra.gmra.mxu0 %vm2866_vm10, %v8703_v61  ;;  %v4539_v36 = vsel %vm2870_vm6, %v7493_v42, 0  ;;  %v9617_v42 = vcombine.high %v5029_v2, %v5029_v2 }
 0x14b   : > { %v1516_v24 = vsel %vm615_vm0, %v1485_v31, %v1486_v32  ;;  %v2687_v10 = vsel %vm2664_vm1, %v9346_v48, %v2686_v16  ;;  %v9484_v8 = vpop.permute.xlu0 %1753  ;;  %4384 = vmatpush1.bf16.msra.mxu1 %v9249_v15  ;;  %4567 = vmatpush1.bf16.msra.mxu0 %v4533_v63 }
 0x14c   : > { %v1517_v44 = vsel %vm1494_vm2, %v9348_v19, %v1516_v24  ;;  %v9486_v6 = vpop.permute.xlu1 %2045  ;;  %2729 = vst [vmem:[#allocation2 + $0x298] sm:$0x33] %v2687_v10  ;;  %v1779_v31 = vrot.slane %v9484_v8, 4  ;;  %4568 = vmatprep.subr.bf16.mxu0 %v9052_v27  ;;  %7501 = vmatprep.subr.msk.bf16.mxu1 %vm2870_vm6, %v7494_v30  ;;  %v9507_v27 = vld [vmem:[%s11633_s1] sm:$0xff]   ;;  %v9615_v30 = vld [vmem:[#allocation2 + $0x4c] ss:$144 sps:$4 sm:$0xff]  }
 0x14d   : > { %1559 = vst [vmem:[#allocation2 + $0x178] sm:$0x33] %v1517_v44  ;;  %v2071_v61 = vrot.slane %v9486_v6, 4  ;;  %4588 = vmatprep.mubr.bf16.mxu0 %v7923_v21 }
 0x14e   : > { %v1809_v48 = vsel %vm615_vm0, %v1778_v50, %v1779_v31  ;;  %7474 = vmatmul.mubr.msk.bf16.vlgmr.msra.gmra.mxu1 %vm2866_vm10, %v9507_v27 }
 0x14f   : > { %v2101_v19 = vsel %vm615_vm0, %v2070_v46, %v2071_v61  ;;  %v1810_v50 = vsel %vm1787_vm4, %v9377_v62, %v1809_v48  ;;  %v9516_v9 = vpop.permute.xlu0 %2338  ;;  %4569 = vmatpush1.bf16.msra.mxu0 %v9069_v57  ;;  %4610 = vmatpush1.bf16.msra.mxu1 %v4539_v36  ;;  %v7495_v62 = vcombine.low %v4430_v51, %v4430_v51 }
 0x150   : > { %v2102_v47 = vsel %vm2079_vm3, %v9379_v49, %v2101_v19  ;;  %v9518_v46 = vpop.permute.xlu1 %2632  ;;  %1852 = vst [vmem:[#allocation2 + $0x178] sm:$0xcc] %v1810_v50  ;;  %v2364_v20 = vrot.slane %v9516_v9, 4  ;;  %4570 = vmatprep.subr.bf16.mxu0 %v9093_v54  ;;  %4611 = vmatprep.subr.bf16.mxu1 %v9200_v12 }
 0x151   : > { %2144 = vst [vmem:[#allocation2 + $0x208] sm:$0x33] %v2102_v47  ;;  %v2657_v23 = vrot.slane %v9518_v46, 4  ;;  %4631 = vmatprep.mubr.bf16.mxu1 %v7923_v21 }
 0x152   : > { %v2394_v57 = vsel %vm615_vm0, %v2363_v59, %v2364_v20 }
 0x153   : > { %v2688_v49 = vsel %vm615_vm0, %v2656_v11, %v2657_v23  ;;  %v2395_v4 = vsel %vm2372_vm5, %v9406_v25, %v2394_v57  ;;  %v9537_v12 = vpop.permute.xlu0 %582  ;;  %4571 = vmatpush1.bf16.msra.mxu0 %v9112_v52  ;;  %4612 = vmatpush1.bf16.msra.mxu1 %v9215_v0  ;;  %v4545_v25 = vsel %vm2870_vm6, %v7495_v62, 0 }
 0x154   : > { %v2689_v54 = vsel %vm2664_vm1, %v2631_v41, %v2688_v49  ;;  %v9539_v17 = vpop.permute.xlu1 %875  ;;  %2437 = vst [vmem:[#allocation2 + $0x208] sm:$0xcc] %v2395_v4  ;;  %v608_v59 = vrot.slane %v9537_v12, 4  ;;  %4613 = vmatprep.subr.bf16.mxu1 %v9231_v18  ;;  %7503 = vmatprep.subr.msk.bf16.mxu0 %vm2870_vm6, %v7496_v5  ;;  %v7498_v18 = vcombine.high %v4431_v55, %v4431_v55 }
 0x155   : > { %2730 = vst [vmem:[#allocation2 + $0x2a0] sm:$0x33] %v2689_v54  ;;  %v901_v39 = vrot.slane %v9539_v17, 4 }
 0x156   : > { %v639_v52 = vsel %vm615_vm0, %v607_v7, %v608_v59  ;;  %7500 = vmatmul.mubr.msk.bf16.vlgmr.msra.gmra.mxu0 %vm2866_vm10, %v8899_v37 }
 0x157   : > { %v931_v0 = vsel %vm615_vm0, %v900_v14, %v901_v39  ;;  %v640_v58 = vsel %vm617_vm7, %v9408_v43, %v639_v52  ;;  %v9564_v45 = vpop.permute.xlu0 %1168  ;;  %4614 = vmatpush1.bf16.msra.mxu1 %v9249_v15  ;;  %4653 = vmatpush1.bf16.msra.mxu0 %v4545_v25 }
 0x158   : > { %v932_v1 = vsel %vm909_vm8, %v9437_v26, %v931_v0  ;;  %v9566_v7 = vpop.permute.xlu1 %1462  ;;  %682 = vst [vmem:[#allocation2 + $0x58] sm:$0xcc] %v640_v58  ;;  %v1194_v14 = vrot.slane %v9564_v45, 4  ;;  %4654 = vmatprep.subr.bf16.mxu0 %v9244_v53  ;;  %7505 = vmatprep.subr.msk.bf16.mxu1 %vm2870_vm6, %v7498_v18  ;;  %v4551_v26 = vsel %vm2870_vm6, %v7497_v40, 0 }
 0x159   : > { %974 = vst [vmem:[#allocation2 + $0xe8] sm:$0x33] %v932_v1  ;;  %v1487_v38 = vrot.slane %v9566_v7, 4  ;;  %4674 = vmatprep.mubr.bf16.mxu0 %v7923_v21 }
 0x15a   : > { %v1224_v43 = vsel %vm615_vm0, %v1193_v34, %v1194_v14  ;;  %7502 = vmatmul.mubr.msk.bf16.vlgmr.msra.gmra.mxu1 %vm2866_vm10, %v8899_v37 }
 0x15b   : > { %v1518_v15 = vsel %vm615_vm0, %v1486_v32, %v1487_v38  ;;  %v1225_v41 = vsel %vm1202_vm9, %v9439_v60, %v1224_v43  ;;  %v9593_v29 = vpop.permute.xlu0 %1755  ;;  %4655 = vmatpush1.bf16.msra.mxu0 %v9242_v33  ;;  %4696 = vmatpush1.bf16.msra.mxu1 %v4551_v26  ;;  %v9602_v60 = vld [vmem:[#allocation2 + $0x168] ss:$144 sps:$4 sm:$0xff]   ;;  %v9718_v43 = vld [vmem:[#allocation2 + $0x54] ss:$144 sps:$4 sm:$0xff]  }
 0x15c   : > { %v1519_v34 = vsel %vm1494_vm2, %v9462_v13, %v1518_v15  ;;  %v9595_v11 = vpop.permute.xlu1 %2047  ;;  %1267 = vst [vmem:[#allocation2 + $0xe8] sm:$0xcc] %v1225_v41  ;;  %v1780_v32 = vrot.slane %v9593_v29, 4  ;;  %4656 = vmatprep.subr.bf16.mxu0 %v9278_v22  ;;  %4697 = vmatprep.subr.bf16.mxu1 %v9587_v56  ;;  %v7524_v13 = vcombine.low %v5029_v2, %v5029_v2 }
 0x15d   : > { %1560 = vst [vmem:[#allocation2 + $0x180] sm:$0x33] %v1519_v34  ;;  %v2072_v63 = vrot.slane %v9595_v11, 4  ;;  %4717 = vmatprep.mubr.bf16.mxu1 %v7923_v21 }
 0x15e   : > { %v1811_v16 = vsel %vm615_vm0, %v1779_v31, %v1780_v32  ;;  %v5030_v31 = vld [vmem:[#allocation2 + $0x290] sm:$0x33] }
 0x15f   : > { %v2103_v24 = vsel %vm615_vm0, %v2071_v61, %v2072_v63  ;;  %v1812_v10 = vsel %vm1787_vm4, %v9484_v8, %v1811_v16  ;;  %v9623_v48 = vpop.permute.xlu0 %2340  ;;  %4657 = vmatpush1.bf16.msra.mxu0 %v9276_v28  ;;  %4698 = vmatpush1.bf16.msra.mxu1 %v9602_v60  ;;  %v9634_v8 = vld [vmem:[#allocation2 + $0x48] ss:$144 sps:$4 sm:$0xff]   ;;  %v9651_v47 = vcombine.high %v5030_v31, %v5030_v31 }
 0x160   : > { %v2104_v44 = vsel %vm2079_vm3, %v9486_v6, %v2103_v24  ;;  %v9625_v19 = vpop.permute.xlu1 %584  ;;  %1853 = vst [vmem:[#allocation2 + $0x180] sm:$0xcc] %v1812_v10  ;;  %v2365_v61 = vrot.slane %v9623_v48, 4  ;;  %4699 = vmatprep.subr.bf16.mxu1 %v9615_v30  ;;  %7532 = vmatprep.subr.msk.bf16.mxu0 %vm2870_vm6, %v9617_v42  ;;  %v9637_v6 = vsel %vm2870_vm6, %v7524_v13, 0  ;;  %v7526_v62 = vcombine.low %v5030_v31, %v5030_v31  ;;  %v9754_v10 = vld [vmem:[#allocation2 + $0x17c] ss:$144 sps:$4 sm:$0xff]  }
 0x161   : > { %2145 = vst [vmem:[#allocation2 + $0x210] sm:$0x33] %v2104_v44  ;;  %v609_v36 = vrot.slane %v9625_v19, 4 }
 0x162   : > { %v2396_v51 = vsel %vm615_vm0, %v2364_v20, %v2365_v61  ;;  %7504 = vmatmul.mubr.msk.bf16.vlgmr.msra.gmra.mxu0 %vm2866_vm10, %v8899_v37  ;;  %v9687_v55 = vsel %vm2870_vm6, %v7526_v62, 0 }
 0x163   : > { %v641_v50 = vsel %vm615_vm0, %v608_v59, %v609_v36  ;;  %v2397_v57 = vsel %vm2372_vm5, %v9516_v9, %v2396_v51  ;;  %v9657_v5 = vpop.permute.xlu0 %877  ;;  %4700 = vmatpush1.bf16.msra.mxu1 %v9634_v8  ;;  %5172 = vmatpush1.bf16.msra.mxu0 %v9637_v6  ;;  %v9689_v59 = vld [vmem:[#allocation2 + $0x174] ss:$144 sps:$4 sm:$0xff]  }
 0x164   : > { %v642_v49 = vsel %vm617_vm7, %v9537_v12, %v641_v50  ;;  %v9659_v20 = vpop.permute.xlu1 %1170  ;;  %2438 = vst [vmem:[#allocation2 + $0x210] sm:$0xcc] %v2397_v57  ;;  %v902_v37 = vrot.slane %v9657_v5, 4  ;;  %5173 = vmatprep.subr.bf16.mxu0 %v9587_v56  ;;  %7534 = vmatprep.subr.msk.bf16.mxu1 %vm2870_vm6, %v9651_v47  ;;  %v9682_v12 = vld [vmem:[%s11633_s1 + $0x10] sm:$0xff]  }
 0x165   : > { %683 = vst [vmem:[#allocation2 + $0x60] sm:$0xcc] %v642_v49  ;;  %v1195_v4 = vrot.slane %v9659_v20, 4  ;;  %5193 = vmatprep.mubr.bf16.mxu0 %v7923_v21 }
 0x166   : > { %v933_v9 = vsel %vm615_vm0, %v901_v39, %v902_v37  ;;  %7506 = vmatmul.mubr.msk.bf16.vlgmr.msra.gmra.mxu1 %vm2866_vm10, %v9682_v12  ;;  %v5031_v39 = vld [vmem:[#allocation2 + $0x298] sm:$0x33] }
 0x167   : > { %v1226_v54 = vsel %vm615_vm0, %v1194_v14, %v1195_v4  ;;  %v934_v25 = vsel %vm909_vm8, %v9539_v17, %v933_v9  ;;  %v9695_v0 = vpop.permute.xlu0 %2634  ;;  %5174 = vmatpush1.bf16.msra.mxu0 %v9602_v60  ;;  %5215 = vmatpush1.bf16.msra.mxu1 %v9687_v55  ;;  %v9705_v17 = vld [vmem:[#allocation2 + $0x170] ss:$144 sps:$4 sm:$0xff]   ;;  %v7528_v1 = vcombine.low %v5031_v39, %v5031_v39 }
 0x168   : > { %v1227_v52 = vsel %vm1202_vm9, %v9564_v45, %v1226_v54  ;;  %v9697_v18 = vpop.permute.xlu1 %1464  ;;  %975 = vst [vmem:[#allocation2 + $0xf0] sm:$0x33] %v934_v25  ;;  %v2658_v40 = vrot.slane %v9695_v0, 4  ;;  %5175 = vmatprep.subr.bf16.mxu0 %v9615_v30  ;;  %5216 = vmatprep.subr.bf16.mxu1 %v9689_v59  ;;  %v9720_v15 = vcombine.high %v5031_v39, %v5031_v39  ;;  %v9786_v54 = vld [vmem:[#allocation2 + $0x5c] ss:$144 sps:$4 sm:$0xff]  }
 0x169   : > { %1268 = vst [vmem:[#allocation2 + $0xf0] sm:$0xcc] %v1227_v52  ;;  %v1488_v58 = vrot.slane %v9697_v18, 4  ;;  %5236 = vmatprep.mubr.bf16.mxu1 %v7923_v21 }
 0x16a   : > { %v2690_v45 = vsel %vm615_vm0, %v2657_v23, %v2658_v40  ;;  %v5036_v23 = vld [vmem:[#allocation2 + $0x2a0] sm:$0x33] }
 0x16b   : > { %v1520_v14 = vsel %vm615_vm0, %v1487_v38, %v1488_v58  ;;  %v2691_v26 = vsel %vm2664_vm1, %v9518_v46, %v2690_v45  ;;  %v9726_v41 = vpop.permute.xlu0 %1757  ;;  %5176 = vmatpush1.bf16.msra.mxu0 %v9634_v8  ;;  %5217 = vmatpush1.bf16.msra.mxu1 %v9705_v17  ;;  %v9737_v46 = vld [vmem:[#allocation2 + $0x50] ss:$144 sps:$4 sm:$0xff]   ;;  %v7531_v44 = vcombine.high %v5036_v23, %v5036_v23  ;;  %v9788_v39 = vld [vmem:[#allocation2 + $0x184] ss:$144 sps:$4 sm:$0xff]  }
 0x16c   : > { %v1521_v2 = vsel %vm1494_vm2, %v9566_v7, %v1520_v14  ;;  %v9728_v34 = vpop.permute.xlu1 %2049  ;;  %2731 = vst [vmem:[#allocation2 + $0x2a8] sm:$0x33] %v2691_v26  ;;  %v1781_v38 = vrot.slane %v9726_v41, 4  ;;  %5218 = vmatprep.subr.bf16.mxu1 %v9718_v43  ;;  %7536 = vmatprep.subr.msk.bf16.mxu0 %vm2870_vm6, %v9720_v15  ;;  %v9740_v7 = vsel %vm2870_vm6, %v7528_v1, 0  ;;  %v7530_v31 = vcombine.low %v5036_v23, %v5036_v23 }
 0x16d   : > { %1561 = vst [vmem:[#allocation2 + $0x188] sm:$0x33] %v1521_v2  ;;  %v2073_v13 = vrot.slane %v9728_v34, 4 }
 0x16e   : > { %v1813_v16 = vsel %vm615_vm0, %v1780_v32, %v1781_v38  ;;  %7533 = vmatmul.mubr.msk.bf16.vlgmr.msra.gmra.mxu0 %vm2866_vm10, %v9162_v35  ;;  %v5156_v9 = vsel %vm2870_vm6, %v7530_v31, 0 }
 0x16f   : > { %v2105_v24 = vsel %vm615_vm0, %v2072_v63, %v2073_v13  ;;  %v1814_v51 = vsel %vm1787_vm4, %v9593_v29, %v1813_v16  ;;  %v9760_v32 = vpop.permute.xlu0 %2342  ;;  %5219 = vmatpush1.bf16.msra.mxu1 %v9737_v46  ;;  %5258 = vmatpush1.bf16.msra.mxu0 %v9740_v7  ;;  %v9770_v29 = vld [vmem:[#allocation2 + $0x178] ss:$144 sps:$4 sm:$0xff]  }
 0x170   : > { %v2106_v50 = vsel %vm2079_vm3, %v9595_v11, %v2105_v24  ;;  %v9762_v62 = vpop.permute.xlu1 %586  ;;  %1854 = vst [vmem:[#allocation2 + $0x188] sm:$0xcc] %v1814_v51  ;;  %v2366_v63 = vrot.slane %v9760_v32, 4  ;;  %5259 = vmatprep.subr.bf16.mxu0 %v9754_v10  ;;  %7538 = vmatprep.subr.msk.bf16.mxu1 %vm2870_vm6, %v7531_v44  ;;  %v9818_v23 = vld [vmem:[#allocation2 + $0x64] ss:$144 sps:$4 sm:$0xff]  }
 0x171   : > { %2146 = vst [vmem:[#allocation2 + $0x218] sm:$0x33] %v2106_v50  ;;  %v610_v57 = vrot.slane %v9762_v62, 4  ;;  %5279 = vmatprep.mubr.bf16.mxu0 %v7923_v21 }
 0x172   : > { %v2398_v11 = vsel %vm615_vm0, %v2365_v61, %v2366_v63  ;;  %7535 = vmatmul.mubr.msk.bf16.vlgmr.msra.gmra.mxu1 %vm2866_vm10, %v9162_v35 }
 0x173   : > { %v643_v49 = vsel %vm615_vm0, %v609_v36, %v610_v57  ;;  %v2399_v25 = vsel %vm2372_vm5, %v9623_v48, %v2398_v11  ;;  %v9794_v52 = vpop.permute.xlu0 %879  ;;  %5260 = vmatpush1.bf16.msra.mxu0 %v9770_v29  ;;  %5301 = vmatpush1.bf16.msra.mxu1 %v5156_v9  ;;  %v5028_v36 = vld [vmem:[#allocation2 + $0x280] sm:$0x33]  ;;  %v9803_v48 = vld [vmem:[#allocation2 + $0x58] ss:$144 sps:$4 sm:$0xff]  }
 0x174   : > { %v644_v61 = vsel %vm617_vm7, %v9625_v19, %v643_v49  ;;  %v9796_v1 = vpop.permute.xlu1 %1172  ;;  %2439 = vst [vmem:[#allocation2 + $0x218] sm:$0xcc] %v2399_v25  ;;  %v903_v45 = vrot.slane %v9794_v52, 4  ;;  %5261 = vmatprep.subr.bf16.mxu0 %v9786_v54  ;;  %5302 = vmatprep.subr.bf16.mxu1 %v9788_v39  ;;  %v9805_v19 = vld [vmem:[#allocation2 + $0x180] ss:$144 sps:$4 sm:$0xff]   ;;  %v7545_v16 = vcombine.high %v5028_v36, %v5028_v36 }
 0x175   : > { %684 = vst [vmem:[#allocation2 + $0x68] sm:$0xcc] %v644_v61  ;;  %v1196_v14 = vrot.slane %v9796_v1, 4  ;;  %5322 = vmatprep.mubr.bf16.mxu1 %v7923_v21  ;;  %v7544_v24 = vcombine.low %v5028_v36, %v5028_v36 }
 0x176   : > { %v935_v26 = vsel %vm615_vm0, %v902_v37, %v903_v45 }
 0x177   : > { %v1228_v2 = vsel %vm615_vm0, %v1195_v4, %v1196_v14  ;;  %v936_v44 = vsel %vm909_vm8, %v9657_v5, %v935_v26  ;;  %v9824_v51 = vpop.permute.xlu0 %2636  ;;  %5262 = vmatpush1.bf16.msra.mxu0 %v9803_v48  ;;  %5303 = vmatpush1.bf16.msra.mxu1 %v9805_v19  ;;  %v9834_v5 = vld [vmem:[#allocation2 + $0x60] ss:$144 sps:$4 sm:$0xff]   ;;  %v5359_v49 = vsel %vm2870_vm6, %v7544_v24, 0 }
 0x178   : > { %v1229_v31 = vsel %vm1202_vm9, %v9659_v20, %v1228_v2  ;;  %v9828_v37 = vpop.permute.xlu1 %1466  ;;  %976 = vst [vmem:[#allocation2 + $0xf8] sm:$0x33] %v936_v44  ;;  %v2659_v4 = vrot.slane %v9824_v51, 4  ;;  %5304 = vmatprep.subr.bf16.mxu1 %v9818_v23  ;;  %7546 = vmatprep.subr.msk.bf16.mxu0 %vm2870_vm6, %v7545_v16 }
 0x179   : > { %1269 = vst [vmem:[#allocation2 + $0xf8] sm:$0xcc] %v1229_v31  ;;  %v1489_v50 = vrot.slane %v9828_v37, 4 }
 0x17a   : > { %v2692_v20 = vsel %vm615_vm0, %v2658_v40, %v2659_v4  ;;  %7537 = vmatmul.mubr.msk.bf16.vlgmr.msra.gmra.mxu0 %vm2866_vm10, %v9162_v35 }
 0x17b   : > { %v1522_v11 = vsel %vm615_vm0, %v1488_v58, %v1489_v50  ;;  %v2693_v9 = vsel %vm2664_vm1, %v9695_v0, %v2692_v20  ;;  %v9853_v61 = vpop.permute.xlu0 %1759  ;;  %5305 = vmatpush1.bf16.msra.mxu1 %v9834_v5  ;;  %5375 = vmatpush1.bf16.msra.mxu0 %v5359_v49  ;;  %v5553_v49 = vld [vmem:[#allocation2 + $0x298] sm:$0x33] }
 0x17c   : > { %v1523_v25 = vsel %vm1494_vm2, %v9697_v18, %v1522_v11  ;;  %v9856_v40 = vpop.permute.xlu1 %2051  ;;  %2732 = vst [vmem:[#allocation2 + $0x2b0] sm:$0x33] %v2693_v9  ;;  %v1782_v58 = vrot.slane %v9853_v61, 4  ;;  %5376 = vmatprep.subr.bf16.mxu0 %v9244_v53  ;;  %7548 = vmatprep.subr.msk.bf16.mxu1 %vm2870_vm6, %v9617_v42 }
 0x17d   : > { %1562 = vst [vmem:[#allocation2 + $0x190] sm:$0x33] %v1523_v25  ;;  %v2074_v36 = vrot.slane %v9856_v40, 4  ;;  %5396 = vmatprep.mubr.bf16.mxu0 %v7923_v21 }
 0x17e   : > { %v1815_v0 = vsel %vm615_vm0, %v1781_v38, %v1782_v58  ;;  %7539 = vmatmul.mubr.msk.bf16.vlgmr.msra.gmra.mxu1 %vm2866_vm10, %v9162_v35 }
 0x17f   : > { %v2107_v18 = vsel %vm615_vm0, %v2073_v13, %v2074_v36  ;;  %v1816_v53 = vsel %vm1787_vm4, %v9726_v41, %v1815_v0  ;;  %v9880_v26 = vpop.permute.xlu0 %2344  ;;  %5377 = vmatpush1.bf16.msra.mxu0 %v9242_v33  ;;  %5418 = vmatpush1.bf16.msra.mxu1 %v9637_v6  ;;  %v7572_v0 = vcombine.low %v5553_v49, %v5553_v49 }
 0x180   : > { %v2108_v42 = vsel %vm2079_vm3, %v9728_v34, %v2107_v18  ;;  %v9884_v38 = vpop.permute.xlu1 %588  ;;  %1855 = vst [vmem:[#allocation2 + $0x190] sm:$0xcc] %v1816_v53  ;;  %v2367_v13 = vrot.slane %v9880_v26, 4  ;;  %5378 = vmatprep.subr.bf16.mxu0 %v9278_v22  ;;  %5419 = vmatprep.subr.bf16.mxu1 %v9587_v56 }
 0x181   : > { %2147 = vst [vmem:[#allocation2 + $0x220] sm:$0x33] %v2108_v42  ;;  %v611_v35 = vrot.slane %v9884_v38, 4  ;;  %5439 = vmatprep.mubr.bf16.mxu1 %v7923_v21 }
 0x182   : > { %v2400_v33 = vsel %vm615_vm0, %v2366_v63, %v2367_v13 }
 0x183   : > { %v645_v6 = vsel %vm615_vm0, %v610_v57, %v611_v35  ;;  %v2401_v41 = vsel %vm2372_vm5, %v9760_v32, %v2400_v33  ;;  %v9905_v56 = vpop.permute.xlu0 %881  ;;  %5379 = vmatpush1.bf16.msra.mxu0 %v9276_v28  ;;  %5420 = vmatpush1.bf16.msra.mxu1 %v9602_v60 }
 0x184   : > { %v646_v22 = vsel %vm617_vm7, %v9762_v62, %v645_v6  ;;  %v9909_v34 = vpop.permute.xlu1 %1174  ;;  %2440 = vst [vmem:[#allocation2 + $0x220] sm:$0xcc] %v2401_v41  ;;  %v904_v63 = vrot.slane %v9905_v56, 4  ;;  %5421 = vmatprep.subr.bf16.mxu1 %v9615_v30  ;;  %7550 = vmatprep.subr.msk.bf16.mxu0 %vm2870_vm6, %v9651_v47 }
 0x185   : > { %685 = vst [vmem:[#allocation2 + $0x70] sm:$0xcc] %v646_v22  ;;  %v1197_v57 = vrot.slane %v9909_v34, 4  ;;  %v5554_v22 = vld [vmem:[#allocation2 + $0x2a0] sm:$0x33] }
 0x186   : > { %v937_v28 = vsel %vm615_vm0, %v903_v45, %v904_v63  ;;  %7547 = vmatmul.mubr.msk.bf16.vlgmr.msra.gmra.mxu0 %vm2866_vm10, %v9507_v27 }
 0x187   : > { %v1230_v60 = vsel %vm615_vm0, %v1196_v14, %v1197_v57  ;;  %v938_v30 = vsel %vm909_vm8, %v9794_v52, %v937_v28  ;;  %v2639_v32 = vpop.permute.xlu0 %2638  ;;  %5422 = vmatpush1.bf16.msra.mxu1 %v9634_v8  ;;  %5461 = vmatpush1.bf16.msra.mxu0 %v9687_v55  ;;  %v5552_v52 = vld [vmem:[#allocation2 + $0x290] sm:$0x33] }
 0x188   : > { %v1231_v47 = vsel %vm1202_vm9, %v9796_v1, %v1230_v60  ;;  %v9934_v62 = vpop.permute.xlu1 %1468  ;;  %977 = vst [vmem:[#allocation2 + $0x100] sm:$0x33] %v938_v30  ;;  %v2660_v45 = vrot.slane %v2639_v32, 4  ;;  %5462 = vmatprep.subr.bf16.mxu0 %v9689_v59  ;;  %7552 = vmatprep.subr.msk.bf16.mxu1 %vm2870_vm6, %v9720_v15  ;;  %v7570_v31 = vcombine.low %v5552_v52, %v5552_v52 }
 0x189   : > { %1270 = vst [vmem:[#allocation2 + $0x100] sm:$0xcc] %v1231_v47  ;;  %v1490_v14 = vrot.slane %v9934_v62, 4  ;;  %5482 = vmatprep.mubr.bf16.mxu0 %v7923_v21 }
 0x18a   : > { %v2694_v8 = vsel %vm615_vm0, %v2659_v4, %v2660_v45  ;;  %7549 = vmatmul.mubr.msk.bf16.vlgmr.msra.gmra.mxu1 %vm2866_vm10, %v9507_v27 }
 0x18b   : > { %v1524_v55 = vsel %vm615_vm0, %v1489_v50, %v1490_v14  ;;  %v2695_v1 = vsel %vm2664_vm1, %v9824_v51, %v2694_v8  ;;  %v9955_v2 = vpop.permute.xlu0 %1761  ;;  %5463 = vmatpush1.bf16.msra.mxu0 %v9705_v17  ;;  %5504 = vmatpush1.bf16.msra.mxu1 %v9740_v7 }
 0x18c   : > { %v1525_v15 = vsel %vm1494_vm2, %v9828_v37, %v1524_v55  ;;  %v9959_v16 = vpop.permute.xlu1 %2053  ;;  %2733 = vst [vmem:[#allocation2 + $0x2b8] sm:$0x33] %v2695_v1  ;;  %v1783_v24 = vrot.slane %v9955_v2, 4  ;;  %5464 = vmatprep.subr.bf16.mxu0 %v9718_v43  ;;  %5505 = vmatprep.subr.bf16.mxu1 %v9754_v10  ;;  %v7571_v37 = vcombine.high %v5552_v52, %v5552_v52  ;;  %v5555_v55 = vld [vmem:[#allocation2 + $0x2a8] sm:$0x33] }
 0x18d   : > { %1563 = vst [vmem:[#allocation2 + $0x198] sm:$0x33] %v1525_v15  ;;  %v2075_v44 = vrot.slane %v9959_v16, 4  ;;  %5525 = vmatprep.mubr.bf16.mxu1 %v7923_v21  ;;  %v7577_v1 = vcombine.high %v5555_v55, %v5555_v55  ;;  %v7576_v15 = vcombine.low %v5555_v55, %v5555_v55 }
 0x18e   : > { %v1817_v7 = vsel %vm615_vm0, %v1782_v58, %v1783_v24 }
 0x18f   : > { %v2109_v51 = vsel %vm615_vm0, %v2074_v36, %v2075_v44  ;;  %v1818_v4 = vsel %vm1787_vm4, %v9853_v61, %v1817_v7  ;;  %v9980_v20 = vpop.permute.xlu0 %2346  ;;  %5465 = vmatpush1.bf16.msra.mxu0 %v9737_v46  ;;  %5506 = vmatpush1.bf16.msra.mxu1 %v9770_v29  ;;  %v5657_v61 = vsel %vm2870_vm6, %v7570_v31, 0  ;;  %v7573_v36 = vcombine.high %v5553_v49, %v5553_v49  ;;  %v10117_v49 = vld [vmem:[#allocation2 + $0x18c] ss:$144 sps:$4 sm:$0xff]  }
 0x190   : > { %v2110_v50 = vsel %vm2079_vm3, %v9856_v40, %v2109_v51  ;;  %v9984_v11 = vpop.permute.xlu1 %2640  ;;  %1856 = vst [vmem:[#allocation2 + $0x198] sm:$0xcc] %v1818_v4  ;;  %v2368_v9 = vrot.slane %v9980_v20, 4  ;;  %5507 = vmatprep.subr.bf16.mxu1 %v9786_v54  ;;  %7578 = vmatprep.subr.msk.bf16.mxu0 %vm2870_vm6, %v7571_v37 }
 0x191   : > { %2148 = vst [vmem:[#allocation2 + $0x228] sm:$0x33] %v2110_v50  ;;  %v2661_v25 = vrot.slane %v9984_v11, 4  ;;  %v5675_v50 = vsel %vm2870_vm6, %v7576_v15, 0 }
 0x192   : > { %v2402_v40 = vsel %vm615_vm0, %v2367_v13, %v2368_v9  ;;  %7551 = vmatmul.mubr.msk.bf16.vlgmr.msra.gmra.mxu0 %vm2866_vm10, %v9507_v27 }
 0x193   : > { %v2696_v58 = vsel %vm615_vm0, %v2660_v45, %v2661_v25  ;;  %v2403_v18 = vsel %vm2372_vm5, %v9880_v26, %v2402_v40  ;;  %v10004_v42 = vpop.permute.xlu0 %590  ;;  %5508 = vmatpush1.bf16.msra.mxu1 %v9803_v48  ;;  %5691 = vmatpush1.bf16.msra.mxu0 %v5657_v61  ;;  %v6153_v61 = vld [vmem:[#allocation2 + $0x2a8] sm:$0x33] }
 0x194   : > { %v2697_v53 = vsel %vm2664_vm1, %v2639_v32, %v2696_v58  ;;  %v10007_v13 = vpop.permute.xlu1 %883  ;;  %2441 = vst [vmem:[#allocation2 + $0x228] sm:$0xcc] %v2403_v18  ;;  %v612_v33 = vrot.slane %v10004_v42, 4  ;;  %5692 = vmatprep.subr.bf16.mxu0 %v9689_v59  ;;  %7580 = vmatprep.subr.msk.bf16.mxu1 %vm2870_vm6, %v7573_v36  ;;  %v5663_v59 = vsel %vm2870_vm6, %v7572_v0, 0 }
 0x195   : > { %2734 = vst [vmem:[#allocation2 + $0x2c0] sm:$0x33] %v2697_v53  ;;  %v905_v6 = vrot.slane %v10007_v13, 4  ;;  %5712 = vmatprep.mubr.bf16.mxu0 %v7923_v21 }
 0x196   : > { %v647_v26 = vsel %vm615_vm0, %v611_v35, %v612_v33  ;;  %7553 = vmatmul.mubr.msk.bf16.vlgmr.msra.gmra.mxu1 %vm2866_vm10, %v9507_v27 }
 0x197   : > { %v939_v41 = vsel %vm615_vm0, %v904_v63, %v905_v6  ;;  %v648_v28 = vsel %vm617_vm7, %v9884_v38, %v647_v26  ;;  %v10031_v30 = vpop.permute.xlu0 %1176  ;;  %5693 = vmatpush1.bf16.msra.mxu0 %v9705_v17  ;;  %5734 = vmatpush1.bf16.msra.mxu1 %v5663_v59  ;;  %v10040_v38 = vpop.f32.mrf.mxu1  ;;  %v10149_v59 = vld [vmem:[#allocation2 + $0x6c] ss:$144 sps:$4 sm:$0xff]  }
 0x198   : > { %v940_v60 = vsel %vm909_vm8, %v9905_v56, %v939_v41  ;;  %v10034_v35 = vpop.permute.xlu1 %1470  ;;  %686 = vst [vmem:[#allocation2 + $0x78] sm:$0xcc] %v648_v28  ;;  %v1198_v27 = vrot.slane %v10031_v30, 4  ;;  %5694 = vmatprep.subr.bf16.mxu0 %v9718_v43  ;;  %5735 = vmatprep.subr.bf16.mxu1 %v9754_v10  ;;  %v7574_v56 = vcombine.low %v5554_v22, %v5554_v22  ;;  %v10053_v43 = vpop.f32.mrf.mxu0 }
 0x199   : > { %978 = vst [vmem:[#allocation2 + $0x108] sm:$0x33] %v940_v60  ;;  %v1491_v63 = vrot.slane %v10034_v35, 4  ;;  %5755 = vmatprep.mubr.bf16.mxu1 %v7923_v21  ;;  %v7575_v10 = vcombine.high %v5554_v22, %v5554_v22  ;;  %v10151_v22 = vcombine.high %v6153_v61, %v6153_v61 }
 0x19a   : > { %v1232_v17 = vsel %vm615_vm0, %v1197_v57, %v1198_v27 }
 0x19b   : > { %v1526_v47 = vsel %vm615_vm0, %v1490_v14, %v1491_v63  ;;  %v1233_v32 = vsel %vm1202_vm9, %v9909_v34, %v1232_v17  ;;  %v10059_v8 = vpop.permute.xlu0 %1763  ;;  %5695 = vmatpush1.bf16.msra.mxu0 %v9737_v46  ;;  %5736 = vmatpush1.bf16.msra.mxu1 %v9770_v29  ;;  %v10069_v34 = vpop.f32.mrf.mxu1 }
 0x19c   : > { %v1527_v45 = vsel %vm1494_vm2, %v9934_v62, %v1526_v47  ;;  %v10063_v57 = vpop.permute.xlu1 %2055  ;;  %1271 = vst [vmem:[#allocation2 + $0x108] sm:$0xcc] %v1233_v32  ;;  %v1784_v14 = vrot.slane %v10059_v8, 4  ;;  %5737 = vmatprep.subr.bf16.mxu1 %v9786_v54  ;;  %7582 = vmatprep.subr.msk.bf16.mxu0 %vm2870_vm6, %v7575_v10  ;;  %v5669_v62 = vsel %vm2870_vm6, %v7574_v56, 0  ;;  %v10077_v29 = vpop.f32.mrf.mxu0  ;;  %v6154_v47 = vld [vmem:[#allocation2 + $0x2b0] sm:$0x33] }
 0x19d   : > { %1564 = vst [vmem:[#allocation2 + $0x1a0] sm:$0x33] %v1527_v45  ;;  %v2076_v52 = vrot.slane %v10063_v57, 4 }
 0x19e   : > { %v1819_v46 = vsel %vm615_vm0, %v1783_v24, %v1784_v14  ;;  %7579 = vmatmul.mubr.msk.bf16.vlgmr.msra.gmra.mxu0 %vm2866_vm10, %v9682_v12 }
 0x19f   : > { %v2111_v54 = vsel %vm615_vm0, %v2075_v44, %v2076_v52  ;;  %v1820_v31 = vsel %vm1787_vm4, %v9955_v2, %v1819_v46  ;;  %v10090_v24 = vpop.permute.xlu0 %2348  ;;  %5738 = vmatpush1.bf16.msra.mxu1 %v9803_v48  ;;  %5777 = vmatpush1.bf16.msra.mxu0 %v5669_v62  ;;  %v10099_v2 = vpop.f32.mrf.mxu1  ;;  %v10181_v46 = vcombine.high %v6154_v47, %v6154_v47 }
 0x1a0   : > { %v2112_v7 = vsel %vm2079_vm3, %v9959_v16, %v2111_v54  ;;  %v10093_v51 = vpop.permute.xlu1 %592  ;;  %1857 = vst [vmem:[#allocation2 + $0x1a0] sm:$0xcc] %v1820_v31  ;;  %v2369_v44 = vrot.slane %v10090_v24, 4  ;;  %5778 = vmatprep.subr.bf16.mxu0 %v9788_v39  ;;  %7584 = vmatprep.subr.msk.bf16.mxu1 %vm2870_vm6, %v7577_v1  ;;  %v10102_v16 = vpop.f32.mrf.mxu0  ;;  %v7605_v1 = vcombine.low %v6154_v47, %v6154_v47 }
 0x1a1   : > { %2149 = vst [vmem:[#allocation2 + $0x230] sm:$0x33] %v2112_v7  ;;  %v613_v37 = vrot.slane %v10093_v51, 4  ;;  %5798 = vmatprep.mubr.bf16.mxu0 %v7923_v21  ;;  %v10129_v18 = vpop.f32.mrf.mxu1 }
 0x1a2   : > { %v2404_v48 = vsel %vm615_vm0, %v2368_v9, %v2369_v44  ;;  %7581 = vmatmul.mubr.msk.bf16.vlgmr.msra.gmra.mxu1 %vm2866_vm10, %v9682_v12 }
 0x1a3   : > { %v649_v4 = vsel %vm615_vm0, %v612_v33, %v613_v37  ;;  %v2405_v40 = vsel %vm2372_vm5, %v9980_v20, %v2404_v48  ;;  %v10123_v58 = vpop.permute.xlu0 %885  ;;  %5779 = vmatpush1.bf16.msra.mxu0 %v9805_v19  ;;  %5820 = vmatpush1.bf16.msra.mxu1 %v5675_v50  ;;  %v10134_v20 = vld [vmem:[#allocation2 + $0x188] ss:$144 sps:$4 sm:$0xff]   ;;  %v10137_v33 = vpop.f32.mrf.mxu0 }
 0x1a4   : > { %v650_v9 = vsel %vm617_vm7, %v10004_v42, %v649_v4  ;;  %v10126_v36 = vpop.permute.xlu1 %1178  ;;  %2442 = vst [vmem:[#allocation2 + $0x230] sm:$0xcc] %v2405_v40  ;;  %v906_v0 = vrot.slane %v10123_v58, 4  ;;  %5780 = vmatprep.subr.bf16.mxu0 %v9818_v23  ;;  %5821 = vmatprep.subr.bf16.mxu1 %v10117_v49  ;;  %v7603_v42 = vcombine.low %v6153_v61, %v6153_v61  ;;  %v10153_v28 = vpop.f32.mrf.mxu1  ;;  %v10208_v61 = vsel %vm2870_vm6, %v7605_v1, 0  ;;  %v10210_v40 = vld [vmem:[#allocation2 + $0x194] ss:$144 sps:$4 sm:$0xff]  }
 0x1a5   : > { %687 = vst [vmem:[#allocation2 + $0x80] sm:$0xcc] %v650_v9  ;;  %v1199_v53 = vrot.slane %v10126_v36, 4  ;;  %5841 = vmatprep.mubr.bf16.mxu1 %v7923_v21 }
 0x1a6   : > { %v941_v26 = vsel %vm615_vm0, %v905_v6, %v906_v0  ;;  %v10171_v45 = vsel %vm2870_vm6, %v7603_v42, 0 }
 0x1a7   : > { %v1234_v41 = vsel %vm615_vm0, %v1198_v27, %v1199_v53  ;;  %v942_v60 = vsel %vm909_vm8, %v10007_v13, %v941_v26  ;;  %v2643_v17 = vpop.permute.xlu0 %2642  ;;  %5781 = vmatpush1.bf16.msra.mxu0 %v9834_v5  ;;  %5822 = vmatpush1.bf16.msra.mxu1 %v10134_v20  ;;  %v10161_v27 = vpop.f32.mrf.mxu0 }
 0x1a8   : > { %v1235_v56 = vsel %vm1202_vm9, %v10031_v30, %v1234_v41  ;;  %v1473_v6 = vpop.permute.xlu1 %1472  ;;  %979 = vst [vmem:[#allocation2 + $0x110] sm:$0x33] %v942_v60  ;;  %v2662_v10 = vrot.slane %v2643_v17, 4  ;;  %5823 = vmatprep.subr.bf16.mxu1 %v10149_v59  ;;  %7611 = vmatprep.subr.msk.bf16.mxu0 %vm2870_vm6, %v10151_v22  ;;  %v10166_v13 = vpop.f32.mrf.mxu1  ;;  %v10168_v30 = vld [vmem:[#allocation2 + $0x68] ss:$144 sps:$4 sm:$0xff]  }
 0x1a9   : > { %1272 = vst [vmem:[#allocation2 + $0x110] sm:$0xcc] %v1235_v56  ;;  %v1492_v32 = vrot.slane %v1473_v6, 4  ;;  %v10233_v6 = vld [vmem:[#allocation2 + $0x74] ss:$144 sps:$4 sm:$0xff]  }
 0x1aa   : > { %v2698_v55 = vsel %vm615_vm0, %v2661_v25, %v2662_v10  ;;  %7583 = vmatmul.mubr.msk.bf16.vlgmr.msra.gmra.mxu0 %vm2866_vm10, %v9682_v12  ;;  %v10183_v54 = vpop.f32.mrf.mxu1 }
 0x1ab   : > { %v1528_v62 = vsel %vm615_vm0, %v1491_v63, %v1492_v32  ;;  %v2699_v15 = vsel %vm2664_vm1, %v9984_v11, %v2698_v55  ;;  %v1766_v7 = vpop.permute.xlu0 %1765  ;;  %5824 = vmatpush1.bf16.msra.mxu1 %v10168_v30  ;;  %6296 = vmatpush1.bf16.msra.mxu0 %v10171_v45  ;;  %v10191_v63 = vpop.f32.mrf.mxu0 }
 0x1ac   : > { %v1529_v31 = vsel %vm1494_vm2, %v10034_v35, %v1528_v62  ;;  %v2058_v25 = vpop.permute.xlu1 %2057  ;;  %2735 = vst [vmem:[#allocation2 + $0x2c8] sm:$0x33] %v2699_v15  ;;  %v1785_v48 = vrot.slane %v1766_v7, 4  ;;  %6297 = vmatprep.subr.bf16.mxu0 %v10117_v49  ;;  %7613 = vmatprep.subr.msk.bf16.mxu1 %vm2870_vm6, %v10181_v46  ;;  %v10205_v50 = vpop.f32.mrf.mxu1 }
 0x1ad   : > { %1565 = vst [vmem:[#allocation2 + $0x1a8] sm:$0x33] %v1529_v31  ;;  %v2077_v4 = vrot.slane %v2058_v25, 4  ;;  %6317 = vmatprep.mubr.bf16.mxu0 %v7923_v21  ;;  %v10218_v26 = vpop.f32.mrf.mxu0 }
 0x1ae   : > { %v1821_v11 = vsel %vm615_vm0, %v1784_v14, %v1785_v48  ;;  %7585 = vmatmul.mubr.msk.bf16.vlgmr.msra.gmra.mxu1 %vm2866_vm10, %v9682_v12  ;;  %v6155_v12 = vld [vmem:[#allocation2 + $0x2b8] sm:$0x33] }
 0x1af   : > { %v2113_v35 = vsel %vm615_vm0, %v2076_v52, %v2077_v4  ;;  %v1822_v9 = vsel %vm1787_vm4, %v10059_v8, %v1821_v11  ;;  %v2351_v42 = vpop.permute.xlu0 %2350  ;;  %6298 = vmatpush1.bf16.msra.mxu0 %v10134_v20  ;;  %6339 = vmatpush1.bf16.msra.mxu1 %v10208_v61  ;;  %v10222_v8 = vld [vmem:[#allocation2 + $0x190] ss:$144 sps:$4 sm:$0xff]   ;;  %v10235_v47 = vcombine.high %v6155_v12, %v6155_v12  ;;  %v10243_v1 = vpop.f32.mrf.mxu0  ;;  %v7903_v4 = vld [vmem:[%s11633_s1 + $0x8] sm:$0xff]  }
 0x1b0   : > { %v2114_v14 = vsel %vm2079_vm3, %v10063_v57, %v2113_v35  ;;  %v595_v52 = vpop.permute.xlu1 %594  ;;  %1858 = vst [vmem:[#allocation2 + $0x1a8] sm:$0xcc] %v1822_v9  ;;  %v2370_v41 = vrot.slane %v2351_v42, 4  ;;  %6299 = vmatprep.subr.bf16.mxu0 %v10149_v59  ;;  %6340 = vmatprep.subr.bf16.mxu1 %v10210_v40  ;;  %v7607_v62 = vcombine.low %v6155_v12, %v6155_v12  ;;  %v10284_v12 = vld [vmem:[#allocation2 + $0x1a4] ss:$144 sps:$4 sm:$0xff]  }
 0x1b1   : > { %2150 = vst [vmem:[#allocation2 + $0x238] sm:$0x33] %v2114_v14  ;;  %v614_v60 = vrot.slane %v595_v52, 4  ;;  %6360 = vmatprep.mubr.bf16.mxu1 %v7923_v21  ;;  %v10231_v17 = vpop.f32.mrf.mxu1  ;;  %v10272_v14 = vld [vmem:[#allocation2 + $0x19c] ss:$144 sps:$4 sm:$0xff]  }
 0x1b2   : > { %v2406_v57 = vsel %vm615_vm0, %v2369_v44, %v2370_v41  ;;  %v10286_v41 = vld [vmem:[#allocation2 + $0x7c] ss:$144 sps:$4 sm:$0xff]  }
 0x1b3   : > { %v651_v56 = vsel %vm615_vm0, %v613_v37, %v614_v60  ;;  %v2407_v10 = vsel %vm2372_vm5, %v10090_v24, %v2406_v57  ;;  %6300 = vmatpush1.bf16.msra.mxu0 %v10168_v30  ;;  %6341 = vmatpush1.bf16.msra.mxu1 %v10222_v8  ;;  %v888_v44 = vpop.permute.xlu0 %887  ;;  %v6160_v37 = vld [vmem:[#allocation2 + $0x2c0] sm:$0x33]  ;;  %v10245_v7 = vpop.f32.mrf.mxu1 }
 0x1b4   : > { %v652_v32 = vsel %vm617_vm7, %v10093_v51, %v651_v56  ;;  %v1181_v55 = vpop.permute.xlu1 %1180  ;;  %2443 = vst [vmem:[#allocation2 + $0x238] sm:$0xcc] %v2407_v10  ;;  %v907_v15 = vrot.slane %v888_v44, 4  ;;  %6342 = vmatprep.subr.bf16.mxu1 %v10233_v6  ;;  %7615 = vmatprep.subr.msk.bf16.mxu0 %vm2870_vm6, %v10235_v47  ;;  %v10250_v24 = vld [vmem:[#allocation2 + $0x70] ss:$144 sps:$4 sm:$0xff]   ;;  %v7610_v11 = vcombine.high %v6160_v37, %v6160_v37 }
 0x1b5   : > { %688 = vst [vmem:[#allocation2 + $0x88] sm:$0xcc] %v652_v32  ;;  %v1200_v31 = vrot.slane %v1181_v55, 4  ;;  %v10258_v48 = vpop.f32.mrf.mxu0  ;;  %v7609_v35 = vcombine.low %v6160_v37, %v6160_v37  ;;  %v10274_v42 = vpop.f32.mrf.mxu1  ;;  %v6152_v56 = vld [vmem:[#allocation2 + $0x2a0] sm:$0x33] }
 0x1b6   : > { %v943_v51 = vsel %vm615_vm0, %v906_v0, %v907_v15  ;;  %7612 = vmatmul.mubr.msk.bf16.vlgmr.msra.gmra.mxu0 %vm2866_vm10, %v7903_v4  ;;  %v10296_v10 = vld [vmem:[#allocation2 + $0x1a0] ss:$144 sps:$4 sm:$0xff]   ;;  %v10298_v32 = vld [vmem:[#allocation2 + $0x78] ss:$144 sps:$4 sm:$0xff]   ;;  %v10302_v55 = vld [vmem:[#allocation2 + $0x84] ss:$144 sps:$4 sm:$0xff]   ;;  %v7623_v37 = vcombine.low %v6152_v56, %v6152_v56 }
 0x1b7   : > { %v1236_v25 = vsel %vm615_vm0, %v1199_v53, %v1200_v31  ;;  %v944_v9 = vsel %vm909_vm8, %v10123_v58, %v943_v51  ;;  %6343 = vmatpush1.bf16.msra.mxu1 %v10250_v24  ;;  %v10270_v53 = vsel %vm2870_vm6, %v7607_v62, 0  ;;  %v3142_v52 = vpop.f32.mrf.mxu0  ;;  %6403 = vmatprep.mubr.bf16.mxu0 %v7923_v21  ;;  %v10280_v58 = vld [vmem:[#allocation2 + $0x198] ss:$144 sps:$4 sm:$0xff]   ;;  %v10289_v60 = vpop.f32.mrf.mxu1  ;;  %v7624_v62 = vcombine.high %v6152_v56, %v6152_v56  ;;  %v10309_v31 = vld [vmem:[#allocation2 + $0x80] ss:$144 sps:$4 sm:$0xff]  }
 0x1b8   : > { %v1237_v0 = vsel %vm1202_vm9, %v10126_v36, %v1236_v25  ;;  %980 = vst [vmem:[#allocation2 + $0x118] sm:$0x33] %v944_v9  ;;  %6382 = vmatpush1.bf16.msra.mxu0 %v10270_v53  ;;  %7617 = vmatprep.subr.msk.bf16.mxu1 %vm2870_vm6, %v7610_v11  ;;  %v6280_v36 = vsel %vm2870_vm6, %v7609_v35, 0  ;;  %v6483_v11 = vsel %vm2870_vm6, %v7623_v37, 0  ;;  %v3188_v56 = vadd.f32 %v10274_v42, %v10099_v2 }
 0x1b9   : > { %1273 = vst [vmem:[#allocation2 + $0x118] sm:$0xcc] %v1237_v0  ;;  %6383 = vmatprep.subr.bf16.mxu0 %v10272_v14  ;;  %v10291_v57 = vpop.f32.mrf.mxu0 }
 0x1ba   : > { %7614 = vmatmul.mubr.msk.bf16.vlgmr.msra.gmra.mxu1 %vm2866_vm10, %v7903_v4 }
 0x1bb   : > { %6425 = vmatpush1.bf16.msra.mxu1 %v6280_v36  ;;  %6446 = vmatprep.mubr.bf16.mxu1 %v7923_v21  ;;  %v10305_v15 = vpop.f32.mrf.mxu0 }
 0x1bc   : > { %6384 = vmatpush1.bf16.msra.mxu0 %v10280_v58  ;;  %6426 = vmatprep.subr.bf16.mxu1 %v10284_v12 }
 0x1bd   : > { %6385 = vmatprep.subr.bf16.mxu0 %v10286_v41 }
 0x1be   : > { %v10300_v44 = vpop.f32.mrf.mxu1 }
 0x1bf   : > { %6427 = vmatpush1.bf16.msra.mxu1 %v10296_v10 }
 0x1c0   : > { %6386 = vmatpush1.bf16.msra.mxu0 %v10298_v32  ;;  %6428 = vmatprep.subr.bf16.mxu1 %v10302_v55  ;;  %v10312_v51 = vpop.f32.mrf.mxu1 }
 0x1c1   : > { %7625 = vmatprep.subr.msk.bf16.mxu0 %vm2870_vm6, %v7624_v62 }
 0x1c2   : > { %v10314_v25 = vpop.f32.mrf.mxu0  ;;  %v10325_v9 = vpop.f32.mrf.mxu1 }
 0x1c3   : > { %7616 = vmatmul.mubr.msk.bf16.vlgmr.msra.gmra.mxu0 %vm2866_vm10, %v7903_v4  ;;  %6429 = vmatpush1.bf16.msra.mxu1 %v10309_v31  ;;  %v3227_v42 = vadd.f32 %v10314_v25, %v10161_v27  ;;  %v6678_v27 = vld [vmem:[#allocation2 + $0x2c0] sm:$0x33]  ;;  %v3270_v25 = vadd.f32 %v10300_v44, %v10153_v28 }
 0x1c4   : > { %6499 = vmatpush1.bf16.msra.mxu0 %v6483_v11  ;;  %v10319_v35 = vpop.f32.mrf.mxu0  ;;  %7627 = vmatprep.subr.msk.bf16.mxu1 %vm2870_vm6, %v10151_v22  ;;  %v10335_v22 = vpop.f32.mrf.mxu1 }
 0x1c5   : > { %6500 = vmatprep.subr.bf16.mxu0 %v9788_v39  ;;  %6520 = vmatprep.mubr.bf16.mxu0 %v7923_v21 }
 0x1c6   : > { %7618 = vmatmul.mubr.msk.bf16.vlgmr.msra.gmra.mxu1 %vm2866_vm10, %v7903_v4  ;;  %v10330_v0 = vpop.f32.mrf.mxu0 }
 0x1c7   : > { %6542 = vmatpush1.bf16.msra.mxu1 %v10171_v45  ;;  %6563 = vmatprep.mubr.bf16.mxu1 %v7923_v21  ;;  %v3141_v45 = vadd.f32 %v10258_v48, %v10053_v43  ;;  %v3231_v28 = vadd.f32 %v10330_v0, %v10218_v26 }
 0x1c8   : > { %6501 = vmatpush1.bf16.msra.mxu0 %v9805_v19  ;;  %6543 = vmatprep.subr.bf16.mxu1 %v10117_v49  ;;  %v10338_v39 = vpop.f32.mrf.mxu0 }
 0x1c9   : > { %6502 = vmatprep.subr.bf16.mxu0 %v9818_v23  ;;  %v3143_v23 = vadd.f32 %v3142_v52, %v10077_v29  ;;  %v3184_v29 = vadd.f32 %v10231_v17, %v10040_v38  ;;  %v6676_v17 = vld [vmem:[#allocation2 + $0x2b0] sm:$0x33]  ;;  %v3147_v52 = vadd.f32 %v10305_v15, %v10137_v33  ;;  %v3233_v0 = vadd.f32 %v10338_v39, %v10243_v1  ;;  %v7896_v39 = vld [vmem:[#allocation2 + $0x1ac] ss:$144 sps:$4 sm:$0xff]  }
 0x1ca   : > { %v3507_v36 = vpop.f32.mrf.mxu1  ;;  %v7650_v4 = vcombine.high %v6676_v17, %v6676_v17 }
 0x1cb   : > { %6544 = vmatpush1.bf16.msra.mxu1 %v10134_v20  ;;  %v7904_v20 = vld [vmem:[%s11633_s1] sm:$0xff]  }
 0x1cc   : > { %6503 = vmatpush1.bf16.msra.mxu0 %v9834_v5  ;;  %6545 = vmatprep.subr.bf16.mxu1 %v10149_v59  ;;  %v3509_v5 = vpop.f32.mrf.mxu1 }
 0x1cd   : > { %7629 = vmatprep.subr.msk.bf16.mxu0 %vm2870_vm6, %v10181_v46  ;;  %v10368_v46 = vadd.f32 %v3507_v36, %v3184_v29 }
 0x1ce   : > { %v3464_v19 = vpop.f32.mrf.mxu0  ;;  %v3511_v38 = vpop.f32.mrf.mxu1 }
 0x1cf   : > { %v10347_v49 = vadd.f32 %v3464_v19, %v3141_v45  ;;  %7626 = vmatmul.mubr.msk.bf16.vlgmr.msra.gmra.mxu0 %vm2866_vm10, %v7904_v20  ;;  %6546 = vmatpush1.bf16.msra.mxu1 %v10168_v30  ;;  %v3186_v30 = vadd.f32 %v10245_v7, %v10069_v34  ;;  %v3190_v45 = vadd.f32 %v10289_v60, %v10129_v18 }
 0x1d0   : > { %6585 = vmatpush1.bf16.msra.mxu0 %v10208_v61  ;;  %v3466_v43 = vpop.f32.mrf.mxu0  ;;  %7631 = vmatprep.subr.msk.bf16.mxu1 %vm2870_vm6, %v10235_v47  ;;  %v3145_v47 = vadd.f32 %v10291_v57, %v10102_v16  ;;  %v6677_v16 = vld [vmem:[#allocation2 + $0x2b8] sm:$0x33]  ;;  %v3513_v57 = vpop.f32.mrf.mxu1  ;;  %v10404_v19 = vadd.f32 %v3511_v38, %v3188_v56 }
 0x1d1   : > { %v10359_v59 = vadd.f32 %v3466_v43, %v3143_v23  ;;  %6586 = vmatprep.subr.bf16.mxu0 %v10210_v40  ;;  %3634 = vrot.lane.b32.xlu0 %v10347_v49, %s7920_s27  ;;  %v10377_v48 = vadd.f32 %v3509_v5, %v3186_v30  ;;  %v7651_v36 = vcombine.low %v6677_v16, %v6677_v16 }
 0x1d2   : > { %7628 = vmatmul.mubr.msk.bf16.vlgmr.msra.gmra.mxu1 %vm2866_vm10, %v7904_v20  ;;  %6606 = vmatprep.mubr.bf16.mxu0 %v7923_v21  ;;  %v3468_v61 = vpop.f32.mrf.mxu0  ;;  %v7652_v15 = vcombine.high %v6677_v16, %v6677_v16  ;;  %v10412_v23 = vadd.f32 %v3513_v57, %v3190_v45 }
 0x1d3   : > { %6628 = vmatpush1.bf16.msra.mxu1 %v10270_v53  ;;  %3636 = vrot.lane.b32.xlu1 %v10359_v59, %s7920_s27  ;;  %v10383_v34 = vadd.f32 %v3468_v61, %v3145_v47  ;;  %v7649_v53 = vcombine.low %v6676_v17, %v6676_v17  ;;  %v6787_v18 = vsel %vm2870_vm6, %v7651_v36, 0 }
 0x1d4   : > { %6587 = vmatpush1.bf16.msra.mxu0 %v10222_v8  ;;  %6629 = vmatprep.subr.bf16.mxu1 %v10272_v14  ;;  %v3470_v7 = vpop.f32.mrf.mxu0 }
 0x1d5   : > { %6588 = vmatprep.subr.bf16.mxu0 %v10233_v6  ;;  %3638 = vrot.lane.b32.xlu0 %v10368_v46, %s7920_s27  ;;  %v10397_v62 = vadd.f32 %v3470_v7, %v3147_v52  ;;  %v6781_v33 = vsel %vm2870_vm6, %v7649_v53, 0 }
 0x1d6   : > { %6649 = vmatprep.mubr.bf16.mxu1 %v7923_v21  ;;  %v3593_v37 = vpop.f32.mrf.mxu1 }
 0x1d7   : > { %6630 = vmatpush1.bf16.msra.mxu1 %v10280_v58  ;;  %3640 = vrot.lane.b32.xlu1 %v10377_v48, %s7920_s27 }
 0x1d8   : > { %6589 = vmatpush1.bf16.msra.mxu0 %v10250_v24  ;;  %6631 = vmatprep.subr.bf16.mxu1 %v10286_v41  ;;  %v3595_v5 = vpop.f32.mrf.mxu1 }
 0x1d9   : > { %7657 = vmatprep.subr.msk.bf16.mxu0 %vm2870_vm6, %v7650_v4  ;;  %3650 = vrot.lane.b32.xlu0 %v10383_v34, %s7920_s27 }
 0x1da   : > { %v3550_v11 = vpop.f32.mrf.mxu0 }
 0x1db   : > { %7630 = vmatmul.mubr.msk.bf16.vlgmr.msra.gmra.mxu0 %vm2866_vm10, %v7904_v20  ;;  %6632 = vmatpush1.bf16.msra.mxu1 %v10298_v32  ;;  %v10421_v60 = vadd.f32 %v3550_v11, %v3227_v42 }
 0x1dc   : > { %6815 = vmatpush1.bf16.msra.mxu0 %v6781_v33  ;;  %3652 = vrot.lane.b32.xlu1 %v10397_v62, %s7920_s27  ;;  %v3552_v2 = vpop.f32.mrf.mxu0 }
 0x1dd   : > { %6816 = vmatprep.subr.bf16.mxu0 %v10210_v40  ;;  %7659 = vmatprep.subr.msk.bf16.mxu1 %vm2870_vm6, %v7652_v15  ;;  %v3229_v40 = vadd.f32 %v10319_v35, %v10191_v63  ;;  %v7654_v63 = vcombine.high %v6678_v27, %v6678_v27  ;;  %v6679_v35 = vld [vmem:[#allocation2 + $0x2c8] sm:$0x33] }
 0x1de   : > { %3654 = vrot.lane.b32.xlu0 %v10404_v19, %s7920_s27  ;;  %7632 = vmatmul.mubr.msk.bf16.vlgmr.msra.gmra.mxu1 %vm2866_vm10, %v7904_v20  ;;  %v3554_v43 = vpop.f32.mrf.mxu0  ;;  %v3597_v20 = vpop.f32.mrf.mxu1  ;;  %v7656_v26 = vcombine.high %v6679_v35, %v6679_v35 }
 0x1df   : > { %6858 = vmatpush1.bf16.msra.mxu1 %v6787_v18  ;;  %6836 = vmatprep.mubr.bf16.mxu0 %v7923_v21  ;;  %v10430_v29 = vadd.f32 %v3552_v2, %v3229_v40  ;;  %v10461_v61 = vadd.f32 %v3554_v43, %v3231_v28 }
 0x1e0   : > { %6817 = vmatpush1.bf16.msra.mxu0 %v10222_v8  ;;  %3656 = vrot.lane.b32.xlu1 %v10412_v23, %s7920_s27  ;;  %v7653_v8 = vcombine.low %v6678_v27, %v6678_v27  ;;  %v3556_v30 = vpop.f32.mrf.mxu0  ;;  %v3599_v44 = vpop.f32.mrf.mxu1 }
 0x1e1   : > { %6818 = vmatprep.subr.bf16.mxu0 %v10233_v6  ;;  %6859 = vmatprep.subr.bf16.mxu1 %v10272_v14  ;;  %v3272_v6 = vadd.f32 %v10312_v51, %v10166_v13  ;;  %v10438_v14 = vadd.f32 %v3593_v37, %v3270_v25  ;;  %v7655_v51 = vcombine.low %v6679_v35, %v6679_v35 }
 0x1e2   : > { %3642 = vrot.lane.b32.xlu0 %v10421_v60, %s7920_s27  ;;  %6879 = vmatprep.mubr.bf16.mxu1 %v7923_v21  ;;  %v10463_v38 = vpop.f32.mrf.mxu1  ;;  %v10471_v47 = vadd.f32 %v3556_v30, %v3233_v0 }
 0x1e3   : > { %6860 = vmatpush1.bf16.msra.mxu1 %v10280_v58  ;;  %v10447_v58 = vadd.f32 %v3595_v5, %v3272_v6  ;;  %v6799_v1 = vsel %vm2870_vm6, %v7655_v51, 0 }
 0x1e4   : > { %6819 = vmatpush1.bf16.msra.mxu0 %v10250_v24  ;;  %3644 = vrot.lane.b32.xlu1 %v10430_v29, %s7920_s27  ;;  %v7905_v24 = vld [vmem:[%s11633_s1 + $0x10] sm:$0xff]   ;;  %v4116_v4 = vpop.f32.mrf.mxu1 }
 0x1e5   : > { %6861 = vmatprep.subr.bf16.mxu1 %v10286_v41  ;;  %7661 = vmatprep.subr.msk.bf16.mxu0 %vm2870_vm6, %v7654_v63  ;;  %v6793_v41 = vsel %vm2870_vm6, %v7653_v8, 0 }
 0x1e6   : > { %3646 = vrot.lane.b32.xlu0 %v10438_v14, %s7920_s27  ;;  %v10451_v13 = vpop.f32.mrf.mxu0 }
 0x1e7   : > { %7658 = vmatmul.mubr.msk.bf16.vlgmr.msra.gmra.mxu0 %vm2866_vm10, %v7905_v24  ;;  %6862 = vmatpush1.bf16.msra.mxu1 %v10298_v32  ;;  %v3274_v32 = vadd.f32 %v10325_v9, %v10183_v54  ;;  %v7894_v9 = vld [vmem:[#allocation2 + $0x1a8] ss:$144 sps:$4 sm:$0xff]  }
 0x1e8   : > { %6901 = vmatpush1.bf16.msra.mxu0 %v6793_v41  ;;  %3648 = vrot.lane.b32.xlu1 %v10447_v58, %s7920_s27  ;;  %v4073_v17 = vpop.f32.mrf.mxu0 }
 0x1e9   : > { %6902 = vmatprep.subr.bf16.mxu0 %v10284_v12  ;;  %7663 = vmatprep.subr.msk.bf16.mxu1 %vm2870_vm6, %v7656_v26  ;;  %v3276_v12 = vadd.f32 %v10335_v22, %v10205_v50  ;;  %v10480_v7 = vadd.f32 %v3597_v20, %v3274_v32  ;;  %v7899_v50 = vld [vmem:[#allocation2 + $0x8c] ss:$144 sps:$4 sm:$0xff]   ;;  %v4118_v22 = vpop.f32.mrf.mxu1 }
 0x1ea   : > { %3658 = vrot.lane.b32.xlu0 %v10461_v61, %s7920_s27  ;;  %7660 = vmatmul.mubr.msk.bf16.vlgmr.msra.gmra.mxu1 %vm2866_vm10, %v7905_v24  ;;  %v4075_v54 = vpop.f32.mrf.mxu0 }
 0x1eb   : > { %6944 = vmatpush1.bf16.msra.mxu1 %v6799_v1  ;;  %6922 = vmatprep.mubr.bf16.mxu0 %v7923_v21  ;;  %11708 = vst [vmem:[#allocation5_spill] sm:$0xff] %v10480_v7  ;;  %v10486_v53 = vadd.f32 %v3599_v44, %v3276_v12  ;;  %v4120_v52 = vpop.f32.mrf.mxu1 }
 0x1ec   : > { %6903 = vmatpush1.bf16.msra.mxu0 %v10296_v10  ;;  %3660 = vrot.lane.b32.xlu1 %v10471_v47, %s7920_s27  ;;  %v4077_v16 = vpop.f32.mrf.mxu0  ;;  %v7897_v10 = vld [vmem:[#allocation2 + $0x88] ss:$144 sps:$4 sm:$0xff]  }
 0x1ed   : > { %6904 = vmatprep.subr.bf16.mxu0 %v10302_v55  ;;  %6945 = vmatprep.subr.bf16.mxu1 %v7896_v39  ;;  %11709 = vst [vmem:[#allocation6_spill] sm:$0xff] %v10486_v53 }
 0x1ee   : > { %3662 = vrot.lane.b32.xlu0 %v10480_v7, %s7920_s27  ;;  %6965 = vmatprep.mubr.bf16.mxu1 %v7923_v21 }
 0x1ef   : > { %6946 = vmatpush1.bf16.msra.mxu1 %v7894_v9 }
 0x1f0   : > { %6905 = vmatpush1.bf16.msra.mxu0 %v10309_v31  ;;  %3664 = vrot.lane.b32.xlu1 %v10486_v53, %s7920_s27 }
 0x1f1   : > { %6947 = vmatprep.subr.bf16.mxu1 %v7899_v50 }
 0x1f2   : > { %v4157_v55 = vpop.f32.mrf.mxu0 }
 0x1f3   : > { %7662 = vmatmul.mubr.msk.bf16.vlgmr.msra.gmra.mxu0 %vm2866_vm10, %v7905_v24  ;;  %6948 = vmatpush1.bf16.msra.mxu1 %v7897_v10 }
 0x1f4   : > { %v4159_v57 = vpop.f32.mrf.mxu0  ;;  %v10495_v56 = vpop.f32.mrf.mxu1 }
 0x1f6   : > { %7664 = vmatmul.mubr.msk.bf16.vlgmr.msra.gmra.mxu1 %vm2866_vm10, %v7905_v24  ;;  %v10498_v21 = vpop.f32.mrf.mxu0  ;;  %v10500_v37 = vpop.f32.mrf.mxu1 }
 0x1f8   : > { %v10502_v31 = vpop.f32.mrf.mxu0  ;;  %v10504_v11 = vpop.f32.mrf.mxu1 }
 0x1fa   : > { %v10506_v33 = vpop.f32.mrf.mxu1 }
 0x1fe   : > { %v4274_v36 = vpop.f32.mrf.mxu0 }
 0x1ff   : > { %v4275_v6 = vadd.f32 %v4274_v36, %v10451_v13 }
 0x200   : > { %v4276_v15 = vpop.f32.mrf.mxu0 }
 0x201   : > { %v4277_v28 = vadd.f32 %v4276_v15, %v4073_v17 }
 0x202   : > { %v4317_v45 = vpop.f32.mrf.mxu1  ;;  %v4278_v2 = vpop.f32.mrf.mxu0 }
 0x203   : > { %v4318_v41 = vadd.f32 %v4317_v45, %v10463_v38  ;;  %v4279_v17 = vadd.f32 %v4278_v2, %v4075_v54 }
 0x204   : > { %v4319_v42 = vpop.f32.mrf.mxu1  ;;  %v4280_v5 = vpop.f32.mrf.mxu0 }
 0x205   : > { %v4320_v1 = vadd.f32 %v4319_v42, %v4116_v4  ;;  %v4281_v50 = vadd.f32 %v4280_v5, %v4077_v16 }
 0x206   : > { %v4321_v18 = vpop.f32.mrf.mxu1 }
 0x207   : > { %v4322_v4 = vadd.f32 %v4321_v18, %v4118_v22 }
 0x208   : > { %v4323_v43 = vpop.f32.mrf.mxu1 }
 0x209   : > { %v4324_v45 = vadd.f32 %v4323_v43, %v4120_v52 }
 0x20a   : > { %v4360_v40 = vpop.f32.mrf.mxu0 }
 0x20b   : > { %v4361_v42 = vadd.f32 %v4360_v40, %v4157_v55 }
 0x20c   : > { %v4362_v27 = vpop.f32.mrf.mxu0 }
 0x20d   : > { %v4363_v18 = vadd.f32 %v4362_v27, %v4159_v57 }
 0x20e   : > { %v4403_v25 = vpop.f32.mrf.mxu1  ;;  %v4364_v20 = vpop.f32.mrf.mxu0 }
 0x210   : > { %v4405_v63 = vpop.f32.mrf.mxu1  ;;  %v10508_v8 = vpop.f32.mrf.mxu0 }
 0x211   : > { %v4406_v55 = vadd.f32 %v4405_v63, %v10500_v37 }
 0x212   : > { %v4407_v35 = vpop.f32.mrf.mxu1 }
 0x214   : > { %v4409_v51 = vpop.f32.mrf.mxu1 }
 0x216   : > { %v4590_v30 = vpop.f32.mrf.mxu0 }
 0x217   : > { %v10511_v44 = vadd.f32 %v4590_v30, %v4275_v6  ;;  %v4404_v30 = vadd.f32 %v4403_v25, %v10495_v56  ;;  %v4408_v25 = vadd.f32 %v4407_v35, %v10504_v11  ;;  %v4367_v11 = vadd.f32 %v10508_v8, %v10502_v31 }
 0x218   : > { %v4592_v24 = vpop.f32.mrf.mxu0 }
 0x219   : > { %v10514_v26 = vadd.f32 %v4592_v24, %v4277_v28  ;;  %4760 = vrot.lane.b32.xlu1 %v10511_v44, %s7920_s27  ;;  %v4365_v24 = vadd.f32 %v4364_v20, %v10498_v21 }
 0x21a   : > { %v4594_v0 = vpop.f32.mrf.mxu0  ;;  %v4633_v32 = vpop.f32.mrf.mxu1 }
 0x21b   : > { %v10518_v39 = vadd.f32 %v4633_v32, %v4318_v41  ;;  %4762 = vrot.lane.b32.xlu0 %v10514_v26, %s7920_s27  ;;  %v10526_v10 = vadd.f32 %v4594_v0, %v4279_v17  ;;  %v4410_v32 = vadd.f32 %v4409_v51, %v10506_v33 }
 0x21c   : > { %v4635_v13 = vpop.f32.mrf.mxu1  ;;  %v4596_v38 = vpop.f32.mrf.mxu0 }
 0x21d   : > { %v10522_v12 = vadd.f32 %v4635_v13, %v4320_v1  ;;  %4764 = vrot.lane.b32.xlu1 %v10518_v39, %s7920_s27  ;;  %v10530_v36 = vadd.f32 %v4596_v38, %v4281_v50 }
 0x21e   : > { %v4637_v9 = vpop.f32.mrf.mxu1 }
 0x21f   : > { %4766 = vrot.lane.b32.xlu0 %v10522_v12, %s7920_s27  ;;  %v10534_v2 = vadd.f32 %v4637_v9, %v4322_v4 }
 0x220   : > { %v4639_v54 = vpop.f32.mrf.mxu1 }
 0x221   : > { %4776 = vrot.lane.b32.xlu1 %v10526_v10, %s7920_s27  ;;  %v10538_v5 = vadd.f32 %v4639_v54, %v4324_v45 }
 0x222   : > { %v4676_v15 = vpop.f32.mrf.mxu0 }
 0x223   : > { %4778 = vrot.lane.b32.xlu0 %v10530_v36, %s7920_s27  ;;  %v10542_v6 = vadd.f32 %v4676_v15, %v4361_v42 }
 0x224   : > { %v4678_v16 = vpop.f32.mrf.mxu0 }
 0x225   : > { %4780 = vrot.lane.b32.xlu1 %v10534_v2, %s7920_s27  ;;  %v10547_v28 = vadd.f32 %v4678_v16, %v4363_v18 }
 0x226   : > { %v4719_v22 = vpop.f32.mrf.mxu1  ;;  %v4680_v52 = vpop.f32.mrf.mxu0 }
 0x227   : > { %4782 = vrot.lane.b32.xlu0 %v10538_v5, %s7920_s27  ;;  %v10552_v40 = vadd.f32 %v4719_v22, %v4404_v30  ;;  %v10564_v0 = vadd.f32 %v4680_v52, %v4365_v24 }
 0x228   : > { %v4721_v43 = vpop.f32.mrf.mxu1  ;;  %v4682_v57 = vpop.f32.mrf.mxu0 }
 0x229   : > { %4768 = vrot.lane.b32.xlu1 %v10542_v6, %s7920_s27  ;;  %v10557_v41 = vadd.f32 %v4721_v43, %v4406_v55  ;;  %v10587_v33 = vadd.f32 %v4682_v57, %v4367_v11 }
 0x22a   : > { %v4723_v27 = vpop.f32.mrf.mxu1 }
 0x22b   : > { %4770 = vrot.lane.b32.xlu0 %v10547_v28, %s7920_s27  ;;  %v10571_v21 = vadd.f32 %v4723_v27, %v4408_v25 }
 0x22c   : > { %v4725_v37 = vpop.f32.mrf.mxu1 }
 0x22d   : > { %4772 = vrot.lane.b32.xlu1 %v10552_v40, %s7920_s27  ;;  %v10579_v35 = vadd.f32 %v4725_v37, %v4410_v32 }
 0x22e   : > { %v10561_v56 = vpop.f32.mrf.mxu0 }
 0x22f   : > { %4774 = vrot.lane.b32.xlu0 %v10557_v41, %s7920_s27  ;;  %11710 = vst [vmem:[#allocation7_spill] sm:$0xff] %v10579_v35 }
 0x230   : > { %v10568_v63 = vpop.f32.mrf.mxu0 }
 0x231   : > { %4784 = vrot.lane.b32.xlu1 %v10564_v0, %s7920_s27 }
 0x232   : > { %v10575_v20 = vpop.f32.mrf.mxu1  ;;  %v10583_v1 = vpop.f32.mrf.mxu0 }
 0x233   : > { %4788 = vrot.lane.b32.xlu0 %v10571_v21, %s7920_s27 }
 0x234   : > { %v10585_v13 = vpop.f32.mrf.mxu1  ;;  %v10593_v51 = vpop.f32.mrf.mxu0 }
 0x235   : > { %4790 = vrot.lane.b32.xlu1 %v10579_v35, %s7920_s27 }
 0x236   : > { %v10595_v31 = vpop.f32.mrf.mxu1 }
 0x237   : > { %4786 = vrot.lane.b32.xlu0 %v10587_v33, %s7920_s27 }
 0x238   : > { %v10599_v17 = vpop.f32.mrf.mxu1 }
 0x23a   : > { %v10597_v8 = vpop.f32.mrf.mxu0 }
 0x23c   : > { %v10601_v38 = vpop.f32.mrf.mxu0 }
 0x23e   : > { %v10603_v9 = vpop.f32.mrf.mxu0  ;;  %v10605_v50 = vpop.f32.mrf.mxu1 }
 0x240   : > { %v10607_v4 = vpop.f32.mrf.mxu1  ;;  %v10609_v54 = vpop.f32.mrf.mxu0 }
 0x242   : > { %v10611_v15 = vpop.f32.mrf.mxu1 }
 0x243   : > { %v3635_v45 = vpop.permute.xlu0 %3634 }
 0x244   : > { %v10616_v18 = vpop.f32.mrf.mxu1 }
 0x245   : > { %v3637_v16 = vpop.permute.xlu1 %3636 }
 0x246   : > { %v3667_v42 = vsel %vm617_vm7, %v3635_v45, %v3637_v16  ;;  %v10614_v22 = vpop.f32.mrf.mxu0 }
 0x247   : > { %v10619_v52 = vmax.f32 %v10347_v49, %v3667_v42  ;;  %v3639_v43 = vpop.permute.xlu0 %3638 }
 0x248   : > { %v3668_v30 = vsel %vm617_vm7, %v3637_v16, %v3639_v43  ;;  %v10622_v55 = vpop.f32.mrf.mxu0 }
 0x249   : > { %11711 = vst [vmem:[#allocation8_spill] sm:$0xff] %v10619_v52  ;;  %v10625_v57 = vmax.f32 %v10359_v59, %v3668_v30  ;;  %v3641_v27 = vpop.permute.xlu1 %3640  ;;  %3729 = vrot.lane.b32.xlu0 %v10619_v52, %s7922_s29 }
 0x24a   : > { %v3669_v24 = vsel %vm617_vm7, %v3639_v43, %v3641_v27  ;;  %v10630_v25 = vpop.f32.mrf.mxu1  ;;  %v10637_v32 = vpop.f32.mrf.mxu0 }
 0x24b   : > { %11712 = vst [vmem:[#allocation9_spill] sm:$0xff] %v10625_v57  ;;  %v10633_v37 = vmax.f32 %v10368_v46, %v3669_v24  ;;  %3731 = vrot.lane.b32.xlu1 %v10625_v57, %s7922_s29  ;;  %v3651_v49 = vpop.permute.xlu0 %3650 }
 0x24c   : > { %v10639_v11 = vpop.f32.mrf.mxu1  ;;  %v10644_v16 = vpop.f32.mrf.mxu0 }
 0x24d   : > { %11713 = vst [vmem:[#allocation10_spill] sm:$0xff] %v10633_v37  ;;  %3733 = vrot.lane.b32.xlu0 %v10633_v37, %s7922_s29 }
 0x24e   : > { %v3653_v59 = vpop.permute.xlu1 %3652  ;;  %v10649_v43 = vpop.f32.mrf.mxu1 }
 0x24f   : > { %v3674_v45 = vsel %vm617_vm7, %v3651_v49, %v3653_v59 }
 0x250   : > { %v10647_v42 = vmax.f32 %v10383_v34, %v3674_v45  ;;  %v3655_v46 = vpop.permute.xlu0 %3654 }
 0x251   : > { %v3675_v30 = vsel %vm617_vm7, %v3653_v59, %v3655_v46  ;;  %v10667_v59 = vpop.f32.mrf.mxu1 }
 0x252   : > { %11714 = vst [vmem:[#allocation11_spill] sm:$0xff] %v10647_v42  ;;  %v10653_v24 = vmax.f32 %v10397_v62, %v3675_v30  ;;  %v3657_v53 = vpop.permute.xlu1 %3656  ;;  %3745 = vrot.lane.b32.xlu0 %v10647_v42, %s7922_s29  ;;  %v10657_v35 = vpop.f32.mrf.mxu0 }
 0x253   : > { %v3676_v49 = vsel %vm617_vm7, %v3655_v46, %v3657_v53 }
 0x254   : > { %11715 = vst [vmem:[#allocation12_spill] sm:$0xff] %v10653_v24  ;;  %v10661_v57 = vmax.f32 %v10404_v19, %v3676_v49  ;;  %3747 = vrot.lane.b32.xlu1 %v10653_v24, %s7922_s29  ;;  %v3643_v34 = vpop.permute.xlu0 %3642  ;;  %v10665_v45 = vpop.f32.mrf.mxu0 }
 0x255   : > { %v3670_v62 = vsel %vm617_vm7, %v3641_v27, %v3643_v34 }
 0x256   : > { %11716 = vst [vmem:[#allocation13_spill] sm:$0xff] %v10661_v57  ;;  %v10671_v30 = vmax.f32 %v10377_v48, %v3670_v62  ;;  %v3645_v42 = vpop.permute.xlu1 %3644  ;;  %3749 = vrot.lane.b32.xlu0 %v10661_v57, %s7922_s29  ;;  %v10676_v46 = vpop.f32.mrf.mxu1 }
 0x257   : > { %v3671_v19 = vsel %vm617_vm7, %v3643_v34, %v3645_v42  ;;  %v10681_v24 = vpop.f32.mrf.mxu0 }
 0x258   : > { %11717 = vst [vmem:[#allocation14_spill] sm:$0xff] %v10671_v30  ;;  %v10679_v49 = vmax.f32 %v10421_v60, %v3671_v19  ;;  %3735 = vrot.lane.b32.xlu1 %v10671_v30, %s7922_s29  ;;  %v3647_v27 = vpop.permute.xlu0 %3646  ;;  %v10685_v7 = vpop.f32.mrf.mxu1 }
 0x259   : > { %v3672_v60 = vsel %vm617_vm7, %v3645_v42, %v3647_v27  ;;  %v10694_v19 = vpop.f32.mrf.mxu0 }
 0x25a   : > { %11718 = vst [vmem:[#allocation15_spill] sm:$0xff] %v10679_v49  ;;  %v3649_v48 = vpop.permute.xlu1 %3648  ;;  %3737 = vrot.lane.b32.xlu0 %v10679_v49, %s7922_s29  ;;  %v10699_v37 = vpop.f32.mrf.mxu1 }
 0x25b   : > { %v3673_v62 = vsel %vm617_vm7, %v3647_v27, %v3649_v48  ;;  %v10691_v34 = vmax.f32 %v10447_v58, %v3649_v48  ;;  %v10706_v58 = vmax.f32 %v10430_v29, %v3672_v60  ;;  %v5401_v60 = vadd.f32 %v10622_v55, %v10568_v63 }
 0x25c   : > { %v10697_v57 = vmax.f32 %v10438_v14, %v3673_v62  ;;  %v3659_v30 = vpop.permute.xlu0 %3658  ;;  %v10715_v3 = vpop.f32.mrf.mxu1  ;;  %v5442_v63 = vadd.f32 %v10630_v25, %v10575_v20 }
 0x25d   : > { %11719 = vst [vmem:[#allocation16_spill] sm:$0xff] %v10691_v34  ;;  %3743 = vrot.lane.b32.xlu1 %v10691_v34, %s7922_s29  ;;  %v3677_v27 = vsel %vm617_vm7, %v3657_v53, %v3659_v30 }
 0x25e   : > { %v3661_v52 = vpop.permute.xlu1 %3660  ;;  %3741 = vrot.lane.b32.xlu0 %v10697_v57, %s7922_s29  ;;  %v5714_v49 = vpop.f32.mrf.mxu0  ;;  %v10724_v29 = vmax.f32 %v10412_v23, %v3677_v27 }
 0x25f   : > { %v3678_v42 = vsel %vm617_vm7, %v3659_v30, %v3661_v52 }
 0x260   : > { %v10711_v14 = vmax.f32 %v10461_v61, %v3678_v42  ;;  %v10713_v48 = vpop.permute.xlu0 %3662  ;;  %v5716_v62 = vpop.f32.mrf.mxu0 }
 0x261   : > { %v3679_v34 = vsel %vm617_vm7, %v3661_v52, %v10713_v48  ;;  %3739 = vrot.lane.b32.xlu1 %v10706_v58, %s7922_s29  ;;  %v5399_v52 = vadd.f32 %v10614_v22, %v10561_v56  ;;  %v10737_v23 = vadd.f32 %v5716_v62, %v5401_v60  ;;  %v5403_v60 = vadd.f32 %v10637_v32, %v10583_v1 }
 0x262   : > { %11720 = vst [vmem:[#allocation17_spill] sm:$0xff] %v10711_v14  ;;  %3753 = vrot.lane.b32.xlu0 %v10711_v14, %s7922_s29  ;;  %v5757_v53 = vpop.f32.mrf.mxu1  ;;  %v10727_v61 = vmax.f32 %v10471_v47, %v3679_v34  ;;  %v5718_v30 = vpop.f32.mrf.mxu0  ;;  %v5444_v14 = vadd.f32 %v10639_v11, %v10585_v13  ;;  %v5405_v13 = vadd.f32 %v10644_v16, %v10593_v51 }
 0x263   : > { %v10739_v27 = vadd.f32 %v5714_v49, %v5399_v52  ;;  %v10751_v55 = vadd.f32 %v5757_v53, %v5442_v63  ;;  %v10761_v25 = vadd.f32 %v5718_v30, %v5403_v60  ;;  %v5448_v1 = vadd.f32 %v10667_v59, %v10599_v17 }
 0x264   : > { %11721 = vst [vmem:[#allocation18_spill] sm:$0xff] %v10727_v61  ;;  %v5759_v42 = vpop.f32.mrf.mxu1  ;;  %v5720_v47 = vpop.f32.mrf.mxu0  ;;  %v5528_v52 = vadd.f32 %v10676_v46, %v10605_v50 }
 0x265   : > { %3751 = vrot.lane.b32.xlu1 %v10724_v29, %s7922_s29  ;;  %v10749_v22 = vadd.f32 %v5759_v42, %v5444_v14  ;;  %v10763_v11 = vadd.f32 %v5720_v47, %v5405_v13  ;;  %v5446_v42 = vadd.f32 %v10649_v43, %v10595_v31  ;;  %v5485_v31 = vadd.f32 %v10657_v35, %v10597_v8 }
 0x266   : > { %3755 = vrot.lane.b32.xlu0 %v10727_v61, %s7922_s29  ;;  %v5761_v34 = vpop.f32.mrf.mxu1  ;;  %v5530_v35 = vadd.f32 %v10685_v7, %v10607_v4  ;;  %v5532_v7 = vadd.f32 %v10699_v37, %v10611_v15  ;;  %v5534_v15 = vadd.f32 %v10715_v3, %v10616_v18  ;;  %v10851_v18 = vpop.permute.xlu1 %3664 }
 0x267   : > { %v10773_v51 = vadd.f32 %v5761_v34, %v5446_v42  ;;  %v5487_v34 = vadd.f32 %v10665_v45, %v10601_v38  ;;  %v5489_v38 = vadd.f32 %v10681_v24, %v10603_v9  ;;  %v5491_v9 = vadd.f32 %v10694_v19, %v10609_v54  ;;  %11730 = vst [vmem:[#allocation27_spill] sm:$0xff] %v10851_v18 }
 0x268   : > { %v5763_v49 = vpop.f32.mrf.mxu1 }
 0x269   : > { %5886 = vrot.lane.b32.xlu1 %v10737_v23, %s7920_s27  ;;  %v10775_v32 = vadd.f32 %v5763_v49, %v5448_v1 }
 0x26a   : > { %5884 = vrot.lane.b32.xlu0 %v10739_v27, %s7920_s27  ;;  %v5800_v56 = vpop.f32.mrf.mxu0 }
 0x26b   : > { %11722 = vst [vmem:[#allocation19_spill] sm:$0xff] %v10775_v32  ;;  %v10789_v59 = vadd.f32 %v5800_v56, %v5485_v31 }
 0x26c   : > { %v5802_v62 = vpop.f32.mrf.mxu0 }
 0x26d   : > { %5890 = vrot.lane.b32.xlu1 %v10749_v22, %s7920_s27  ;;  %v10803_v46 = vadd.f32 %v5802_v62, %v5487_v34 }
 0x26e   : > { %5888 = vrot.lane.b32.xlu0 %v10751_v55, %s7920_s27  ;;  %v5843_v20 = vpop.f32.mrf.mxu1  ;;  %v5804_v14 = vpop.f32.mrf.mxu0 }
 0x26f   : > { %v10787_v43 = vadd.f32 %v5843_v20, %v5528_v52  ;;  %11724 = vst [vmem:[#allocation21_spill] sm:$0xff] %v10803_v46  ;;  %v10819_v4 = vadd.f32 %v5804_v14, %v5489_v38 }
 0x270   : > { %v5845_v53 = vpop.f32.mrf.mxu1  ;;  %v5806_v16 = vpop.f32.mrf.mxu0 }
 0x271   : > { %5900 = vrot.lane.b32.xlu1 %v10761_v25, %s7920_s27  ;;  %11723 = vst [vmem:[#allocation20_spill] sm:$0xff] %v10787_v43  ;;  %v10805_v63 = vadd.f32 %v5845_v53, %v5530_v35  ;;  %11726 = vst [vmem:[#allocation23_spill] sm:$0xff] %v10819_v4  ;;  %v10835_v37 = vadd.f32 %v5806_v16, %v5491_v9 }
 0x272   : > { %5902 = vrot.lane.b32.xlu0 %v10763_v11, %s7920_s27  ;;  %v5847_v30 = vpop.f32.mrf.mxu1 }
 0x273   : > { %11725 = vst [vmem:[#allocation22_spill] sm:$0xff] %v10805_v63  ;;  %v10821_v49 = vadd.f32 %v5847_v30, %v5532_v7  ;;  %11728 = vst [vmem:[#allocation25_spill] sm:$0xff] %v10835_v37 }
 0x274   : > { %v5849_v47 = vpop.f32.mrf.mxu1 }
 0x275   : > { %5904 = vrot.lane.b32.xlu1 %v10773_v51, %s7920_s27  ;;  %11727 = vst [vmem:[#allocation24_spill] sm:$0xff] %v10821_v49  ;;  %v10839_v13 = vadd.f32 %v5849_v47, %v5534_v15 }
 0x276   : > { %5906 = vrot.lane.b32.xlu0 %v10775_v32, %s7920_s27  ;;  %v10785_v17 = vpop.f32.mrf.mxu0 }
 0x277   : > { %11729 = vst [vmem:[#allocation26_spill] sm:$0xff] %v10839_v13 }
 0x278   : > { %v10795_v50 = vpop.f32.mrf.mxu0 }
 0x279   : > { %5896 = vrot.lane.b32.xlu1 %v10787_v43, %s7920_s27 }
 0x27a   : > { %5892 = vrot.lane.b32.xlu0 %v10789_v59, %s7920_s27  ;;  %v10801_v8 = vpop.f32.mrf.mxu1  ;;  %v10813_v45 = vpop.f32.mrf.mxu0 }
 0x27c   : > { %v10807_v56 = vpop.f32.mrf.mxu1  ;;  %v10827_v24 = vpop.f32.mrf.mxu0 }
 0x27d   : > { %5894 = vrot.lane.b32.xlu1 %v10803_v46, %s7920_s27 }
 0x27e   : > { %5898 = vrot.lane.b32.xlu0 %v10805_v63, %s7920_s27  ;;  %v10823_v62 = vpop.f32.mrf.mxu1 }
 0x280   : > { %v10841_v20 = vpop.f32.mrf.mxu1 }
 0x281   : > { %5908 = vrot.lane.b32.xlu1 %v10819_v4, %s7920_s27 }
 0x282   : > { %5912 = vrot.lane.b32.xlu0 %v10821_v49, %s7920_s27 }
 0x283   : > { %v10837_v60 = vpop.f32.mrf.mxu0 }
 0x285   : > { %5910 = vrot.lane.b32.xlu1 %v10835_v37, %s7920_s27  ;;  %v10845_v54 = vpop.f32.mrf.mxu0 }
 0x286   : > { %5914 = vrot.lane.b32.xlu0 %v10839_v13, %s7920_s27  ;;  %v10849_v3 = vpop.f32.mrf.mxu1 }
 0x287   : > { %v10853_v19 = vpop.f32.mrf.mxu0 }
 0x288   : > { %v10855_v14 = vpop.f32.mrf.mxu1 }
 0x289   : > { %v10859_v42 = vpop.f32.mrf.mxu0 }
 0x28a   : > { %v10857_v53 = vpop.f32.mrf.mxu1 }
 0x28b   : > { %v4761_v1 = vpop.permute.xlu1 %4760 }
 0x28c   : > { %v10862_v52 = vpop.f32.mrf.mxu1 }
 0x28d   : > { %v4763_v16 = vpop.permute.xlu0 %4762 }
 0x28e   : > { %v4792_v30 = vsel %vm617_vm7, %v4761_v1, %v4763_v16 }
 0x28f   : > { %v10865_v31 = vmax.f32 %v10511_v44, %v4792_v30  ;;  %v6522_v47 = vpop.f32.mrf.mxu0  ;;  %v4765_v34 = vpop.permute.xlu1 %4764 }
 0x290   : > { %v4793_v35 = vsel %vm617_vm7, %v4763_v16, %v4765_v34 }
 0x291   : > { %11731 = vst [vmem:[#allocation28_spill] sm:$0xff] %v10865_v31  ;;  %v10869_v38 = vmax.f32 %v10514_v26, %v4793_v35  ;;  %v10871_v7 = vpop.f32.mrf.mxu0  ;;  %4854 = vrot.lane.b32.xlu1 %v10865_v31, %s7922_s29  ;;  %v4767_v9 = vpop.permute.xlu0 %4766 }
 0x292   : > { %v4794_v15 = vsel %vm617_vm7, %v4765_v34, %v4767_v9  ;;  %v6565_v1 = vpop.f32.mrf.mxu1 }
 0x293   : > { %11732 = vst [vmem:[#allocation29_spill] sm:$0xff] %v10869_v38  ;;  %v10877_v13 = vmax.f32 %v10518_v39, %v4794_v15  ;;  %v4777_v44 = vpop.permute.xlu1 %4776  ;;  %4856 = vrot.lane.b32.xlu0 %v10869_v38, %s7922_s29  ;;  %v10883_v26 = vpop.f32.mrf.mxu0 }
 0x294   : > { %v10881_v16 = vpop.f32.mrf.mxu1 }
 0x295   : > { %11733 = vst [vmem:[#allocation30_spill] sm:$0xff] %v10877_v13  ;;  %4858 = vrot.lane.b32.xlu1 %v10877_v13, %s7922_s29  ;;  %v4779_v30 = vpop.permute.xlu0 %4778  ;;  %v10894_v61 = vpop.f32.mrf.mxu0 }
 0x296   : > { %v4799_v35 = vsel %vm617_vm7, %v4777_v44, %v4779_v30  ;;  %v10891_v39 = vpop.f32.mrf.mxu1 }
 0x297   : > { %v10889_v34 = vmax.f32 %v10526_v10, %v4799_v35  ;;  %v4781_v49 = vpop.permute.xlu1 %4780 }
 0x298   : > { %v4800_v15 = vsel %vm617_vm7, %v4779_v30, %v4781_v49  ;;  %v10909_v30 = vpop.f32.mrf.mxu1 }
 0x299   : > { %11734 = vst [vmem:[#allocation31_spill] sm:$0xff] %v10889_v34  ;;  %v10897_v38 = vmax.f32 %v10530_v36, %v4800_v15  ;;  %4870 = vrot.lane.b32.xlu0 %v10889_v34, %s7922_s29  ;;  %v4783_v13 = vpop.permute.xlu0 %4782 }
 0x29a   : > { %v4801_v31 = vsel %vm617_vm7, %v4781_v49, %v4783_v13 }
 0x29b   : > { %11735 = vst [vmem:[#allocation32_spill] sm:$0xff] %v10897_v38  ;;  %v10903_v44 = vmax.f32 %v10534_v2, %v4801_v31  ;;  %v10905_v10 = vpop.f32.mrf.mxu0  ;;  %v4769_v35 = vpop.permute.xlu1 %4768  ;;  %4872 = vrot.lane.b32.xlu1 %v10897_v38, %s7922_s29 }
 0x29c   : > { %v4795_v36 = vsel %vm617_vm7, %v4767_v9, %v4769_v35 }
 0x29d   : > { %11736 = vst [vmem:[#allocation33_spill] sm:$0xff] %v10903_v44  ;;  %4874 = vrot.lane.b32.xlu0 %v10903_v44, %s7922_s29  ;;  %v4771_v15 = vpop.permute.xlu0 %4770  ;;  %v10914_v34 = vpop.f32.mrf.mxu0  ;;  %v10919_v2 = vmax.f32 %v10522_v12, %v4795_v36 }
 0x29e   : > { %v10916_v49 = vpop.f32.mrf.mxu1  ;;  %v4796_v32 = vsel %vm617_vm7, %v4769_v35, %v4771_v15  ;;  %v6523_v35 = vadd.f32 %v6522_v47, %v10785_v17  ;;  %v6566_v17 = vadd.f32 %v6565_v1, %v10801_v8  ;;  %v6525_v1 = vadd.f32 %v10871_v7, %v10795_v50 }
 0x29f   : > { %11737 = vst [vmem:[#allocation34_spill] sm:$0xff] %v10919_v2  ;;  %v4773_v31 = vpop.permute.xlu1 %4772  ;;  %v10924_v4 = vpop.f32.mrf.mxu0  ;;  %v10941_v46 = vmax.f32 %v10542_v6, %v4796_v32  ;;  %v6609_v50 = vadd.f32 %v10905_v10, %v10837_v60 }
 0x2a0   : > { %v4797_v37 = vsel %vm617_vm7, %v4771_v15, %v4773_v31  ;;  %v10926_v9 = vpop.f32.mrf.mxu1 }
 0x2a1   : > { %4860 = vrot.lane.b32.xlu0 %v10919_v2, %s7922_s29  ;;  %v4775_v38 = vpop.permute.xlu0 %4774  ;;  %v10933_v43 = vmax.f32 %v10547_v28, %v4797_v37 }
 0x2a2   : > { %v10929_v44 = vmax.f32 %v10557_v41, %v4775_v38  ;;  %v4798_v12 = vsel %vm617_vm7, %v4773_v31, %v4775_v38  ;;  %v10943_v41 = vpop.f32.mrf.mxu0  ;;  %v10945_v63 = vpop.f32.mrf.mxu1 }
 0x2a3   : > { %v4785_v36 = vpop.permute.xlu1 %4784  ;;  %v10948_v28 = vmax.f32 %v10552_v40, %v4798_v12 }
 0x2a4   : > { %4868 = vrot.lane.b32.xlu1 %v10929_v44, %s7922_s29  ;;  %v4802_v37 = vsel %vm617_vm7, %v4783_v13, %v4785_v36  ;;  %v10959_v15 = vpop.f32.mrf.mxu1 }
 0x2a5   : > { %4864 = vrot.lane.b32.xlu0 %v10933_v43, %s7922_s29  ;;  %v4789_v2 = vpop.permute.xlu0 %4788  ;;  %v10957_v32 = vmax.f32 %v10538_v5, %v4802_v37 }
 0x2a7   : > { %v6838_v38 = vpop.f32.mrf.mxu0  ;;  %v11004_v7 = vpop.permute.xlu1 %4790 }
 0x2a8   : > { %4862 = vrot.lane.b32.xlu1 %v10941_v46, %s7922_s29  ;;  %v10961_v31 = vadd.f32 %v6838_v38, %v6523_v35  ;;  %11738 = vst [vmem:[#allocation35_spill] sm:$0xff] %v11004_v7 }
 0x2a9   : > { %4866 = vrot.lane.b32.xlu0 %v10948_v28, %s7922_s29  ;;  %v4787_v6 = vpop.permute.xlu0 %4786  ;;  %v6840_v13 = vpop.f32.mrf.mxu0 }
 0x2aa   : > { %v4803_v40 = vsel %vm617_vm7, %v4785_v36, %v4787_v6  ;;  %v6881_v12 = vpop.f32.mrf.mxu1  ;;  %v4804_v5 = vsel %vm617_vm7, %v4787_v6, %v4789_v2  ;;  %v6527_v36 = vadd.f32 %v10883_v26, %v10813_v45  ;;  %v10994_v45 = vadd.f32 %v6840_v13, %v6525_v1 }
 0x2ab   : > { %v10970_v47 = vmax.f32 %v10564_v0, %v4803_v40  ;;  %v10973_v37 = vadd.f32 %v6881_v12, %v6566_v17  ;;  %v6842_v38 = vpop.f32.mrf.mxu0  ;;  %v10982_v8 = vmax.f32 %v10587_v33, %v4804_v5  ;;  %v6570_v40 = vadd.f32 %v10891_v39, %v10823_v62 }
 0x2ac   : > { %4876 = vrot.lane.b32.xlu1 %v10957_v32, %s7922_s29  ;;  %v6883_v35 = vpop.f32.mrf.mxu1  ;;  %v10984_v0 = vadd.f32 %v6842_v38, %v6527_v36  ;;  %v6568_v12 = vadd.f32 %v10881_v16, %v10807_v56  ;;  %v6529_v56 = vadd.f32 %v10894_v61, %v10827_v24  ;;  %v4805_v16 = vsel %vm617_vm7, %v4789_v2, %v11004_v7  ;;  %v11754_v7 = vld [vmem:[#allocation15_spill] sm:$0xff] }
 0x2ad   : > { %7008 = vrot.lane.b32.xlu0 %v10961_v31, %s7920_s27  ;;  %v6844_v26 = vpop.f32.mrf.mxu0  ;;  %v11023_v10 = vmax.f32 %v10571_v21, %v4805_v16  ;;  %v6572_v61 = vadd.f32 %v10909_v30, %v10841_v20  ;;  %v6654_v2 = vadd.f32 %v10926_v9, %v10855_v14  ;;  %v6613_v14 = vadd.f32 %v10924_v4, %v10853_v19  ;;  %v11744_v4 = vld [vmem:[#allocation4_spill] sm:$0xff] }
 0x2ae   : > { %v6885_v6 = vpop.f32.mrf.mxu1  ;;  %v11008_v62 = vadd.f32 %v6883_v35, %v6568_v12  ;;  %v11020_v60 = vadd.f32 %v6844_v26, %v6529_v56  ;;  %v6652_v26 = vadd.f32 %v10916_v49, %v10849_v3  ;;  %v6611_v3 = vadd.f32 %v10914_v34, %v10845_v54 }
 0x2af   : > { %v10996_v33 = vadd.f32 %v6885_v6, %v6570_v40  ;;  %11740 = vst [vmem:[#allocation37_spill] sm:$0xff] %v11023_v10  ;;  %v11057_v19 = vsub.s32 0, %v11744_v4  ;;  %v6658_v56 = vadd.f32 %v10959_v15, %v10862_v52  ;;  %v11068_v54 = vsub.s32 1, %v11744_v4 }
 0x2b0   : > { %4878 = vrot.lane.b32.xlu1 %v10970_v47, %s7922_s29  ;;  %v6887_v39 = vpop.f32.mrf.mxu1  ;;  %v3680_v52 = vsel %vm617_vm7, %v10713_v48, %v10851_v18 }
 0x2b1   : > { %7012 = vrot.lane.b32.xlu0 %v10973_v37, %s7920_s27  ;;  %v11033_v1 = vadd.f32 %v6887_v39, %v6572_v61  ;;  %v3820_v61 = vld [vmem:[%s11634_s2] ss:$4 sm:$0x3f] }
 0x2b3   : > { %v6924_v17 = vpop.f32.mrf.mxu0  ;;  %11741 = vst [vmem:[#allocation38_spill] sm:$0xff] %v11033_v1 }
 0x2b4   : > { %4880 = vrot.lane.b32.xlu1 %v10982_v8, %s7922_s29  ;;  %v11010_v13 = vadd.f32 %v6924_v17, %v6609_v50 }
 0x2b5   : > { %7024 = vrot.lane.b32.xlu0 %v10984_v0, %s7920_s27  ;;  %v6926_v35 = vpop.f32.mrf.mxu0 }
 0x2b6   : > { %11739 = vst [vmem:[#allocation36_spill] sm:$0xff] %v11010_v13  ;;  %v6967_v38 = vpop.f32.mrf.mxu1  ;;  %v11070_v34 = vadd.f32 %v6926_v35, %v6611_v3  ;;  %v11090_v3 = vrot.slane %v3820_v61, %v11068_v54 }
 0x2b7   : > { %v6928_v21 = vpop.f32.mrf.mxu0  ;;  %v11045_v9 = vadd.f32 %v6967_v38, %v6652_v26 }
 0x2b8   : > { %7010 = vrot.lane.b32.xlu1 %v10994_v45, %s7920_s27  ;;  %v6969_v24 = vpop.f32.mrf.mxu1  ;;  %v11047_v17 = vadd.f32 %v6928_v21, %v6613_v14  ;;  %11745 = vst [vmem:[#allocation4_spill] sm:$0xff] %v11070_v34  ;;  %v11747_v21 = vld [vmem:[#allocation8_spill] sm:$0xff] }
 0x2b9   : > { %7028 = vrot.lane.b32.xlu0 %v10996_v33, %s7920_s27  ;;  %v11035_v40 = vadd.f32 %v6969_v24, %v6654_v2  ;;  %11742 = vst [vmem:[#allocation39_spill] sm:$0xff] %v11045_v9 }
 0x2ba   : > { %v6971_v20 = vpop.f32.mrf.mxu1  ;;  %11743 = vst [vmem:[#allocation40_spill] sm:$0xff] %v11047_v17 }
 0x2bb   : > { %v3730_v5 = vpop.permute.xlu0 %3729 }
 0x2bc   : > { %7014 = vrot.lane.b32.xlu1 %v11008_v62, %s7920_s27  ;;  %v6973_v49 = vpop.f32.mrf.mxu1 }
 0x2bd   : > { %7016 = vrot.lane.b32.xlu0 %v11010_v13, %s7920_s27  ;;  %v3732_v6 = vpop.permute.xlu1 %3731  ;;  %v11078_v15 = vadd.f32 %v6973_v49, %v6658_v56  ;;  %v11751_v49 = vld [vmem:[#allocation9_spill] sm:$0xff] }
 0x2be   : > { %v3762_v16 = vsel %vm1202_vm9, %v3730_v5, %v3732_v6 }
 0x2bf   : > { %v3734_v36 = vpop.permute.xlu0 %3733  ;;  %11746 = vst [vmem:[#allocation41_spill] sm:$0xff] %v11078_v15  ;;  %v3792_v26 = vmax.f32 %v11747_v21, %v3762_v16 }
 0x2c0   : > { %7026 = vrot.lane.b32.xlu1 %v11020_v60, %s7920_s27  ;;  %v3763_v5 = vsel %vm1202_vm9, %v3732_v6, %v3734_v36 }
 0x2c1   : > { %4882 = vrot.lane.b32.xlu0 %v11023_v10, %s7922_s29  ;;  %v3793_v56 = vmax.f32 %v11751_v49, %v3763_v5  ;;  %v11101_v10 = vsub.s32 2, %v11744_v4  ;;  %v6930_v49 = vpop.f32.mrf.mxu0 }
 0x2c4   : > { %v3746_v30 = vpop.permute.xlu0 %3745  ;;  %7030 = vrot.lane.b32.xlu1 %v11033_v1, %s7920_s27 }
 0x2c5   : > { %7022 = vrot.lane.b32.xlu0 %v11035_v40, %s7920_s27 }
 0x2c6   : > { %v3748_v12 = vpop.permute.xlu1 %3747 }
 0x2c7   : > { %v11050_v50 = vsel %vm1202_vm9, %v3746_v30, %v3748_v12  ;;  %v11748_v30 = vld [vmem:[#allocation10_spill] sm:$0xff] }
 0x2c8   : > { %v3750_v39 = vpop.permute.xlu0 %3749  ;;  %7020 = vrot.lane.b32.xlu1 %v11045_v9, %s7920_s27 }
 0x2c9   : > { %v11063_v38 = vsel %vm1202_vm9, %v3748_v12, %v3750_v39  ;;  %7032 = vrot.lane.b32.xlu0 %v11047_v17, %s7920_s27  ;;  %v11087_v12 = vrot.slane %v3820_v61, %v11057_v19  ;;  %v6656_v17 = vadd.f32 %v10945_v63, %v10857_v53  ;;  %v11119_v63 = vsub.s32 4, %v11744_v4 }
 0x2ca   : > { %v3736_v24 = vpop.permute.xlu1 %3735  ;;  %v11122_v53 = vsub.s32 5, %v11744_v4 }
 0x2cb   : > { %v3764_v2 = vsel %vm1202_vm9, %v3734_v36, %v3736_v24  ;;  %v11749_v36 = vld [vmem:[#allocation5_spill] sm:$0xff] }
 0x2cc   : > { %v3794_v35 = vmax.f32 %v11748_v30, %v3764_v2  ;;  %v3738_v14 = vpop.permute.xlu0 %3737  ;;  %7018 = vrot.lane.b32.xlu1 %v11070_v34, %s7920_s27  ;;  %v11096_v6 = vmax.f32 %v11749_v36, %v3680_v52  ;;  %v11752_v2 = vld [vmem:[#allocation14_spill] sm:$0xff]  ;;  %v11108_v36 = vadd.f32 %v6971_v20, %v6656_v17  ;;  %v6615_v20 = vadd.f32 %v10943_v41, %v10859_v42 }
 0x2cd   : > { %v3765_v48 = vsel %vm1202_vm9, %v3736_v24, %v3738_v14  ;;  %7038 = vrot.lane.b32.xlu0 %v11078_v15, %s7920_s27  ;;  %v11753_v15 = vld [vmem:[#allocation16_spill] sm:$0xff] }
 0x2ce   : > { %11750 = vst [vmem:[#allocation8_spill] sm:$0xff] %v11096_v6  ;;  %v3808_v16 = vmax.f32 %v3792_v26, %v3794_v35  ;;  %v3795_v21 = vmax.f32 %v11752_v2, %v3765_v48  ;;  %v11113_v48 = vsub.s32 3, %v11744_v4  ;;  %v11116_v2 = vrot.slane %v3820_v61, %v11101_v10 }
 0x2cf   : > { %v3744_v30 = vpop.permute.xlu1 %3743  ;;  %v11134_v13 = vadd.f32 %v6930_v49, %v6615_v20 }
 0x2d0   : > { %v3809_v1 = vmax.f32 %v3793_v56, %v3795_v21  ;;  %v3742_v24 = vpop.permute.xlu0 %3741  ;;  %3757 = vrot.lane.b32.xlu1 %v11096_v6, %s7922_s29  ;;  %v3852_v5 = vmul.f32 %v11087_v12, %v3808_v16  ;;  %v3799_v18 = vmax.f32 %v11753_v15, %v3744_v30  ;;  %v11137_v42 = vrot.slane %v3820_v61, %v11113_v48 }
 0x2d1   : > { %v3768_v52 = vsel %vm1202_vm9, %v3742_v24, %v3744_v30 }
 0x2d2   : > { %v3853_v26 = vmul.f32 %v11090_v3, %v3809_v1  ;;  %v3798_v9 = vmax.f32 %v10697_v57, %v3768_v52 }
 0x2d3   : > { %v3740_v56 = vpop.permute.xlu1 %3739 }
 0x2d4   : > { %v3864_v17 = vadd.f32 %v3853_v26, %v3852_v5  ;;  %v3766_v1 = vsel %vm1202_vm9, %v3738_v14, %v3740_v56  ;;  %v3767_v16 = vsel %vm1202_vm9, %v3740_v56, %v3742_v24  ;;  %v3754_v6 = vpop.permute.xlu0 %3753  ;;  %7036 = vrot.lane.b32.xlu1 %v11108_v36, %s7920_s27  ;;  %v11140_v56 = vrot.slane %v3820_v61, %v11122_v53 }
 0x2d5   : > { %v3796_v4 = vmax.f32 %v11754_v7, %v3766_v1  ;;  %v3797_v34 = vmax.f32 %v10706_v58, %v3767_v16  ;;  %v11756_v58 = vld [vmem:[#allocation11_spill] sm:$0xff] }
 0x2d6   : > { %11755 = vst [vmem:[#allocation10_spill] sm:$0xff] %v11140_v56  ;;  %v3800_v30 = vmax.f32 %v11756_v58, %v11050_v50  ;;  %v11760_v50 = vld [vmem:[#allocation17_spill] sm:$0xff] }
 0x2d7   : > { %v3810_v41 = vmax.f32 %v3794_v35, %v3796_v4  ;;  %v3811_v14 = vmax.f32 %v3795_v21, %v3797_v34  ;;  %v3812_v24 = vmax.f32 %v3796_v4, %v3798_v9  ;;  %v3813_v5 = vmax.f32 %v3797_v34, %v3799_v18  ;;  %v3752_v26 = vpop.permute.xlu1 %3751  ;;  %v11758_v9 = vld [vmem:[#allocation12_spill] sm:$0xff]  ;;  %v11759_v21 = vld [vmem:[#allocation13_spill] sm:$0xff] }
 0x2d8   : > { %v3771_v15 = vsel %vm1202_vm9, %v3750_v39, %v3752_v26  ;;  %v3772_v57 = vsel %vm1202_vm9, %v3752_v26, %v3754_v6  ;;  %v11144_v7 = vpop.permute.xlu0 %3755  ;;  %7034 = vrot.lane.b32.xlu1 %v11134_v13, %s7920_s27  ;;  %v11151_v35 = vrot.slane %v3820_v61, %v11119_v63  ;;  %v3801_v34 = vmax.f32 %v11758_v9, %v11063_v38 }
 0x2d9   : > { %v3854_v18 = vmul.f32 %v11116_v2, %v3810_v41  ;;  %v3802_v39 = vmax.f32 %v11759_v21, %v3771_v15  ;;  %v11158_v52 = vmax.f32 %v10724_v29, %v3772_v57  ;;  %v3773_v49 = vsel %vm1202_vm9, %v3754_v6, %v11144_v7 }
 0x2da   : > { %11757 = vst [vmem:[#allocation5_spill] sm:$0xff] %v11151_v35  ;;  %v3855_v20 = vmul.f32 %v11137_v42, %v3811_v14  ;;  %v11164_v16 = vmax.f32 %v11760_v50, %v3773_v49  ;;  %v3857_v4 = vmul.f32 %v11140_v56, %v3813_v5  ;;  %v3856_v15 = vmul.f32 %v11151_v35, %v3812_v24  ;;  %v11777_v35 = vld [vmem:[#allocation29_spill] sm:$0xff] }
 0x2db   : > { %v3865_v1 = vadd.f32 %v3864_v17, %v3854_v18  ;;  %v5887_v61 = vpop.permute.xlu1 %5886  ;;  %v3814_v41 = vmax.f32 %v3800_v30, %v3802_v39  ;;  %v3815_v38 = vmax.f32 %v3801_v34, %v11158_v52 }
 0x2dc   : > { %11761 = vst [vmem:[#allocation9_spill] sm:$0xff] %v11164_v16  ;;  %v5885_v26 = vpop.permute.xlu0 %5884  ;;  %v3816_v57 = vmax.f32 %v3802_v39, %v11164_v16  ;;  %v3869_v18 = vsel %vm2079_vm3, %v3857_v4, 0.0 }
 0x2dd   : > { %v3866_v29 = vadd.f32 %v3865_v1, %v3855_v20  ;;  %v5916_v6 = vsel %vm617_vm7, %v5885_v26, %v5887_v61  ;;  %v3858_v9 = vmul.f32 %v11087_v12, %v3814_v41  ;;  %v3859_v39 = vmul.f32 %v11090_v3, %v3815_v38 }
 0x2de   : > { %v11172_v14 = vmax.f32 %v10739_v27, %v5916_v6  ;;  %v3860_v50 = vmul.f32 %v11116_v2, %v3816_v57 }
 0x2df   : > { %v3867_v17 = vadd.f32 %v3866_v29, %v3856_v15  ;;  %v5891_v58 = vpop.permute.xlu1 %5890 }
 0x2e0   : > { %5978 = vrot.lane.b32.xlu1 %v11172_v14, %s7922_s29  ;;  %v5889_v5 = vpop.permute.xlu0 %5888 }
 0x2e1   : > { %v3870_v30 = vadd.f32 %v3869_v18, %v3867_v17  ;;  %v5917_v24 = vsel %vm617_vm7, %v5887_v61, %v5889_v5  ;;  %v5918_v34 = vsel %vm617_vm7, %v5889_v5, %v5891_v58  ;;  %v11765_v18 = vld [vmem:[#allocation22_spill] sm:$0xff] }
 0x2e2   : > { %v11181_v21 = vmax.f32 %v10737_v23, %v5917_v24  ;;  %v11184_v27 = vmax.f32 %v10751_v55, %v5918_v34  ;;  %v11767_v24 = vld [vmem:[#allocation21_spill] sm:$0xff] }
 0x2e3   : > { %v3871_v49 = vadd.f32 %v3870_v30, %v3858_v9  ;;  %v5901_v20 = vpop.permute.xlu1 %5900 }
 0x2e4   : > { %5982 = vrot.lane.b32.xlu1 %v11184_v27, %s7922_s29  ;;  %5980 = vrot.lane.b32.xlu0 %v11181_v21, %s7922_s29  ;;  %v5903_v12 = vpop.permute.xlu0 %5902 }
 0x2e5   : > { %v3872_v1 = vadd.f32 %v3871_v49, %v3859_v39  ;;  %v5923_v23 = vsel %vm617_vm7, %v5901_v20, %v5903_v12 }
 0x2e6   : > { %v11194_v61 = vmax.f32 %v10761_v25, %v5923_v23 }
 0x2e7   : > { %v11196_v55 = vadd.f32 %v3872_v1, %v3860_v50  ;;  %v5905_v3 = vpop.permute.xlu1 %5904  ;;  %v11769_v50 = vld [vmem:[#allocation19_spill] sm:$0xff] }
 0x2e8   : > { %11762 = vst [vmem:[#allocation14_spill] sm:$0xff] %v11194_v61  ;;  %v5924_v4 = vsel %vm617_vm7, %v5903_v12, %v5905_v3  ;;  %5994 = vrot.lane.b32.xlu0 %v11194_v61, %s7922_s29  ;;  %v5907_v41 = vpop.permute.xlu0 %5906 }
 0x2e9   : > { %v11202_v38 = vmax.f32 %v10763_v11, %v5924_v4  ;;  %v5925_v26 = vsel %vm617_vm7, %v5905_v3, %v5907_v41  ;;  %v11771_v3 = vld [vmem:[#allocation23_spill] sm:$0xff] }
 0x2ea   : > { %v11206_v2 = vmax.f32 %v10773_v51, %v5925_v26 }
 0x2eb   : > { %11763 = vst [vmem:[#allocation16_spill] sm:$0xff] %v11202_v38  ;;  %v5897_v15 = vpop.permute.xlu1 %5896  ;;  %5996 = vrot.lane.b32.xlu1 %v11202_v38, %s7922_s29 }
 0x2ec   : > { %11764 = vst [vmem:[#allocation15_spill] sm:$0xff] %v11206_v2  ;;  %5998 = vrot.lane.b32.xlu0 %v11206_v2, %s7922_s29  ;;  %v5893_v25 = vpop.permute.xlu0 %5892  ;;  %v11779_v2 = vld [vmem:[#allocation31_spill] sm:$0xff] }
 0x2ed   : > { %v5919_v29 = vsel %vm617_vm7, %v5891_v58, %v5893_v25 }
 0x2ee   : > { %v11214_v57 = vmax.f32 %v10749_v22, %v5919_v29 }
 0x2ef   : > { %v5895_v11 = vpop.permute.xlu1 %5894 }
 0x2f0   : > { %v5920_v6 = vsel %vm617_vm7, %v5893_v25, %v5895_v11  ;;  %5984 = vrot.lane.b32.xlu0 %v11214_v57, %s7922_s29  ;;  %v5899_v51 = vpop.permute.xlu0 %5898  ;;  %v5921_v30 = vsel %vm617_vm7, %v5895_v11, %v5897_v15 }
 0x2f1   : > { %v11220_v17 = vmax.f32 %v10789_v59, %v5920_v6  ;;  %v11223_v5 = vmax.f32 %v11765_v18, %v5899_v51  ;;  %v5922_v58 = vsel %vm617_vm7, %v5897_v15, %v5899_v51  ;;  %v11232_v34 = vmax.f32 %v11767_v24, %v5921_v30  ;;  %v11768_v59 = vld [vmem:[#allocation20_spill] sm:$0xff]  ;;  %v11773_v15 = vld [vmem:[#allocation25_spill] sm:$0xff] }
 0x2f2   : > { %v11235_v39 = vmax.f32 %v11768_v59, %v5922_v58 }
 0x2f3   : > { %11766 = vst [vmem:[#allocation11_spill] sm:$0xff] %v11223_v5  ;;  %v5909_v9 = vpop.permute.xlu1 %5908  ;;  %5986 = vrot.lane.b32.xlu1 %v11220_v17, %s7922_s29 }
 0x2f4   : > { %5992 = vrot.lane.b32.xlu0 %v11223_v5, %s7922_s29  ;;  %v5913_v22 = vpop.permute.xlu0 %5912  ;;  %v5926_v49 = vsel %vm617_vm7, %v5907_v41, %v5909_v9 }
 0x2f5   : > { %v11246_v23 = vmax.f32 %v11769_v50, %v5926_v49  ;;  %v11776_v50 = vld [vmem:[#allocation30_spill] sm:$0xff] }
 0x2f7   : > { %v5911_v20 = vpop.permute.xlu1 %5910  ;;  %5988 = vrot.lane.b32.xlu1 %v11232_v34, %s7922_s29  ;;  %11770 = vst [vmem:[#allocation12_spill] sm:$0xff] %v11246_v23 }
 0x2f8   : > { %v5927_v12 = vsel %vm617_vm7, %v5909_v9, %v5911_v20  ;;  %5990 = vrot.lane.b32.xlu0 %v11235_v39, %s7922_s29  ;;  %v11243_v1 = vpop.permute.xlu0 %5914  ;;  %v5928_v26 = vsel %vm617_vm7, %v5911_v20, %v5913_v22  ;;  %v11775_v20 = vld [vmem:[#allocation28_spill] sm:$0xff] }
 0x2f9   : > { %v11249_v4 = vmax.f32 %v11771_v3, %v5927_v12  ;;  %v11253_v41 = vsel %vm617_vm7, %v5913_v22, %v11243_v1  ;;  %v11261_v25 = vmax.f32 %v11773_v15, %v5928_v26  ;;  %v7507_v15 = vld [vmem:[%s11634_s2 + $0x1] ss:$4 sm:$0x3f] }
 0x2fa   : > { %v4950_v56 = vrot.slane %v7507_v15, %v11057_v19  ;;  %v11298_v5 = vrot.slane %v7507_v15, %v11119_v63 }
 0x2fb   : > { %11772 = vst [vmem:[#allocation13_spill] sm:$0xff] %v11249_v4  ;;  %6000 = vrot.lane.b32.xlu1 %v11246_v23, %s7922_s29  ;;  %11774 = vst [vmem:[#allocation17_spill] sm:$0xff] %v11261_v25 }
 0x2fc   : > { %6002 = vrot.lane.b32.xlu0 %v11249_v4, %s7922_s29 }
 0x2ff   : > { %6004 = vrot.lane.b32.xlu1 %v11261_v25, %s7922_s29 }
 0x303   : > { %v4855_v29 = vpop.permute.xlu1 %4854 }
 0x305   : > { %v4857_v11 = vpop.permute.xlu0 %4856 }
 0x306   : > { %v4886_v6 = vsel %vm1202_vm9, %v4855_v29, %v4857_v11 }
 0x307   : > { %v4859_v51 = vpop.permute.xlu1 %4858  ;;  %v4916_v12 = vmax.f32 %v11775_v20, %v4886_v6 }
 0x308   : > { %v4887_v18 = vsel %vm1202_vm9, %v4857_v11, %v4859_v51 }
 0x309   : > { %v4917_v25 = vmax.f32 %v11777_v35, %v4887_v18  ;;  %v4958_v18 = vrot.slane %v7507_v15, %v11101_v10 }
 0x30b   : > { %v4871_v30 = vpop.permute.xlu0 %4870 }
 0x30d   : > { %v4873_v58 = vpop.permute.xlu1 %4872 }
 0x30e   : > { %v4893_v9 = vsel %vm1202_vm9, %v4871_v30, %v4873_v58 }
 0x30f   : > { %v4875_v22 = vpop.permute.xlu0 %4874 }
 0x310   : > { %v4894_v24 = vsel %vm1202_vm9, %v4873_v58, %v4875_v22  ;;  %v4954_v58 = vrot.slane %v7507_v15, %v11068_v54 }
 0x313   : > { %v4861_v59 = vpop.permute.xlu0 %4860 }
 0x314   : > { %v4888_v49 = vsel %vm1202_vm9, %v4859_v51, %v4861_v59 }
 0x315   : > { %v4918_v3 = vmax.f32 %v11776_v50, %v4888_v49  ;;  %v11778_v49 = vld [vmem:[#allocation34_spill] sm:$0xff] }
 0x316   : > { %v4869_v26 = vpop.permute.xlu1 %4868 }
 0x317   : > { %v4932_v29 = vmax.f32 %v4916_v12, %v4918_v3  ;;  %v4865_v11 = vpop.permute.xlu0 %4864  ;;  %v4923_v4 = vmax.f32 %v10929_v44, %v4869_v26  ;;  %v4924_v44 = vmax.f32 %v11779_v2, %v4893_v9 }
 0x31a   : > { %v4863_v30 = vpop.permute.xlu1 %4862 }
 0x31b   : > { %v4889_v51 = vsel %vm1202_vm9, %v4861_v59, %v4863_v30  ;;  %v4890_v6 = vsel %vm1202_vm9, %v4863_v30, %v4865_v11  ;;  %v4867_v20 = vpop.permute.xlu0 %4866  ;;  %v11289_v30 = vrot.slane %v7507_v15, %v11113_v48 }
 0x31c   : > { %v4919_v50 = vmax.f32 %v11778_v49, %v4889_v51  ;;  %v4920_v16 = vmax.f32 %v10941_v46, %v4890_v6  ;;  %v4891_v38 = vsel %vm1202_vm9, %v4865_v11, %v4867_v20  ;;  %v4892_v12 = vsel %vm1202_vm9, %v4867_v20, %v4869_v26 }
 0x31d   : > { %v4921_v23 = vmax.f32 %v10933_v43, %v4891_v38  ;;  %v4922_v35 = vmax.f32 %v10948_v28, %v4892_v12  ;;  %v4977_v26 = vmul.f32 %v4950_v56, %v4932_v29  ;;  %v11780_v38 = vld [vmem:[#allocation33_spill] sm:$0xff]  ;;  %v11295_v12 = vrot.slane %v7507_v15, %v11122_v53 }
 0x31e   : > { %v4933_v59 = vmax.f32 %v4917_v25, %v4919_v50  ;;  %v4934_v61 = vmax.f32 %v4918_v3, %v4920_v16  ;;  %v4877_v51 = vpop.permute.xlu1 %4876 }
 0x31f   : > { %v4935_v49 = vmax.f32 %v4919_v50, %v4921_v23  ;;  %v4936_v46 = vmax.f32 %v4920_v16, %v4922_v35  ;;  %v4937_v6 = vmax.f32 %v4921_v23, %v4923_v4  ;;  %v4895_v11 = vsel %vm1202_vm9, %v4875_v22, %v4877_v51  ;;  %v7009_v20 = vpop.permute.xlu0 %7008  ;;  %v11781_v22 = vld [vmem:[#allocation32_spill] sm:$0xff] }
 0x320   : > { %v4978_v43 = vmul.f32 %v4954_v58, %v4933_v59  ;;  %v4926_v28 = vmax.f32 %v11780_v38, %v4895_v11  ;;  %v4979_v25 = vmul.f32 %v4958_v18, %v4934_v61  ;;  %v4925_v35 = vmax.f32 %v11781_v22, %v4894_v24 }
 0x321   : > { %v4980_v9 = vmul.f32 %v11289_v30, %v4935_v49  ;;  %v4982_v59 = vmul.f32 %v11295_v12, %v4937_v6  ;;  %v4981_v61 = vmul.f32 %v11298_v5, %v4936_v46 }
 0x322   : > { %v4989_v3 = vadd.f32 %v4978_v43, %v4977_v26  ;;  %v4938_v50 = vmax.f32 %v4924_v44, %v4926_v28  ;;  %v4879_v16 = vpop.permute.xlu1 %4878 }
 0x323   : > { %v4896_v23 = vsel %vm1202_vm9, %v4877_v51, %v4879_v16  ;;  %v7013_v4 = vpop.permute.xlu0 %7012  ;;  %v4993_v24 = vsel %vm2079_vm3, %v4982_v59, 0.0 }
 0x324   : > { %v4990_v2 = vadd.f32 %v4989_v3, %v4979_v25  ;;  %v4927_v29 = vmax.f32 %v10957_v32, %v4896_v23  ;;  %v4983_v49 = vmul.f32 %v4950_v56, %v4938_v50 }
 0x326   : > { %v4991_v11 = vadd.f32 %v4990_v2, %v4980_v9  ;;  %v4939_v26 = vmax.f32 %v4925_v35, %v4927_v29  ;;  %v4881_v15 = vpop.permute.xlu1 %4880 }
 0x327   : > { %v4897_v44 = vsel %vm1202_vm9, %v4879_v16, %v4881_v15  ;;  %v7025_v43 = vpop.permute.xlu0 %7024 }
 0x328   : > { %v4992_v38 = vadd.f32 %v4991_v11, %v4981_v61  ;;  %v11308_v51 = vmax.f32 %v10970_v47, %v4897_v44  ;;  %v4984_v35 = vmul.f32 %v4954_v58, %v4939_v26 }
 0x32a   : > { %v4994_v25 = vadd.f32 %v4993_v24, %v4992_v38  ;;  %v4940_v32 = vmax.f32 %v4926_v28, %v11308_v51  ;;  %v7011_v3 = vpop.permute.xlu1 %7010 }
 0x32b   : > { %v7040_v6 = vsel %vm617_vm7, %v7009_v20, %v7011_v3  ;;  %v7041_v46 = vsel %vm617_vm7, %v7011_v3, %v7013_v4  ;;  %v7029_v23 = vpop.permute.xlu0 %7028  ;;  %v11783_v3 = vld [vmem:[#allocation4_spill] sm:$0xff] }
 0x32c   : > { %v4995_v22 = vadd.f32 %v4994_v25, %v4983_v49  ;;  %v11315_v16 = vmax.f32 %v10961_v31, %v7040_v6  ;;  %v11318_v47 = vmax.f32 %v10994_v45, %v7041_v46  ;;  %v4985_v9 = vmul.f32 %v4958_v18, %v4940_v32  ;;  %v11782_v49 = vld [vmem:[#allocation36_spill] sm:$0xff] }
 0x32e   : > { %v4996_v2 = vadd.f32 %v4995_v22, %v4984_v35  ;;  %v7015_v59 = vpop.permute.xlu1 %7014  ;;  %7102 = vrot.lane.b32.xlu0 %v11315_v16, %s7922_s29  ;;  %7104 = vrot.lane.b32.xlu1 %v11318_v47, %s7922_s29  ;;  %v11784_v35 = vld [vmem:[#allocation35_spill] sm:$0xff] }
 0x32f   : > { %v7042_v56 = vsel %vm617_vm7, %v7013_v4, %v7015_v59  ;;  %v7017_v20 = vpop.permute.xlu0 %7016 }
 0x330   : > { %v4997_v28 = vadd.f32 %v4996_v2, %v4985_v9  ;;  %v11326_v58 = vmax.f32 %v10973_v37, %v7042_v56  ;;  %v11785_v2 = vld [vmem:[#allocation7_spill] sm:$0xff] }
 0x331   : > { %v11390_v9 = vmax.f32 %v11785_v2, %v11784_v35 }
 0x332   : > { %v7027_v31 = vpop.permute.xlu1 %7026  ;;  %7106 = vrot.lane.b32.xlu0 %v11326_v58, %s7922_s29 }
 0x333   : > { %v7047_v45 = vsel %vm617_vm7, %v7025_v43, %v7027_v31  ;;  %v7048_v18 = vsel %vm617_vm7, %v7027_v31, %v7029_v23  ;;  %v11332_v50 = vpop.permute.xlu0 %4882 }
 0x334   : > { %v11335_v61 = vmax.f32 %v10984_v0, %v7047_v45  ;;  %v11338_v4 = vmax.f32 %v11020_v60, %v7048_v18  ;;  %v4898_v37 = vsel %vm1202_vm9, %v4881_v15, %v11332_v50 }
 0x335   : > { %v11343_v11 = vmax.f32 %v10982_v8, %v4898_v37  ;;  %v7043_v8 = vsel %vm617_vm7, %v7015_v59, %v7017_v20  ;;  %v11786_v59 = vld [vmem:[#allocation39_spill] sm:$0xff]  ;;  %v11789_v37 = vld [vmem:[#allocation6_spill] sm:$0xff] }
 0x336   : > { %v7031_v26 = vpop.permute.xlu1 %7030  ;;  %7118 = vrot.lane.b32.xlu1 %v11335_v61, %s7922_s29  ;;  %7120 = vrot.lane.b32.xlu0 %v11338_v4, %s7922_s29  ;;  %v11366_v25 = vmax.f32 %v11008_v62, %v7043_v8 }
 0x337   : > { %v4941_v44 = vmax.f32 %v4927_v29, %v11343_v11  ;;  %v7049_v0 = vsel %vm617_vm7, %v7029_v23, %v7031_v26  ;;  %v7023_v43 = vpop.permute.xlu0 %7022 }
 0x338   : > { %v11352_v60 = vmax.f32 %v10996_v33, %v7049_v0  ;;  %v11355_v15 = vmax.f32 %v11035_v40, %v7023_v43  ;;  %v11790_v0 = vld [vmem:[#allocation38_spill] sm:$0xff] }
 0x339   : > { %v4986_v38 = vmul.f32 %v11289_v30, %v4941_v44 }
 0x33a   : > { %v7021_v24 = vpop.permute.xlu1 %7020  ;;  %7122 = vrot.lane.b32.xlu1 %v11352_v60, %s7922_s29  ;;  %7116 = vrot.lane.b32.xlu0 %v11355_v15, %s7922_s29 }
 0x33b   : > { %v11363_v29 = vadd.f32 %v4997_v28, %v4986_v38  ;;  %v7046_v46 = vsel %vm617_vm7, %v7021_v24, %v7023_v43  ;;  %v7033_v23 = vpop.permute.xlu0 %7032 }
 0x33c   : > { %v11393_v56 = vmax.f32 %v11786_v59, %v7046_v46  ;;  %v7050_v31 = vsel %vm617_vm7, %v7031_v26, %v7033_v23 }
 0x33d   : > { %v11410_v43 = vmax.f32 %v11790_v0, %v7050_v31 }
 0x33e   : > { %v7019_v33 = vpop.permute.xlu1 %7018  ;;  %7108 = vrot.lane.b32.xlu1 %v11366_v25, %s7922_s29 }
 0x33f   : > { %v7044_v40 = vsel %vm617_vm7, %v7017_v20, %v7019_v33  ;;  %v7045_v30 = vsel %vm617_vm7, %v7019_v33, %v7021_v24  ;;  %v11787_v20 = vld [vmem:[#allocation18_spill] sm:$0xff]  ;;  %v11792_v24 = vld [vmem:[#allocation24_spill] sm:$0xff] }
 0x340   : > { %v11373_v32 = vmax.f32 %v11782_v49, %v7044_v40  ;;  %v11376_v6 = vmax.f32 %v11783_v3, %v7045_v30  ;;  %v11423_v33 = vmax.f32 %v11792_v24, %v11253_v41  ;;  %v11794_v40 = vld [vmem:[#allocation40_spill] sm:$0xff]  ;;  %v7039_v3 = vpop.permute.xlu0 %7038 }
 0x342   : > { %v11379_v22 = vpop.permute.xlu1 %3757  ;;  %7112 = vrot.lane.b32.xlu1 %v11376_v6, %s7922_s29  ;;  %7110 = vrot.lane.b32.xlu0 %v11373_v32, %s7922_s29  ;;  %11793 = vst [vmem:[#allocation21_spill] sm:$0xff] %v11423_v33 }
 0x343   : > { %v3774_v62 = vsel %vm1202_vm9, %v11144_v7, %v11379_v22  ;;  %v11788_v7 = vld [vmem:[#allocation27_spill] sm:$0xff] }
 0x344   : > { %v11396_v28 = vmax.f32 %v11787_v20, %v3774_v62  ;;  %v11407_v44 = vmax.f32 %v11789_v37, %v11788_v7 }
 0x346   : > { %v3817_v45 = vmax.f32 %v11158_v52, %v11396_v28  ;;  %v7037_v18 = vpop.permute.xlu1 %7036  ;;  %4884 = vrot.lane.b32.xlu0 %v11390_v9, %s7922_s29  ;;  %7114 = vrot.lane.b32.xlu1 %v11393_v56, %s7922_s29 }
 0x347   : > { %v7053_v41 = vsel %vm617_vm7, %v7037_v18, %v7039_v3 }
 0x348   : > { %v3861_v8 = vmul.f32 %v11137_v42, %v3817_v45  ;;  %v11449_v35 = vmax.f32 %v11108_v36, %v7053_v41 }
 0x34a   : > { %v7035_v26 = vpop.permute.xlu1 %7034  ;;  %3759 = vrot.lane.b32.xlu1 %v11407_v44, %s7922_s29  ;;  %7124 = vrot.lane.b32.xlu0 %v11410_v43, %s7922_s29  ;;  %v11418_v52 = vadd.f32 %v11196_v55, %v3861_v8  ;;  %v11796_v55 = vld [vmem:[#allocation26_spill] sm:$0xff]  ;;  %11801 = vst [vmem:[#allocation28_spill] sm:$0xff] %v11449_v35 }
 0x34b   : > { %v7051_v38 = vsel %vm617_vm7, %v7033_v23, %v7035_v26  ;;  %v7052_v42 = vsel %vm617_vm7, %v7035_v26, %v7037_v18  ;;  %v11435_v49 = vmax.f32 %v11796_v55, %v11243_v1  ;;  %v11799_v23 = vld [vmem:[#allocation41_spill] sm:$0xff] }
 0x34c   : > { %11791 = vst [vmem:[#allocation22_spill] sm:$0xff] %v11418_v52  ;;  %v11426_v30 = vmax.f32 %v11794_v40, %v7051_v38  ;;  %v11438_v46 = vmax.f32 %v11134_v13, %v7052_v42  ;;  %v11446_v62 = vmax.f32 %v11799_v23, %v7039_v3  ;;  %v7586_v3 = vld [vmem:[%s11634_s2 + $0x2] ss:$4 sm:$0x3f] }
 0x34d   : > { %11797 = vst [vmem:[#allocation19_spill] sm:$0xff] %v11435_v49  ;;  %v11802_v52 = vld [vmem:[#allocation11_spill] sm:$0xff] }
 0x34e   : > { %11795 = vst [vmem:[#allocation20_spill] sm:$0xff] %v11426_v30  ;;  %6006 = vrot.lane.b32.xlu1 %v11423_v33, %s7922_s29  ;;  %7126 = vrot.lane.b32.xlu0 %v11426_v30, %s7922_s29  ;;  %11798 = vst [vmem:[#allocation23_spill] sm:$0xff] %v11438_v46 }
 0x34f   : > { %11800 = vst [vmem:[#allocation25_spill] sm:$0xff] %v11446_v62 }
 0x352   : > { %6008 = vrot.lane.b32.xlu1 %v11435_v49, %s7922_s29  ;;  %7128 = vrot.lane.b32.xlu0 %v11438_v46, %s7922_s29  ;;  %v5979_v2 = vpop.permute.xlu1 %5978 }
 0x356   : > { %7132 = vrot.lane.b32.xlu1 %v11446_v62, %s7922_s29  ;;  %7130 = vrot.lane.b32.xlu0 %v11449_v35, %s7922_s29  ;;  %v5981_v13 = vpop.permute.xlu0 %5980  ;;  %v5983_v20 = vpop.permute.xlu1 %5982 }
 0x357   : > { %v6011_v8 = vsel %vm1202_vm9, %v5981_v13, %v5983_v20  ;;  %v6010_v40 = vsel %vm1202_vm9, %v5979_v2, %v5981_v13  ;;  %v6074_v2 = vrot.slane %v7586_v3, %v11057_v19 }
 0x358   : > { %v6041_v55 = vmax.f32 %v11181_v21, %v6011_v8 }
 0x35a   : > { %v5995_v1 = vpop.permute.xlu0 %5994 }
 0x35d   : > { %v5997_v31 = vpop.permute.xlu1 %5996 }
 0x35e   : > { %v5999_v59 = vpop.permute.xlu0 %5998 }
 0x362   : > { %v5985_v45 = vpop.permute.xlu0 %5984 }
 0x363   : > { %v6012_v26 = vsel %vm1202_vm9, %v5983_v20, %v5985_v45 }
 0x364   : > { %v6042_v41 = vmax.f32 %v11184_v27, %v6012_v26 }
 0x365   : > { %v5987_v18 = vpop.permute.xlu1 %5986 }
 0x366   : > { %v5993_v7 = vpop.permute.xlu0 %5992  ;;  %v6013_v0 = vsel %vm1202_vm9, %v5985_v45, %v5987_v18  ;;  %v6040_v45 = vmax.f32 %v11172_v14, %v6010_v40  ;;  %v11483_v40 = vrot.slane %v7586_v3, %v11113_v48 }
 0x367   : > { %v6043_v24 = vmax.f32 %v11214_v57, %v6013_v0  ;;  %v11470_v57 = vrot.slane %v7586_v3, %v11068_v54  ;;  %v6047_v30 = vmax.f32 %v11802_v52, %v5993_v7 }
 0x368   : > { %v6056_v21 = vmax.f32 %v6040_v45, %v6042_v41 }
 0x369   : > { %v5989_v37 = vpop.permute.xlu1 %5988  ;;  %v6057_v13 = vmax.f32 %v6041_v55, %v6043_v24 }
 0x36a   : > { %v5991_v36 = vpop.permute.xlu0 %5990  ;;  %v6014_v38 = vsel %vm1202_vm9, %v5987_v18, %v5989_v37  ;;  %v11474_v18 = vrot.slane %v7586_v3, %v11101_v10  ;;  %v6101_v26 = vmul.f32 %v6074_v2, %v6056_v21 }
 0x36b   : > { %v6044_v23 = vmax.f32 %v11220_v17, %v6014_v38  ;;  %v6015_v35 = vsel %vm1202_vm9, %v5989_v37, %v5991_v36  ;;  %v6102_v37 = vmul.f32 %v11470_v57, %v6057_v13  ;;  %v6016_v14 = vsel %vm1202_vm9, %v5991_v36, %v5993_v7 }
 0x36c   : > { %v6045_v27 = vmax.f32 %v11232_v34, %v6015_v35  ;;  %v11489_v36 = vrot.slane %v7586_v3, %v11119_v63 }
 0x36d   : > { %v6001_v42 = vpop.permute.xlu1 %6000  ;;  %v6058_v0 = vmax.f32 %v6042_v41, %v6044_v23  ;;  %v6113_v62 = vadd.f32 %v6102_v37, %v6101_v26  ;;  %v6046_v41 = vmax.f32 %v11235_v39, %v6016_v14  ;;  %v6017_v39 = vsel %vm1202_vm9, %v5995_v1, %v5997_v31  ;;  %v11803_v14 = vld [vmem:[#allocation15_spill] sm:$0xff]  ;;  %v11804_v26 = vld [vmem:[#allocation14_spill] sm:$0xff] }
 0x36e   : > { %v6003_v20 = vpop.permute.xlu0 %6002  ;;  %v6059_v55 = vmax.f32 %v6043_v24, %v6045_v27  ;;  %v6061_v33 = vmax.f32 %v6045_v27, %v6047_v30  ;;  %v6019_v24 = vsel %vm1202_vm9, %v5999_v59, %v6001_v42  ;;  %v6018_v30 = vsel %vm1202_vm9, %v5997_v31, %v5999_v59 }
 0x36f   : > { %v6103_v38 = vmul.f32 %v11474_v18, %v6058_v0  ;;  %v6060_v21 = vmax.f32 %v6044_v23, %v6046_v41  ;;  %v11492_v0 = vrot.slane %v7586_v3, %v11122_v53  ;;  %v6050_v3 = vmax.f32 %v11803_v14, %v6019_v24  ;;  %v11805_v41 = vld [vmem:[#allocation12_spill] sm:$0xff] }
 0x370   : > { %v6104_v35 = vmul.f32 %v11483_v40, %v6059_v55  ;;  %v11807_v24 = vld [vmem:[#allocation16_spill] sm:$0xff] }
 0x371   : > { %v11477_v8 = vpop.permute.xlu1 %6004  ;;  %v6114_v34 = vadd.f32 %v6113_v62, %v6103_v38  ;;  %v6020_v62 = vsel %vm1202_vm9, %v6001_v42, %v6003_v20  ;;  %v6105_v23 = vmul.f32 %v11489_v36, %v6060_v21  ;;  %v6106_v27 = vmul.f32 %v11492_v0, %v6061_v33  ;;  %v11806_v42 = vld [vmem:[#allocation13_spill] sm:$0xff] }
 0x372   : > { %v6021_v52 = vsel %vm1202_vm9, %v6003_v20, %v11477_v8  ;;  %v6048_v38 = vmax.f32 %v11804_v26, %v6017_v39  ;;  %v11509_v1 = vmax.f32 %v11805_v41, %v6020_v62  ;;  %v7665_v20 = vld [vmem:[%s11634_s2 + $0x3] ss:$4 sm:$0x3f]  ;;  %v6049_v14 = vmax.f32 %v11807_v24, %v6018_v30 }
 0x373   : > { %v6115_v37 = vadd.f32 %v6114_v34, %v6104_v35  ;;  %v11512_v34 = vmax.f32 %v11806_v42, %v6021_v52  ;;  %v11522_v39 = vrot.slane %v7665_v20, %v11057_v19  ;;  %v11536_v42 = vrot.slane %v7665_v20, %v11113_v48 }
 0x374   : > { %v6062_v59 = vmax.f32 %v6048_v38, %v6050_v3 }
 0x375   : > { %v6116_v55 = vadd.f32 %v6115_v37, %v6105_v23  ;;  %v6117_v37 = vsel %vm2079_vm3, %v6106_v27, 0.0  ;;  %v6063_v23 = vmax.f32 %v6049_v14, %v11509_v1  ;;  %v6064_v26 = vmax.f32 %v6050_v3, %v11512_v34 }
 0x376   : > { %v11533_v27 = vrot.slane %v7665_v20, %v11101_v10 }
 0x377   : > { %v6118_v52 = vadd.f32 %v6117_v37, %v6116_v55  ;;  %v6108_v14 = vmul.f32 %v11470_v57, %v6063_v23  ;;  %v11548_v48 = vmul.f32 %v11474_v18, %v6064_v26 }
 0x3a0   : > { %v7103_v17 = vpop.permute.xlu0 %7102  ;;  %v7105_v45 = vpop.permute.xlu1 %7104 }
 0x3a1   : > { %v7134_v33 = vsel %vm1202_vm9, %v7103_v17, %v7105_v45  ;;  %v11530_v17 = vrot.slane %v7665_v20, %v11068_v54 }
 0x3a2   : > { %v7164_v30 = vmax.f32 %v11315_v16, %v7134_v33 }
 0x3a4   : > { %v7107_v46 = vpop.permute.xlu0 %7106 }
 0x3a5   : > { %v7135_v41 = vsel %vm1202_vm9, %v7105_v45, %v7107_v46 }
 0x3a6   : > { %v7165_v16 = vmax.f32 %v11318_v47, %v7135_v41 }
 0x3a8   : > { %v7119_v13 = vpop.permute.xlu1 %7118  ;;  %v11495_v49 = vpop.permute.xlu0 %7120 }
 0x3ac   : > { %v11501_v7 = vpop.permute.xlu1 %7122  ;;  %v7117_v35 = vpop.permute.xlu0 %7116 }
 0x3b0   : > { %v7109_v21 = vpop.permute.xlu1 %7108 }
 0x3b1   : > { %v7136_v31 = vsel %vm1202_vm9, %v7107_v46, %v7109_v21  ;;  %v11541_v46 = vrot.slane %v7665_v20, %v11119_v63  ;;  %v7141_v63 = vsel %vm1202_vm9, %v7119_v13, %v11495_v49 }
 0x3b2   : > { %v7166_v62 = vmax.f32 %v11326_v58, %v7136_v31  ;;  %v6107_v58 = vmul.f32 %v6074_v2, %v6062_v59  ;;  %v11551_v2 = vrot.slane %v7665_v20, %v11122_v53 }
 0x3b4   : > { %v7113_v38 = vpop.permute.xlu1 %7112  ;;  %v7111_v19 = vpop.permute.xlu0 %7110  ;;  %v7180_v45 = vmax.f32 %v7164_v30, %v7166_v62  ;;  %v6119_v24 = vadd.f32 %v6118_v52, %v6107_v58  ;;  %v11808_v52 = vld [vmem:[#allocation37_spill] sm:$0xff] }
 0x3b5   : > { %v7137_v55 = vsel %vm1202_vm9, %v7109_v21, %v7111_v19  ;;  %v7138_v3 = vsel %vm1202_vm9, %v7111_v19, %v7113_v38  ;;  %v7171_v21 = vmax.f32 %v11355_v15, %v7117_v35  ;;  %v7172_v19 = vmax.f32 %v11335_v61, %v7141_v63 }
 0x3b6   : > { %v7167_v54 = vmax.f32 %v11366_v25, %v7137_v55  ;;  %v7168_v10 = vmax.f32 %v11373_v32, %v7138_v3  ;;  %v7225_v53 = vmul.f32 %v11522_v39, %v7180_v45  ;;  %v6120_v37 = vadd.f32 %v6119_v24, %v6108_v14 }
 0x3b7   : > { %v7142_v55 = vsel %vm1202_vm9, %v11495_v49, %v11501_v7 }
 0x3b8   : > { %v7181_v47 = vmax.f32 %v7165_v16, %v7167_v54  ;;  %v7182_v59 = vmax.f32 %v7166_v62, %v7168_v10  ;;  %v7115_v33 = vpop.permute.xlu1 %7114  ;;  %v4885_v25 = vpop.permute.xlu0 %4884 }
 0x3b9   : > { %v7139_v32 = vsel %vm1202_vm9, %v7113_v38, %v7115_v33  ;;  %v7140_v31 = vsel %vm1202_vm9, %v7115_v33, %v7117_v35  ;;  %v4899_v57 = vsel %vm1202_vm9, %v11332_v50, %v4885_v25  ;;  %v4931_v18 = vmax.f32 %v11390_v9, %v4885_v25  ;;  %v11811_v25 = vld [vmem:[#allocation17_spill] sm:$0xff] }
 0x3ba   : > { %v7226_v20 = vmul.f32 %v11530_v17, %v7181_v47  ;;  %v7169_v13 = vmax.f32 %v11376_v6, %v7139_v32  ;;  %v7170_v15 = vmax.f32 %v11393_v56, %v7140_v31  ;;  %v7227_v62 = vmul.f32 %v11533_v27, %v7182_v59 }
 0x3bb   : > { %v4930_v23 = vmax.f32 %v11808_v52, %v4899_v57  ;;  %v4943_v35 = vmax.f32 %v11343_v11, %v4931_v18 }
 0x3bc   : > { %v7237_v26 = vadd.f32 %v7226_v20, %v7225_v53  ;;  %v7183_v41 = vmax.f32 %v7167_v54, %v7169_v13  ;;  %v7184_v50 = vmax.f32 %v7168_v10, %v7170_v15  ;;  %v7185_v30 = vmax.f32 %v7169_v13, %v7171_v21  ;;  %v3760_v9 = vpop.permute.xlu1 %3759  ;;  %v7125_v38 = vpop.permute.xlu0 %7124  ;;  %v11809_v54 = vld [vmem:[#allocation8_spill] sm:$0xff]  ;;  %v11810_v21 = vld [vmem:[#allocation9_spill] sm:$0xff]  ;;  %v11813_v20 = vld [vmem:[#allocation10_spill] sm:$0xff] }
 0x3bd   : > { %v4942_v58 = vmax.f32 %v11308_v51, %v4930_v23  ;;  %v3775_v6 = vsel %vm1202_vm9, %v11379_v22, %v3760_v9  ;;  %v3807_v56 = vmax.f32 %v11407_v44, %v3760_v9  ;;  %v4988_v16 = vmul.f32 %v11295_v12, %v4943_v35  ;;  %v11814_v35 = vld [vmem:[#allocation19_spill] sm:$0xff] }
 0x3be   : > { %v7238_v11 = vadd.f32 %v7237_v26, %v7227_v62  ;;  %v7228_v3 = vmul.f32 %v11536_v42, %v7183_v41  ;;  %v7230_v45 = vmul.f32 %v11551_v2, %v7185_v30  ;;  %v3806_v51 = vmax.f32 %v11809_v54, %v3775_v6  ;;  %v11815_v30 = vld [vmem:[#allocation21_spill] sm:$0xff]  ;;  %v11817_v6 = vld [vmem:[#allocation22_spill] sm:$0xff] }
 0x3bf   : > { %v4987_v61 = vmul.f32 %v11298_v5, %v4942_v58  ;;  %v7143_v22 = vsel %vm1202_vm9, %v11501_v7, %v7125_v38  ;;  %v7229_v44 = vmul.f32 %v11541_v46, %v7184_v50  ;;  %v3819_v24 = vmax.f32 %v11396_v28, %v3807_v56  ;;  %v11818_v54 = vld [vmem:[#allocation25_spill] sm:$0xff] }
 0x3c0   : > { %v7239_v10 = vadd.f32 %v7238_v11, %v7228_v3  ;;  %v7174_v49 = vmax.f32 %v11352_v60, %v7143_v22  ;;  %v6007_v14 = vpop.permute.xlu1 %6006  ;;  %v7127_v63 = vpop.permute.xlu0 %7126  ;;  %v7173_v12 = vmax.f32 %v11338_v4, %v7142_v55  ;;  %v3818_v47 = vmax.f32 %v11810_v21, %v3806_v51  ;;  %v11812_v60 = vld [vmem:[#allocation5_spill] sm:$0xff] }
 0x3c1   : > { %v6022_v5 = vsel %vm1202_vm9, %v11477_v8, %v6007_v14  ;;  %v7144_v59 = vsel %vm1202_vm9, %v7125_v38, %v7127_v63  ;;  %v7241_v28 = vsel %vm2079_vm3, %v7230_v45, 0.0  ;;  %v4999_v18 = vadd.f32 %v11363_v29, %v4987_v61 }
 0x3c2   : > { %v7240_v33 = vadd.f32 %v7239_v10, %v7229_v44  ;;  %v7186_v7 = vmax.f32 %v7172_v19, %v7174_v49  ;;  %v6053_v32 = vmax.f32 %v11811_v25, %v6022_v5  ;;  %v7175_v31 = vmax.f32 %v11410_v43, %v7144_v59 }
 0x3c3   : > { %v3862_v57 = vmul.f32 %v11812_v60, %v3818_v47  ;;  %v5000_v4 = vsel %vm2079_vm3, %v4988_v16, 0.0  ;;  %v3863_v13 = vmul.f32 %v11813_v20, %v3819_v24  ;;  %v6121_v38 = vadd.f32 %v6120_v37, %v11548_v48 }
 0x3c4   : > { %v7242_v53 = vadd.f32 %v7241_v28, %v7240_v33  ;;  %v6065_v8 = vmax.f32 %v11509_v1, %v6053_v32  ;;  %v7187_v15 = vmax.f32 %v7173_v12, %v7175_v31  ;;  %v6009_v62 = vpop.permute.xlu1 %6008  ;;  %v7129_v52 = vpop.permute.xlu0 %7128  ;;  %v5001_v26 = vadd.f32 %v5000_v4, %v4999_v18  ;;  %v11816_v1 = vld [vmem:[#allocation20_spill] sm:$0xff] }
 0x3c5   : > { %v6023_v23 = vsel %vm1202_vm9, %v6007_v14, %v6009_v62  ;;  %v6055_v43 = vmax.f32 %v11814_v35, %v6009_v62  ;;  %v7145_v41 = vsel %vm1202_vm9, %v7127_v63, %v7129_v52  ;;  %v7231_v50 = vmul.f32 %v11522_v39, %v7186_v7  ;;  %v11820_v14 = vld [vmem:[#allocation28_spill] sm:$0xff] }
 0x3c6   : > { %v6110_v29 = vmul.f32 %v11483_v40, %v6065_v8  ;;  %v6054_v9 = vmax.f32 %v11815_v30, %v6023_v23  ;;  %5002 = vadd.xlane.f32.xlu1 %v5001_v26  ;;  %v7176_v58 = vmax.f32 %v11816_v1, %v7145_v41  ;;  %v3875_v56 = vadd.f32 %v11817_v6, %v3862_v57 }
 0x3c7   : > { %v6067_v19 = vmax.f32 %v6053_v32, %v6055_v43  ;;  %v7243_v55 = vadd.f32 %v7242_v53, %v7231_v50  ;;  %v7232_v11 = vmul.f32 %v11530_v17, %v7187_v15  ;;  %v3876_v39 = vsel %vm2079_vm3, %v3863_v13, 0.0 }
 0x3c8   : > { %v6066_v3 = vmax.f32 %v11512_v34, %v6054_v9  ;;  %v7133_v16 = vpop.permute.xlu1 %7132  ;;  %v7131_v45 = vpop.permute.xlu0 %7130  ;;  %v7188_v61 = vmax.f32 %v7174_v49, %v7176_v58  ;;  %v3877_v37 = vadd.f32 %v3876_v39, %v3875_v56  ;;  %v6122_v10 = vadd.f32 %v6121_v38, %v6110_v29  ;;  %v11819_v34 = vld [vmem:[#allocation23_spill] sm:$0xff] }
 0x3c9   : > { %v6112_v40 = vmul.f32 %v11492_v0, %v6067_v19  ;;  %v7179_v48 = vmax.f32 %v11818_v54, %v7133_v16  ;;  %v7146_v22 = vsel %vm1202_vm9, %v7129_v52, %v7131_v45  ;;  %v7147_v44 = vsel %vm1202_vm9, %v7131_v45, %v7133_v16 }
 0x3ca   : > { %v6111_v51 = vmul.f32 %v11489_v36, %v6066_v3  ;;  %v7233_v17 = vmul.f32 %v11533_v27, %v7188_v61  ;;  %3878 = vadd.xlane.f32.xlu0 %v3877_v37  ;;  %v7177_v24 = vmax.f32 %v11819_v34, %v7146_v22  ;;  %v7178_v63 = vmax.f32 %v11820_v14, %v7147_v44 }
 0x3cb   : > { %v7244_v12 = vadd.f32 %v7243_v55, %v7232_v11  ;;  %v6124_v5 = vsel %vm2079_vm3, %v6112_v40, 0.0  ;;  %v11821_v56 = vlaneseq  ;;  %v7265_v11 = vstv %s7264_s7 }
 0x3cc   : > { %v6123_v0 = vadd.f32 %v6122_v10, %v6111_v51  ;;  %v7189_v49 = vmax.f32 %v7175_v31, %v7177_v24  ;;  %v7190_v21 = vmax.f32 %v7176_v58, %v7178_v63  ;;  %v7191_v47 = vmax.f32 %v7177_v24, %v7179_v48 }
 0x3cd   : > { %v7245_v59 = vadd.f32 %v7244_v12, %v7233_v17  ;;  %v205_v55 = vand.u32 127, %v11821_v56 }
 0x3ce   : > { %v6125_v36 = vadd.f32 %v6124_v5, %v6123_v0  ;;  %v7234_v33 = vmul.f32 %v11536_v42, %v7189_v49  ;;  %v7236_v7 = vmul.f32 %v11551_v2, %v7191_v47  ;;  %v7235_v27 = vmul.f32 %v11541_v46, %v7190_v21 }
 0x3cf   : > { %vm7260_vm11 = vcmp.eq.s32.totalorder %v205_v55, 0 }
 0x3d0   : > { %6126 = vadd.xlane.f32.xlu0 %v6125_v36  ;;  %v7246_v25 = vadd.f32 %v7245_v59, %v7234_v33  ;;  %v7248_v28 = vsel %vm2079_vm3, %v7236_v7, 0.0 }
 0x3d2   : > { %v7247_v32 = vadd.f32 %v7246_v25, %v7235_v27 }
 0x3d4   : > { %v7249_v60 = vadd.f32 %v7248_v28, %v7247_v32 }
 0x3d6   : > { %7250 = vadd.xlane.f32.xlu0 %v7249_v60 }
 0x44f   : > { %v5003_v31 = vpop.xlane.xlu1 %5002 }
 0x450   : > { %v5004_v57 = vrot.slane %v5003_v31, 4 }
 0x452   : > { %v5005_v18 = vadd.f32 %v5004_v57, %v5003_v31 }
 0x453   : > { %v3879_v4 = vpop.xlane.xlu0 %3878 }
 0x454   : > { %v5006_v53 = vrot.slane %v5005_v18, 2  ;;  %v3880_v20 = vrot.slane %v3879_v4, 4 }
 0x456   : > { %v3881_v13 = vadd.f32 %v3880_v20, %v3879_v4  ;;  %v5007_v8 = vadd.f32 %v5006_v53, %v5005_v18 }
 0x458   : > { %v3882_v42 = vrot.slane %v3881_v13, 2  ;;  %v5008_v46 = vrot.slane %v5007_v8, 1 }
 0x459   : > { %v6127_v15 = vpop.xlane.xlu0 %6126 }
 0x45a   : > { %v6128_v2 = vrot.slane %v6127_v15, 4  ;;  %v3883_v62 = vadd.f32 %v3882_v42, %v3881_v13  ;;  %v5009_v26 = vadd.f32 %v5008_v46, %v5007_v8 }
 0x45c   : > { %v6129_v52 = vadd.f32 %v6128_v2, %v6127_v15  ;;  %v3884_v23 = vrot.slane %v3883_v62, 1 }
 0x45e   : > { %v6130_v35 = vrot.slane %v6129_v52, 2  ;;  %v3885_v43 = vadd.f32 %v3884_v23, %v3883_v62 }
 0x45f   : > { %v7251_v41 = vpop.xlane.xlu0 %7250 }
 0x460   : > { %v6131_v50 = vadd.f32 %v6130_v35, %v6129_v52  ;;  %7669 = vpush %v3885_v43  ;;  %v7252_v29 = vrot.slane %v7251_v41, 4 }
 0x461   : > { %7671 = vpush %v5009_v26 }
 0x462   : > { %v6132_v30 = vrot.slane %v6131_v50, 1  ;;  %v7253_v9 = vadd.f32 %v7252_v29, %v7251_v41 }
 0x464   : > { %v6133_v38 = vadd.f32 %v6132_v30, %v6131_v50  ;;  %v7254_v19 = vrot.slane %v7253_v9, 2 }
 0x466   : > { %7673 = vpush %v6133_v38  ;;  %v7255_v1 = vadd.f32 %v7254_v19, %v7253_v9 }
 0x468   : > { %v7256_v58 = vrot.slane %v7255_v1, 1 }
 0x46a   : > { %v7257_v6 = vadd.f32 %v7256_v58, %v7255_v1 }
 0x46c   : > { %7675 = vpush %v7257_v6 }
 0x491   : > { %s7670_s5 = spop %7669 }
 0x492   : > { %s7672_s6 = spop %7671 }
 0x493   : > { %s5011_s9 = sadd.f32 %s7672_s6, %s7670_s5 }
 0x497   : > { %s7674_s8 = spop %7673 }
 0x498   : > { %s6135_s10 = sadd.f32 %s7674_s8, %s5011_s9 }
 0x49d   : > { %s7676_s11 = spop %7675 }
 0x49e   : > { %s7259_s12 = sadd.f32 %s7676_s11, %s6135_s10 }
 0x4a0   : > { %v7261_v3 = vstv %s7259_s12 }
 0x4a1   : > { %v7262_v16 = vsel %vm7260_vm11, %v7261_v3, 0.0 }
 0x4a2   : > { %v7266_v39 = vadd.f32 %v7265_v11, %v7262_v16 }
 0x4a4   : > { %7268 = vst.msk [vmem:[%s194_s15] sm:$0x1] %vm7267_vm12, %v7266_v39 }
 0x4a5 PF: > { %s15_s17 = sadd.s32 1, %s7912_s17  }
 0x4a6   : > { %p12_p4 = scmp.ge.s32.totalorder %s15_s17, 4  }
 0x4a8   :  { %14 = sbr.rel (!%p12_p4) target bundleno = 2 (0x2), region = 71 }

</bundles_post_ra>
